<compile_context>
chip_gen: v5e
topology: v5e:2x2
jax: 0.10.0
libtpu: 0.0.40
codegen_flags: <defaults>
</compile_context>

<pallas_src>
import functools
import math

import jax
import jax.numpy as jnp
import numpy as np
from jax import lax
from jax.experimental import pallas as pl
from jax.experimental.pallas import tpu as pltpu

EPS = 1e-7


# ----------------------------- Pallas kernel -------------------------------
def _nce_loss_kernel(
    # inputs
    cidx_ref,      # SMEM (B*(K+1),) int32 contrast indices (col 0 = positive)
    yidx_ref,      # SMEM (B,)       int32 positive indices (memory update)
    mem_s_ref,     # VMEM (n_data, D) bank scored against f_s  (= memory_v2)
    mem_t_ref,     # VMEM (n_data, D) bank scored against f_t  (= memory_v1)
    fs_ref,        # VMEM (B, D) student features
    ft_ref,        # VMEM (B, D) teacher features
    # outputs
    loss_ref,      # VMEM (1, 1) f32
    upd_m1_ref,    # VMEM (B, D) updated rows for memory_v1 (momentum w/ f_s)
    upd_m2_ref,    # VMEM (B, D) updated rows for memory_v2 (momentum w/ f_t)
    # scratch
    w_s_scr,       # VMEM (K_TILE, D) f32 gathered tile of mem_s
    w_t_scr,       # VMEM (K_TILE, D) f32 gathered tile of mem_t
    scores_s,      # VMEM (B, K1) f32 cached scores/T (student side)
    scores_t,      # VMEM (B, K1) f32 cached scores/T (teacher side)
    *, inv_T, n_data, B, K1, K_TILE, NK, momentum):

  f32 = jnp.float32
  # contract on D: (1, D) x (K_TILE, D) -> (1, K_TILE), lane-dense, on the MXU.
  dn = (((1,), (1,)), ((), ()))

  # ---- pass 1: gather + lane-dense scores, cached in the (B, K1) scratch ----
  # Batch loop is folded into the kernel (statically unrolled; no grid steps).
  for b in range(B):
    fs_row = fs_ref[pl.ds(b, 1), :].astype(f32)     # (1, D)
    ft_row = ft_ref[pl.ds(b, 1), :].astype(f32)     # (1, D)
    for kt in range(NK):                            # NK * K_TILE == K1
      k0 = kt * K_TILE
      # Per-row dynamic sublane gather of the VMEM-resident banks.
      # TODO(synk): HBM-resident banks -> per-row async DMA gather instead.
      for j in range(K_TILE):                       # static unroll, <= 128
        row = cidx_ref[b * K1 + k0 + j]
        w_s_scr[pl.ds(j, 1), :] = mem_s_ref[pl.ds(row, 1), :].astype(f32)
        w_t_scr[pl.ds(j, 1), :] = mem_t_ref[pl.ds(row, 1), :].astype(f32)
      ss = lax.dot_general(fs_row, w_s_scr[...], dn,
                           preferred_element_type=f32) * inv_T   # (1, K_TILE)
      st = lax.dot_general(ft_row, w_t_scr[...], dn,
                           preferred_element_type=f32) * inv_T   # (1, K_TILE)
      scores_s[pl.ds(b, 1), pl.ds(k0, K_TILE)] = ss
      scores_t[pl.ds(b, 1), pl.ds(k0, K_TILE)] = st

  # ---- pass 2: Z + NCE criterion, one vectorized sweep over (B, K1) ---------
  m_neg = K1 - 1
  Pn = 1.0 / float(n_data)
  c = float(m_neg) * Pn + EPS
  coef = float(B * K1) / float(n_data)
  const = float(B) * float(m_neg) * math.log(float(m_neg) * Pn)

  def modality_acc(scores_ref):
    s = scores_ref[...]                                        # (B, K1) f32
    m_max = jnp.max(jnp.max(s, axis=1, keepdims=True),
                    axis=0, keepdims=True)                     # (1, 1)
    e = jnp.exp(s - m_max)                                     # (B, K1)
    l_sum = jnp.sum(jnp.sum(e, axis=1, keepdims=True),
                    axis=0, keepdims=True)                     # (1, 1)
    # p = exp(s/T) / Z,  Z = mean(exp(s/T)) * n_data  (first-call semantics)
    #   = exp(s/T - M) * (B*K1) / (n_data * sum(exp(s/T - M)))
    p = e * (coef / l_sum)                                     # (B, K1)
    lpos = jnp.sum(jnp.log(p[:, 0:1]), axis=0, keepdims=True)  # positives
    lsum = jnp.sum(jnp.sum(jnp.log(p + c), axis=1, keepdims=True),
                   axis=0, keepdims=True)
    # criterion (log form): sum_b log p0 + B*m*log(m*Pn) - sum_{b,k} log(p + c)
    return lpos - lsum + const

  loss = -(modality_acc(scores_s) + modality_acc(scores_t)) * (1.0 / float(B))
  loss_ref[...] = loss.astype(loss_ref.dtype)

  # ---- fused memory-bank momentum update + L2 renorm ------------------------
  # Stage the OLD positive bank rows straight into the output refs (no concat),
  # then do the momentum + rsqrt renorm vectorized over (B, D).
  for i in range(B):
    row = yidx_ref[i]
    upd_m1_ref[pl.ds(i, 1), :] = mem_t_ref[pl.ds(row, 1), :]   # memory_v1[y]
    upd_m2_ref[pl.ds(i, 1), :] = mem_s_ref[pl.ds(row, 1), :]   # memory_v2[y]

  new_v1 = (upd_m1_ref[...].astype(f32) * momentum
            + fs_ref[...].astype(f32) * (1.0 - momentum))
  new_v2 = (upd_m2_ref[...].astype(f32) * momentum
            + ft_ref[...].astype(f32) * (1.0 - momentum))
  upd_m1_ref[...] = (new_v1 * lax.rsqrt(
      jnp.sum(new_v1 * new_v1, axis=1, keepdims=True))).astype(upd_m1_ref.dtype)
  upd_m2_ref[...] = (new_v2 * lax.rsqrt(
      jnp.sum(new_v2 * new_v2, axis=1, keepdims=True))).astype(upd_m2_ref.dtype)


def _pick_k_tile(K1):
  # Largest divisor of K+1 capped at 128 (bounds the gather unroll & scratch).
  for t in (128, 64, 32, 16, 8, 4, 2, 1):
    if K1 % t == 0:
      return t
  return 1


def nce_loss_pallas(contrast_idx, idx, f_s, f_t, memory_v1, memory_v2,
                    *, T, momentum, n_data):
  B, K1 = contrast_idx.shape
  n_rows, D = memory_v1.shape
  k_tile = _pick_k_tile(K1)
  nk = K1 // k_tile

  kernel = functools.partial(
      _nce_loss_kernel, inv_T=1.0 / float(T), n_data=int(n_data), B=int(B),
      K1=int(K1), K_TILE=int(k_tile), NK=int(nk), momentum=float(momentum))

  # Flattened 1-D index table (keeps SMEM footprint small for large nce_k).
  cidx_flat = contrast_idx.reshape(-1).astype(jnp.int32)
  yidx = idx.astype(jnp.int32)
  # NOTE: out-of-range indices are an undetected OOB VMEM read — callers must
  # guarantee 0 <= idx < n_data (matches torch index_select semantics).

  smem_spec = pl.BlockSpec(memory_space=pltpu.MemorySpace.SMEM)
  # Whole-array VMEM residency, no pipelining => no 2x double-buffering of the
  # banks (the review's single-buffer item for v5e/v6e VMEM-resident banks).
  vmem_spec = pl.BlockSpec(memory_space=pltpu.MemorySpace.VMEM)

  # VMEM budget: banks (single-buffered) + features + outputs + scratch.
  # Capped at 48 MiB so it is valid on v7x (64 MiB physical); on v5e/v6e this
  # could be raised toward ~110 MiB for larger VMEM-resident banks, beyond
  # that the HBM + per-row DMA gather path is required (TODO above).
  itemsize = memory_v1.dtype.itemsize
  vmem_est = (2 * n_rows * D * itemsize
              + 2 * B * D * f_s.dtype.itemsize
              + 2 * B * D * itemsize
              + 2 * k_tile * D * 4
              + 2 * B * K1 * 4
              + (2 << 20))
  vmem_limit = int(min(48 * 1024 * 1024, max(16 * 1024 * 1024, vmem_est)))

  loss, upd_m1, upd_m2 = pl.pallas_call(
      kernel,
      out_shape=(jax.ShapeDtypeStruct((1, 1), jnp.float32),
                 jax.ShapeDtypeStruct((B, D), memory_v1.dtype),
                 jax.ShapeDtypeStruct((B, D), memory_v2.dtype)),
      in_specs=[smem_spec, smem_spec,           # contrast idx, y idx
                vmem_spec, vmem_spec,           # memory_v2, memory_v1 banks
                vmem_spec, vmem_spec],          # f_s, f_t
      out_specs=(vmem_spec, vmem_spec, vmem_spec),
      scratch_shapes=[pltpu.VMEM((k_tile, D), jnp.float32),
                      pltpu.VMEM((k_tile, D), jnp.float32),
                      pltpu.VMEM((B, K1), jnp.float32),
                      pltpu.VMEM((B, K1), jnp.float32)],
      compiler_params=pltpu.CompilerParams(vmem_limit_bytes=vmem_limit),
  )(cidx_flat, yidx, memory_v2, memory_v1, f_s, f_t)
  return loss[0, 0], upd_m1, upd_m2


# ----------------------------- wrapper / glue --------------------------------
def nce_loss_forward(f_s, f_t, idx, contrast_idx, memory_v1, memory_v2,
                     *, T, momentum, n_data):
  """Full NCELoss.forward: returns (loss, updated_memory_v1, updated_memory_v2)."""
  loss, upd_m1, upd_m2 = nce_loss_pallas(
      contrast_idx, idx, f_s, f_t, memory_v1, memory_v2,
      T=T, momentum=momentum, n_data=n_data)
  # Per-row momentum + renorm is fused in the kernel; only the index_copy_
  # scatter of the B updated rows remains here.
  new_m1 = memory_v1.at[idx].set(upd_m1)
  new_m2 = memory_v2.at[idx].set(upd_m2)
  return loss, new_m1, new_m2


# ----------------------------- pure-JAX references ---------------------------
def nce_loss_reference(f_s, f_t, contrast_idx, memory_v1, memory_v2, *, T, n_data):
  w_v1 = memory_v1[contrast_idx]
  w_v2 = memory_v2[contrast_idx]
  out_s = jnp.exp(jnp.einsum('bkd,bd->bk', w_v2, f_s) / T)
  out_t = jnp.exp(jnp.einsum('bkd,bd->bk', w_v1, f_t) / T)
  out_s = out_s / (jnp.mean(out_s) * n_data)
  out_t = out_t / (jnp.mean(out_t) * n_data)

  def crit(x):
    B, K1 = x.shape
    m = K1 - 1
    Pn = 1.0 / n_data
    log_d1 = jnp.log(x[:, 0] / (x[:, 0] + m * Pn + EPS))
    log_d0 = jnp.log((m * Pn) / (x[:, 1:] + m * Pn + EPS))
    return -(jnp.sum(log_d1) + jnp.sum(log_d0)) / B

  return crit(out_s) + crit(out_t)


def update_memory_reference(memory, v, y, momentum):
  pos = memory[y] * momentum + v * (1.0 - momentum)
  pos = pos / jnp.sqrt(jnp.sum(pos * pos, axis=1, keepdims=True))
  return memory.at[y].set(pos)


# --------------------------------- main ---------------------------------------
if __name__ == "__main__":
  # opt.feat_dim = 128, n_data = 64, opt.nce_k = 15, opt.nce_t = 0.07, opt.nce_m = 0.5
  B, D, n_data, K = 8, 128, 64, 15
  T, momentum = 0.07, 0.5

  key = jax.random.PRNGKey(0)
  k1, k2, k3, k4, k5 = jax.random.split(key, 5)

  # NCEAverage.__init__: memory ~ U(-stdv, stdv), stdv = 1/sqrt(feat_dim/3)
  stdv = 1.0 / math.sqrt(D / 3.0)
  memory_v1 = jax.random.uniform(k1, (n_data, D), jnp.float32, -stdv, stdv)
  memory_v2 = jax.random.uniform(k2, (n_data, D), jnp.float32, -stdv, stdv)

  f_s = jax.random.normal(k3, (B, D), dtype=jnp.float32)
  f_t = jax.random.normal(k4, (B, D), dtype=jnp.float32)
  idx = jnp.arange(B, dtype=jnp.int32)
  contrast_idx = jax.random.randint(k5, (B, K + 1), 0, n_data, dtype=jnp.int32)
  contrast_idx = contrast_idx.at[:, 0].set(idx)     # column 0 = positive sample

  fwd = jax.jit(functools.partial(
      nce_loss_forward, T=T, momentum=momentum, n_data=n_data))
  loss, new_m1, new_m2 = fwd(f_s, f_t, idx, contrast_idx, memory_v1, memory_v2)
  loss = jax.block_until_ready(loss)
  jax.block_until_ready((new_m1, new_m2))

  # loss check
  ref = nce_loss_reference(f_s, f_t, contrast_idx, memory_v1, memory_v2,
                           T=T, n_data=n_data)
  np.testing.assert_allclose(float(loss), float(ref), rtol=2e-3, atol=2e-3)

  # memory-bank update check (momentum + L2 renorm fused in the kernel)
  ref_m1 = update_memory_reference(memory_v1, f_s, idx, momentum)
  ref_m2 = update_memory_reference(memory_v2, f_t, idx, momentum)
  np.testing.assert_allclose(np.asarray(new_m1), np.asarray(ref_m1),
                             rtol=1e-5, atol=1e-5)
  np.testing.assert_allclose(np.asarray(new_m2), np.asarray(ref_m2),
                             rtol=1e-5, atol=1e-5)

  # TODO(synk): AliasMethod negative sampling (used when contrast_idx is None)
  # is host-side RNG with no Pallas equivalent; contrast_idx is supplied here.
  # TODO(synk): NCEAverage caches Z_v1/Z_v2 after the first batch; here Z is
  # recomputed every call (first-call semantics).
  print("KERNEL_OK")
</pallas_src>

<mosaic_0001>
module attributes {stable_mosaic.version = 11 : i64} {
  func.func @_nce_loss_kernel(%arg0: memref<128xi32, #tpu.memory_space<smem>>, %arg1: memref<8xi32, #tpu.memory_space<smem>>, %arg2: memref<64x128xf32, #tpu.memory_space<vmem>>, %arg3: memref<64x128xf32, #tpu.memory_space<vmem>>, %arg4: memref<8x128xf32, #tpu.memory_space<vmem>>, %arg5: memref<8x128xf32, #tpu.memory_space<vmem>>, %arg6: memref<1x1xf32, #tpu.memory_space<vmem>>, %arg7: memref<8x128xf32, #tpu.memory_space<vmem>>, %arg8: memref<8x128xf32, #tpu.memory_space<vmem>>, %arg9: memref<16x128xf32, #tpu.memory_space<vmem>>, %arg10: memref<16x128xf32, #tpu.memory_space<vmem>>, %arg11: memref<8x16xf32, #tpu.memory_space<vmem>>, %arg12: memref<8x16xf32, #tpu.memory_space<vmem>>) attributes {dimension_semantics = [], scalar_prefetch = 0 : i64, scratch_operands = 4 : i64, tpu.core_type = #tpu.core_type<tc>} {
    %c0 = arith.constant 0 : index
    %c0_0 = arith.constant 0 : index
    %0 = vector.load %arg4[%c0, %c0_0] : memref<8x128xf32, #tpu.memory_space<vmem>>, vector<1x128xf32>
    %c0_1 = arith.constant 0 : index
    %c0_2 = arith.constant 0 : index
    %1 = vector.load %arg5[%c0_1, %c0_2] : memref<8x128xf32, #tpu.memory_space<vmem>>, vector<1x128xf32>
    %c0_3 = arith.constant 0 : index
    %2 = memref.load %arg0[%c0_3] : memref<128xi32, #tpu.memory_space<smem>>
    %3 = arith.index_cast %2 : i32 to index
    %c0_4 = arith.constant 0 : index
    %4 = vector.load %arg2[%3, %c0_4] : memref<64x128xf32, #tpu.memory_space<vmem>>, vector<1x128xf32>
    %c0_5 = arith.constant 0 : index
    %c0_6 = arith.constant 0 : index
    %5 = vector.load %arg9[%c0_5, %c0_6] : memref<16x128xf32, #tpu.memory_space<vmem>>, vector<1x128xf32>
    tpu.vector_store %arg9[%c0_5, %c0_6], %4 {strides = array<i32>} : memref<16x128xf32, #tpu.memory_space<vmem>>, vector<1x128xf32>,
    %6 = arith.index_cast %2 : i32 to index
    %c0_7 = arith.constant 0 : index
    %7 = vector.load %arg3[%6, %c0_7] : memref<64x128xf32, #tpu.memory_space<vmem>>, vector<1x128xf32>
    %c0_8 = arith.constant 0 : index
    %c0_9 = arith.constant 0 : index
    %8 = vector.load %arg10[%c0_8, %c0_9] : memref<16x128xf32, #tpu.memory_space<vmem>>, vector<1x128xf32>
    tpu.vector_store %arg10[%c0_8, %c0_9], %7 {strides = array<i32>} : memref<16x128xf32, #tpu.memory_space<vmem>>, vector<1x128xf32>,
    %c1 = arith.constant 1 : index
    %9 = memref.load %arg0[%c1] : memref<128xi32, #tpu.memory_space<smem>>
    %10 = arith.index_cast %9 : i32 to index
    %c0_10 = arith.constant 0 : index
    %11 = vector.load %arg2[%10, %c0_10] : memref<64x128xf32, #tpu.memory_space<vmem>>, vector<1x128xf32>
    %c1_11 = arith.constant 1 : index
    %c0_12 = arith.constant 0 : index
    %12 = vector.load %arg9[%c1_11, %c0_12] : memref<16x128xf32, #tpu.memory_space<vmem>>, vector<1x128xf32>
    tpu.vector_store %arg9[%c1_11, %c0_12], %11 {strides = array<i32>} : memref<16x128xf32, #tpu.memory_space<vmem>>, vector<1x128xf32>,
    %13 = arith.index_cast %9 : i32 to index
    %c0_13 = arith.constant 0 : index
    %14 = vector.load %arg3[%13, %c0_13] : memref<64x128xf32, #tpu.memory_space<vmem>>, vector<1x128xf32>
    %c1_14 = arith.constant 1 : index
    %c0_15 = arith.constant 0 : index
    %15 = vector.load %arg10[%c1_14, %c0_15] : memref<16x128xf32, #tpu.memory_space<vmem>>, vector<1x128xf32>
    tpu.vector_store %arg10[%c1_14, %c0_15], %14 {strides = array<i32>} : memref<16x128xf32, #tpu.memory_space<vmem>>, vector<1x128xf32>,
    %c2 = arith.constant 2 : index
    %16 = memref.load %arg0[%c2] : memref<128xi32, #tpu.memory_space<smem>>
    %17 = arith.index_cast %16 : i32 to index
    %c0_16 = arith.constant 0 : index
    %18 = vector.load %arg2[%17, %c0_16] : memref<64x128xf32, #tpu.memory_space<vmem>>, vector<1x128xf32>
    %c2_17 = arith.constant 2 : index
    %c0_18 = arith.constant 0 : index
    %19 = vector.load %arg9[%c2_17, %c0_18] : memref<16x128xf32, #tpu.memory_space<vmem>>, vector<1x128xf32>
    tpu.vector_store %arg9[%c2_17, %c0_18], %18 {strides = array<i32>} : memref<16x128xf32, #tpu.memory_space<vmem>>, vector<1x128xf32>,
    %20 = arith.index_cast %16 : i32 to index
    %c0_19 = arith.constant 0 : index
    %21 = vector.load %arg3[%20, %c0_19] : memref<64x128xf32, #tpu.memory_space<vmem>>, vector<1x128xf32>
    %c2_20 = arith.constant 2 : index
    %c0_21 = arith.constant 0 : index
    %22 = vector.load %arg10[%c2_20, %c0_21] : memref<16x128xf32, #tpu.memory_space<vmem>>, vector<1x128xf32>
    tpu.vector_store %arg10[%c2_20, %c0_21], %21 {strides = array<i32>} : memref<16x128xf32, #tpu.memory_space<vmem>>, vector<1x128xf32>,
    %c3 = arith.constant 3 : index
    %23 = memref.load %arg0[%c3] : memref<128xi32, #tpu.memory_space<smem>>
    %24 = arith.index_cast %23 : i32 to index
    %c0_22 = arith.constant 0 : index
    %25 = vector.load %arg2[%24, %c0_22] : memref<64x128xf32, #tpu.memory_space<vmem>>, vector<1x128xf32>
    %c3_23 = arith.constant 3 : index
    %c0_24 = arith.constant 0 : index
    %26 = vector.load %arg9[%c3_23, %c0_24] : memref<16x128xf32, #tpu.memory_space<vmem>>, vector<1x128xf32>
    tpu.vector_store %arg9[%c3_23, %c0_24], %25 {strides = array<i32>} : memref<16x128xf32, #tpu.memory_space<vmem>>, vector<1x128xf32>,
    %27 = arith.index_cast %23 : i32 to index
    %c0_25 = arith.constant 0 : index
    %28 = vector.load %arg3[%27, %c0_25] : memref<64x128xf32, #tpu.memory_space<vmem>>, vector<1x128xf32>
    %c3_26 = arith.constant 3 : index
    %c0_27 = arith.constant 0 : index
    %29 = vector.load %arg10[%c3_26, %c0_27] : memref<16x128xf32, #tpu.memory_space<vmem>>, vector<1x128xf32>
    tpu.vector_store %arg10[%c3_26, %c0_27], %28 {strides = array<i32>} : memref<16x128xf32, #tpu.memory_space<vmem>>, vector<1x128xf32>,
    %c4 = arith.constant 4 : index
    %30 = memref.load %arg0[%c4] : memref<128xi32, #tpu.memory_space<smem>>
    %31 = arith.index_cast %30 : i32 to index
    %c0_28 = arith.constant 0 : index
    %32 = vector.load %arg2[%31, %c0_28] : memref<64x128xf32, #tpu.memory_space<vmem>>, vector<1x128xf32>
    %c4_29 = arith.constant 4 : index
    %c0_30 = arith.constant 0 : index
    %33 = vector.load %arg9[%c4_29, %c0_30] : memref<16x128xf32, #tpu.memory_space<vmem>>, vector<1x128xf32>
    tpu.vector_store %arg9[%c4_29, %c0_30], %32 {strides = array<i32>} : memref<16x128xf32, #tpu.memory_space<vmem>>, vector<1x128xf32>,
    %34 = arith.index_cast %30 : i32 to index
    %c0_31 = arith.constant 0 : index
    %35 = vector.load %arg3[%34, %c0_31] : memref<64x128xf32, #tpu.memory_space<vmem>>, vector<1x128xf32>
    %c4_32 = arith.constant 4 : index
    %c0_33 = arith.constant 0 : index
    %36 = vector.load %arg10[%c4_32, %c0_33] : memref<16x128xf32, #tpu.memory_space<vmem>>, vector<1x128xf32>
    tpu.vector_store %arg10[%c4_32, %c0_33], %35 {strides = array<i32>} : memref<16x128xf32, #tpu.memory_space<vmem>>, vector<1x128xf32>,
    %c5 = arith.constant 5 : index
    %37 = memref.load %arg0[%c5] : memref<128xi32, #tpu.memory_space<smem>>
    %38 = arith.index_cast %37 : i32 to index
    %c0_34 = arith.constant 0 : index
    %39 = vector.load %arg2[%38, %c0_34] : memref<64x128xf32, #tpu.memory_space<vmem>>, vector<1x128xf32>
    %c5_35 = arith.constant 5 : index
    %c0_36 = arith.constant 0 : index
    %40 = vector.load %arg9[%c5_35, %c0_36] : memref<16x128xf32, #tpu.memory_space<vmem>>, vector<1x128xf32>
    tpu.vector_store %arg9[%c5_35, %c0_36], %39 {strides = array<i32>} : memref<16x128xf32, #tpu.memory_space<vmem>>, vector<1x128xf32>,
    %41 = arith.index_cast %37 : i32 to index
    %c0_37 = arith.constant 0 : index
    %42 = vector.load %arg3[%41, %c0_37] : memref<64x128xf32, #tpu.memory_space<vmem>>, vector<1x128xf32>
    %c5_38 = arith.constant 5 : index
    %c0_39 = arith.constant 0 : index
    %43 = vector.load %arg10[%c5_38, %c0_39] : memref<16x128xf32, #tpu.memory_space<vmem>>, vector<1x128xf32>
    tpu.vector_store %arg10[%c5_38, %c0_39], %42 {strides = array<i32>} : memref<16x128xf32, #tpu.memory_space<vmem>>, vector<1x128xf32>,
    %c6 = arith.constant 6 : index
    %44 = memref.load %arg0[%c6] : memref<128xi32, #tpu.memory_space<smem>>
    %45 = arith.index_cast %44 : i32 to index
    %c0_40 = arith.constant 0 : index
    %46 = vector.load %arg2[%45, %c0_40] : memref<64x128xf32, #tpu.memory_space<vmem>>, vector<1x128xf32>
    %c6_41 = arith.constant 6 : index
    %c0_42 = arith.constant 0 : index
    %47 = vector.load %arg9[%c6_41, %c0_42] : memref<16x128xf32, #tpu.memory_space<vmem>>, vector<1x128xf32>
    tpu.vector_store %arg9[%c6_41, %c0_42], %46 {strides = array<i32>} : memref<16x128xf32, #tpu.memory_space<vmem>>, vector<1x128xf32>,
    %48 = arith.index_cast %44 : i32 to index
    %c0_43 = arith.constant 0 : index
    %49 = vector.load %arg3[%48, %c0_43] : memref<64x128xf32, #tpu.memory_space<vmem>>, vector<1x128xf32>
    %c6_44 = arith.constant 6 : index
    %c0_45 = arith.constant 0 : index
    %50 = vector.load %arg10[%c6_44, %c0_45] : memref<16x128xf32, #tpu.memory_space<vmem>>, vector<1x128xf32>
    tpu.vector_store %arg10[%c6_44, %c0_45], %49 {strides = array<i32>} : memref<16x128xf32, #tpu.memory_space<vmem>>, vector<1x128xf32>,
    %c7 = arith.constant 7 : index
    %51 = memref.load %arg0[%c7] : memref<128xi32, #tpu.memory_space<smem>>
    %52 = arith.index_cast %51 : i32 to index
    %c0_46 = arith.constant 0 : index
    %53 = vector.load %arg2[%52, %c0_46] : memref<64x128xf32, #tpu.memory_space<vmem>>, vector<1x128xf32>
    %c7_47 = arith.constant 7 : index
    %c0_48 = arith.constant 0 : index
    %54 = vector.load %arg9[%c7_47, %c0_48] : memref<16x128xf32, #tpu.memory_space<vmem>>, vector<1x128xf32>
    tpu.vector_store %arg9[%c7_47, %c0_48], %53 {strides = array<i32>} : memref<16x128xf32, #tpu.memory_space<vmem>>, vector<1x128xf32>,
    %55 = arith.index_cast %51 : i32 to index
    %c0_49 = arith.constant 0 : index
    %56 = vector.load %arg3[%55, %c0_49] : memref<64x128xf32, #tpu.memory_space<vmem>>, vector<1x128xf32>
    %c7_50 = arith.constant 7 : index
    %c0_51 = arith.constant 0 : index
    %57 = vector.load %arg10[%c7_50, %c0_51] : memref<16x128xf32, #tpu.memory_space<vmem>>, vector<1x128xf32>
    tpu.vector_store %arg10[%c7_50, %c0_51], %56 {strides = array<i32>} : memref<16x128xf32, #tpu.memory_space<vmem>>, vector<1x128xf32>,
    %c8 = arith.constant 8 : index
    %58 = memref.load %arg0[%c8] : memref<128xi32, #tpu.memory_space<smem>>
    %59 = arith.index_cast %58 : i32 to index
    %c0_52 = arith.constant 0 : index
    %60 = vector.load %arg2[%59, %c0_52] : memref<64x128xf32, #tpu.memory_space<vmem>>, vector<1x128xf32>
    %c8_53 = arith.constant 8 : index
    %c0_54 = arith.constant 0 : index
    %61 = vector.load %arg9[%c8_53, %c0_54] : memref<16x128xf32, #tpu.memory_space<vmem>>, vector<1x128xf32>
    tpu.vector_store %arg9[%c8_53, %c0_54], %60 {strides = array<i32>} : memref<16x128xf32, #tpu.memory_space<vmem>>, vector<1x128xf32>,
    %62 = arith.index_cast %58 : i32 to index
    %c0_55 = arith.constant 0 : index
    %63 = vector.load %arg3[%62, %c0_55] : memref<64x128xf32, #tpu.memory_space<vmem>>, vector<1x128xf32>
    %c8_56 = arith.constant 8 : index
    %c0_57 = arith.constant 0 : index
    %64 = vector.load %arg10[%c8_56, %c0_57] : memref<16x128xf32, #tpu.memory_space<vmem>>, vector<1x128xf32>
    tpu.vector_store %arg10[%c8_56, %c0_57], %63 {strides = array<i32>} : memref<16x128xf32, #tpu.memory_space<vmem>>, vector<1x128xf32>,
    %c9 = arith.constant 9 : index
    %65 = memref.load %arg0[%c9] : memref<128xi32, #tpu.memory_space<smem>>
    %66 = arith.index_cast %65 : i32 to index
    %c0_58 = arith.constant 0 : index
    %67 = vector.load %arg2[%66, %c0_58] : memref<64x128xf32, #tpu.memory_space<vmem>>, vector<1x128xf32>
    %c9_59 = arith.constant 9 : index
    %c0_60 = arith.constant 0 : index
    %68 = vector.load %arg9[%c9_59, %c0_60] : memref<16x128xf32, #tpu.memory_space<vmem>>, vector<1x128xf32>
    tpu.vector_store %arg9[%c9_59, %c0_60], %67 {strides = array<i32>} : memref<16x128xf32, #tpu.memory_space<vmem>>, vector<1x128xf32>,
    %69 = arith.index_cast %65 : i32 to index
    %c0_61 = arith.constant 0 : index
    %70 = vector.load %arg3[%69, %c0_61] : memref<64x128xf32, #tpu.memory_space<vmem>>, vector<1x128xf32>
    %c9_62 = arith.constant 9 : index
    %c0_63 = arith.constant 0 : index
    %71 = vector.load %arg10[%c9_62, %c0_63] : memref<16x128xf32, #tpu.memory_space<vmem>>, vector<1x128xf32>
    tpu.vector_store %arg10[%c9_62, %c0_63], %70 {strides = array<i32>} : memref<16x128xf32, #tpu.memory_space<vmem>>, vector<1x128xf32>,
    %c10 = arith.constant 10 : index
    %72 = memref.load %arg0[%c10] : memref<128xi32, #tpu.memory_space<smem>>
    %73 = arith.index_cast %72 : i32 to index
    %c0_64 = arith.constant 0 : index
    %74 = vector.load %arg2[%73, %c0_64] : memref<64x128xf32, #tpu.memory_space<vmem>>, vector<1x128xf32>
    %c10_65 = arith.constant 10 : index
    %c0_66 = arith.constant 0 : index
    %75 = vector.load %arg9[%c10_65, %c0_66] : memref<16x128xf32, #tpu.memory_space<vmem>>, vector<1x128xf32>
    tpu.vector_store %arg9[%c10_65, %c0_66], %74 {strides = array<i32>} : memref<16x128xf32, #tpu.memory_space<vmem>>, vector<1x128xf32>,
    %76 = arith.index_cast %72 : i32 to index
    %c0_67 = arith.constant 0 : index
    %77 = vector.load %arg3[%76, %c0_67] : memref<64x128xf32, #tpu.memory_space<vmem>>, vector<1x128xf32>
    %c10_68 = arith.constant 10 : index
    %c0_69 = arith.constant 0 : index
    %78 = vector.load %arg10[%c10_68, %c0_69] : memref<16x128xf32, #tpu.memory_space<vmem>>, vector<1x128xf32>
    tpu.vector_store %arg10[%c10_68, %c0_69], %77 {strides = array<i32>} : memref<16x128xf32, #tpu.memory_space<vmem>>, vector<1x128xf32>,
    %c11 = arith.constant 11 : index
    %79 = memref.load %arg0[%c11] : memref<128xi32, #tpu.memory_space<smem>>
    %80 = arith.index_cast %79 : i32 to index
    %c0_70 = arith.constant 0 : index
    %81 = vector.load %arg2[%80, %c0_70] : memref<64x128xf32, #tpu.memory_space<vmem>>, vector<1x128xf32>
    %c11_71 = arith.constant 11 : index
    %c0_72 = arith.constant 0 : index
    %82 = vector.load %arg9[%c11_71, %c0_72] : memref<16x128xf32, #tpu.memory_space<vmem>>, vector<1x128xf32>
    tpu.vector_store %arg9[%c11_71, %c0_72], %81 {strides = array<i32>} : memref<16x128xf32, #tpu.memory_space<vmem>>, vector<1x128xf32>,
    %83 = arith.index_cast %79 : i32 to index
    %c0_73 = arith.constant 0 : index
    %84 = vector.load %arg3[%83, %c0_73] : memref<64x128xf32, #tpu.memory_space<vmem>>, vector<1x128xf32>
    %c11_74 = arith.constant 11 : index
    %c0_75 = arith.constant 0 : index
    %85 = vector.load %arg10[%c11_74, %c0_75] : memref<16x128xf32, #tpu.memory_space<vmem>>, vector<1x128xf32>
    tpu.vector_store %arg10[%c11_74, %c0_75], %84 {strides = array<i32>} : memref<16x128xf32, #tpu.memory_space<vmem>>, vector<1x128xf32>,
    %c12 = arith.constant 12 : index
    %86 = memref.load %arg0[%c12] : memref<128xi32, #tpu.memory_space<smem>>
    %87 = arith.index_cast %86 : i32 to index
    %c0_76 = arith.constant 0 : index
    %88 = vector.load %arg2[%87, %c0_76] : memref<64x128xf32, #tpu.memory_space<vmem>>, vector<1x128xf32>
    %c12_77 = arith.constant 12 : index
    %c0_78 = arith.constant 0 : index
    %89 = vector.load %arg9[%c12_77, %c0_78] : memref<16x128xf32, #tpu.memory_space<vmem>>, vector<1x128xf32>
    tpu.vector_store %arg9[%c12_77, %c0_78], %88 {strides = array<i32>} : memref<16x128xf32, #tpu.memory_space<vmem>>, vector<1x128xf32>,
    %90 = arith.index_cast %86 : i32 to index
    %c0_79 = arith.constant 0 : index
    %91 = vector.load %arg3[%90, %c0_79] : memref<64x128xf32, #tpu.memory_space<vmem>>, vector<1x128xf32>
    %c12_80 = arith.constant 12 : index
    %c0_81 = arith.constant 0 : index
    %92 = vector.load %arg10[%c12_80, %c0_81] : memref<16x128xf32, #tpu.memory_space<vmem>>, vector<1x128xf32>
    tpu.vector_store %arg10[%c12_80, %c0_81], %91 {strides = array<i32>} : memref<16x128xf32, #tpu.memory_space<vmem>>, vector<1x128xf32>,
    %c13 = arith.constant 13 : index
    %93 = memref.load %arg0[%c13] : memref<128xi32, #tpu.memory_space<smem>>
    %94 = arith.index_cast %93 : i32 to index
    %c0_82 = arith.constant 0 : index
    %95 = vector.load %arg2[%94, %c0_82] : memref<64x128xf32, #tpu.memory_space<vmem>>, vector<1x128xf32>
    %c13_83 = arith.constant 13 : index
    %c0_84 = arith.constant 0 : index
    %96 = vector.load %arg9[%c13_83, %c0_84] : memref<16x128xf32, #tpu.memory_space<vmem>>, vector<1x128xf32>
    tpu.vector_store %arg9[%c13_83, %c0_84], %95 {strides = array<i32>} : memref<16x128xf32, #tpu.memory_space<vmem>>, vector<1x128xf32>,
    %97 = arith.index_cast %93 : i32 to index
    %c0_85 = arith.constant 0 : index
    %98 = vector.load %arg3[%97, %c0_85] : memref<64x128xf32, #tpu.memory_space<vmem>>, vector<1x128xf32>
    %c13_86 = arith.constant 13 : index
    %c0_87 = arith.constant 0 : index
    %99 = vector.load %arg10[%c13_86, %c0_87] : memref<16x128xf32, #tpu.memory_space<vmem>>, vector<1x128xf32>
    tpu.vector_store %arg10[%c13_86, %c0_87], %98 {strides = array<i32>} : memref<16x128xf32, #tpu.memory_space<vmem>>, vector<1x128xf32>,
    %c14 = arith.constant 14 : index
    %100 = memref.load %arg0[%c14] : memref<128xi32, #tpu.memory_space<smem>>
    %101 = arith.index_cast %100 : i32 to index
    %c0_88 = arith.constant 0 : index
    %102 = vector.load %arg2[%101, %c0_88] : memref<64x128xf32, #tpu.memory_space<vmem>>, vector<1x128xf32>
    %c14_89 = arith.constant 14 : index
    %c0_90 = arith.constant 0 : index
    %103 = vector.load %arg9[%c14_89, %c0_90] : memref<16x128xf32, #tpu.memory_space<vmem>>, vector<1x128xf32>
    tpu.vector_store %arg9[%c14_89, %c0_90], %102 {strides = array<i32>} : memref<16x128xf32, #tpu.memory_space<vmem>>, vector<1x128xf32>,
    %104 = arith.index_cast %100 : i32 to index
    %c0_91 = arith.constant 0 : index
    %105 = vector.load %arg3[%104, %c0_91] : memref<64x128xf32, #tpu.memory_space<vmem>>, vector<1x128xf32>
    %c14_92 = arith.constant 14 : index
    %c0_93 = arith.constant 0 : index
    %106 = vector.load %arg10[%c14_92, %c0_93] : memref<16x128xf32, #tpu.memory_space<vmem>>, vector<1x128xf32>
    tpu.vector_store %arg10[%c14_92, %c0_93], %105 {strides = array<i32>} : memref<16x128xf32, #tpu.memory_space<vmem>>, vector<1x128xf32>,
    %c15 = arith.constant 15 : index
    %107 = memref.load %arg0[%c15] : memref<128xi32, #tpu.memory_space<smem>>
    %108 = arith.index_cast %107 : i32 to index
    %c0_94 = arith.constant 0 : index
    %109 = vector.load %arg2[%108, %c0_94] : memref<64x128xf32, #tpu.memory_space<vmem>>, vector<1x128xf32>
    %c15_95 = arith.constant 15 : index
    %c0_96 = arith.constant 0 : index
    %110 = vector.load %arg9[%c15_95, %c0_96] : memref<16x128xf32, #tpu.memory_space<vmem>>, vector<1x128xf32>
    tpu.vector_store %arg9[%c15_95, %c0_96], %109 {strides = array<i32>} : memref<16x128xf32, #tpu.memory_space<vmem>>, vector<1x128xf32>,
    %111 = arith.index_cast %107 : i32 to index
    %c0_97 = arith.constant 0 : index
    %112 = vector.load %arg3[%111, %c0_97] : memref<64x128xf32, #tpu.memory_space<vmem>>, vector<1x128xf32>
    %c15_98 = arith.constant 15 : index
    %c0_99 = arith.constant 0 : index
    %113 = vector.load %arg10[%c15_98, %c0_99] : memref<16x128xf32, #tpu.memory_space<vmem>>, vector<1x128xf32>
    tpu.vector_store %arg10[%c15_98, %c0_99], %112 {strides = array<i32>} : memref<16x128xf32, #tpu.memory_space<vmem>>, vector<1x128xf32>,
    %c0_100 = arith.constant 0 : index
    %c0_101 = arith.constant 0 : index
    %114 = vector.load %arg9[%c0_100, %c0_101] : memref<16x128xf32, #tpu.memory_space<vmem>>, vector<16x128xf32>
    %cst = arith.constant dense<0.000000e+00> : vector<1x16xf32>
    %115 = tpu.matmul %0, %114, %cst {dimension_numbers = #tpu.dot_dimension_numbers<[1], [1], [0], [0], [0, 0, 1, 0], [], []>} : vector<1x128xf32>, vector<16x128xf32>, vector<1x16xf32> -> vector<1x16xf32>
    %cst_102 = arith.constant 14.2857141 : f32
    %116 = vector.broadcast %cst_102 : f32 to vector<1x16xf32>
    %117 = arith.mulf %115, %116 : vector<1x16xf32>
    %c0_103 = arith.constant 0 : index
    %c0_104 = arith.constant 0 : index
    %118 = vector.load %arg10[%c0_103, %c0_104] : memref<16x128xf32, #tpu.memory_space<vmem>>, vector<16x128xf32>
    %cst_105 = arith.constant dense<0.000000e+00> : vector<1x16xf32>
    %119 = tpu.matmul %1, %118, %cst_105 {dimension_numbers = #tpu.dot_dimension_numbers<[1], [1], [0], [0], [0, 0, 1, 0], [], []>} : vector<1x128xf32>, vector<16x128xf32>, vector<1x16xf32> -> vector<1x16xf32>
    %cst_106 = arith.constant 14.2857141 : f32
    %120 = vector.broadcast %cst_106 : f32 to vector<1x16xf32>
    %121 = arith.mulf %119, %120 : vector<1x16xf32>
    %c0_107 = arith.constant 0 : index
    %c0_108 = arith.constant 0 : index
    %122 = vector.load %arg11[%c0_107, %c0_108] : memref<8x16xf32, #tpu.memory_space<vmem>>, vector<1x16xf32>
    tpu.vector_store %arg11[%c0_107, %c0_108], %117 {strides = array<i32>} : memref<8x16xf32, #tpu.memory_space<vmem>>, vector<1x16xf32>,
    %c0_109 = arith.constant 0 : index
    %c0_110 = arith.constant 0 : index
    %123 = vector.load %arg12[%c0_109, %c0_110] : memref<8x16xf32, #tpu.memory_space<vmem>>, vector<1x16xf32>
    tpu.vector_store %arg12[%c0_109, %c0_110], %121 {strides = array<i32>} : memref<8x16xf32, #tpu.memory_space<vmem>>, vector<1x16xf32>,
    %c1_111 = arith.constant 1 : index
    %c0_112 = arith.constant 0 : index
    %124 = vector.load %arg4[%c1_111, %c0_112] : memref<8x128xf32, #tpu.memory_space<vmem>>, vector<1x128xf32>
    %c1_113 = arith.constant 1 : index
    %c0_114 = arith.constant 0 : index
    %125 = vector.load %arg5[%c1_113, %c0_114] : memref<8x128xf32, #tpu.memory_space<vmem>>, vector<1x128xf32>
    %c16 = arith.constant 16 : index
    %126 = memref.load %arg0[%c16] : memref<128xi32, #tpu.memory_space<smem>>
    %127 = arith.index_cast %126 : i32 to index
    %c0_115 = arith.constant 0 : index
    %128 = vector.load %arg2[%127, %c0_115] : memref<64x128xf32, #tpu.memory_space<vmem>>, vector<1x128xf32>
    %c0_116 = arith.constant 0 : index
    %c0_117 = arith.constant 0 : index
    %129 = vector.load %arg9[%c0_116, %c0_117] : memref<16x128xf32, #tpu.memory_space<vmem>>, vector<1x128xf32>
    tpu.vector_store %arg9[%c0_116, %c0_117], %128 {strides = array<i32>} : memref<16x128xf32, #tpu.memory_space<vmem>>, vector<1x128xf32>,
    %130 = arith.index_cast %126 : i32 to index
    %c0_118 = arith.constant 0 : index
    %131 = vector.load %arg3[%130, %c0_118] : memref<64x128xf32, #tpu.memory_space<vmem>>, vector<1x128xf32>
    %c0_119 = arith.constant 0 : index
    %c0_120 = arith.constant 0 : index
    %132 = vector.load %arg10[%c0_119, %c0_120] : memref<16x128xf32, #tpu.memory_space<vmem>>, vector<1x128xf32>
    tpu.vector_store %arg10[%c0_119, %c0_120], %131 {strides = array<i32>} : memref<16x128xf32, #tpu.memory_space<vmem>>, vector<1x128xf32>,
    %c17 = arith.constant 17 : index
    %133 = memref.load %arg0[%c17] : memref<128xi32, #tpu.memory_space<smem>>
    %134 = arith.index_cast %133 : i32 to index
    %c0_121 = arith.constant 0 : index
    %135 = vector.load %arg2[%134, %c0_121] : memref<64x128xf32, #tpu.memory_space<vmem>>, vector<1x128xf32>
    %c1_122 = arith.constant 1 : index
    %c0_123 = arith.constant 0 : index
    %136 = vector.load %arg9[%c1_122, %c0_123] : memref<16x128xf32, #tpu.memory_space<vmem>>, vector<1x128xf32>
    tpu.vector_store %arg9[%c1_122, %c0_123], %135 {strides = array<i32>} : memref<16x128xf32, #tpu.memory_space<vmem>>, vector<1x128xf32>,
    %137 = arith.index_cast %133 : i32 to index
    %c0_124 = arith.constant 0 : index
    %138 = vector.load %arg3[%137, %c0_124] : memref<64x128xf32, #tpu.memory_space<vmem>>, vector<1x128xf32>
    %c1_125 = arith.constant 1 : index
    %c0_126 = arith.constant 0 : index
    %139 = vector.load %arg10[%c1_125, %c0_126] : memref<16x128xf32, #tpu.memory_space<vmem>>, vector<1x128xf32>
    tpu.vector_store %arg10[%c1_125, %c0_126], %138 {strides = array<i32>} : memref<16x128xf32, #tpu.memory_space<vmem>>, vector<1x128xf32>,
    %c18 = arith.constant 18 : index
    %140 = memref.load %arg0[%c18] : memref<128xi32, #tpu.memory_space<smem>>
    %141 = arith.index_cast %140 : i32 to index
    %c0_127 = arith.constant 0 : index
    %142 = vector.load %arg2[%141, %c0_127] : memref<64x128xf32, #tpu.memory_space<vmem>>, vector<1x128xf32>
    %c2_128 = arith.constant 2 : index
    %c0_129 = arith.constant 0 : index
    %143 = vector.load %arg9[%c2_128, %c0_129] : memref<16x128xf32, #tpu.memory_space<vmem>>, vector<1x128xf32>
    tpu.vector_store %arg9[%c2_128, %c0_129], %142 {strides = array<i32>} : memref<16x128xf32, #tpu.memory_space<vmem>>, vector<1x128xf32>,
    %144 = arith.index_cast %140 : i32 to index
    %c0_130 = arith.constant 0 : index
    %145 = vector.load %arg3[%144, %c0_130] : memref<64x128xf32, #tpu.memory_space<vmem>>, vector<1x128xf32>
    %c2_131 = arith.constant 2 : index
    %c0_132 = arith.constant 0 : index
    %146 = vector.load %arg10[%c2_131, %c0_132] : memref<16x128xf32, #tpu.memory_space<vmem>>, vector<1x128xf32>
    tpu.vector_store %arg10[%c2_131, %c0_132], %145 {strides = array<i32>} : memref<16x128xf32, #tpu.memory_space<vmem>>, vector<1x128xf32>,
    %c19 = arith.constant 19 : index
    %147 = memref.load %arg0[%c19] : memref<128xi32, #tpu.memory_space<smem>>
    %148 = arith.index_cast %147 : i32 to index
    %c0_133 = arith.constant 0 : index
    %149 = vector.load %arg2[%148, %c0_133] : memref<64x128xf32, #tpu.memory_space<vmem>>, vector<1x128xf32>
    %c3_134 = arith.constant 3 : index
    %c0_135 = arith.constant 0 : index
    %150 = vector.load %arg9[%c3_134, %c0_135] : memref<16x128xf32, #tpu.memory_space<vmem>>, vector<1x128xf32>
    tpu.vector_store %arg9[%c3_134, %c0_135], %149 {strides = array<i32>} : memref<16x128xf32, #tpu.memory_space<vmem>>, vector<1x128xf32>,
    %151 = arith.index_cast %147 : i32 to index
    %c0_136 = arith.constant 0 : index
    %152 = vector.load %arg3[%151, %c0_136] : memref<64x128xf32, #tpu.memory_space<vmem>>, vector<1x128xf32>
    %c3_137 = arith.constant 3 : index
    %c0_138 = arith.constant 0 : index
    %153 = vector.load %arg10[%c3_137, %c0_138] : memref<16x128xf32, #tpu.memory_space<vmem>>, vector<1x128xf32>
    tpu.vector_store %arg10[%c3_137, %c0_138], %152 {strides = array<i32>} : memref<16x128xf32, #tpu.memory_space<vmem>>, vector<1x128xf32>,
    %c20 = arith.constant 20 : index
    %154 = memref.load %arg0[%c20] : memref<128xi32, #tpu.memory_space<smem>>
    %155 = arith.index_cast %154 : i32 to index
    %c0_139 = arith.constant 0 : index
    %156 = vector.load %arg2[%155, %c0_139] : memref<64x128xf32, #tpu.memory_space<vmem>>, vector<1x128xf32>
    %c4_140 = arith.constant 4 : index
    %c0_141 = arith.constant 0 : index
    %157 = vector.load %arg9[%c4_140, %c0_141] : memref<16x128xf32, #tpu.memory_space<vmem>>, vector<1x128xf32>
    tpu.vector_store %arg9[%c4_140, %c0_141], %156 {strides = array<i32>} : memref<16x128xf32, #tpu.memory_space<vmem>>, vector<1x128xf32>,
    %158 = arith.index_cast %154 : i32 to index
    %c0_142 = arith.constant 0 : index
    %159 = vector.load %arg3[%158, %c0_142] : memref<64x128xf32, #tpu.memory_space<vmem>>, vector<1x128xf32>
    %c4_143 = arith.constant 4 : index
    %c0_144 = arith.constant 0 : index
    %160 = vector.load %arg10[%c4_143, %c0_144] : memref<16x128xf32, #tpu.memory_space<vmem>>, vector<1x128xf32>
    tpu.vector_store %arg10[%c4_143, %c0_144], %159 {strides = array<i32>} : memref<16x128xf32, #tpu.memory_space<vmem>>, vector<1x128xf32>,
    %c21 = arith.constant 21 : index
    %161 = memref.load %arg0[%c21] : memref<128xi32, #tpu.memory_space<smem>>
    %162 = arith.index_cast %161 : i32 to index
    %c0_145 = arith.constant 0 : index
    %163 = vector.load %arg2[%162, %c0_145] : memref<64x128xf32, #tpu.memory_space<vmem>>, vector<1x128xf32>
    %c5_146 = arith.constant 5 : index
    %c0_147 = arith.constant 0 : index
    %164 = vector.load %arg9[%c5_146, %c0_147] : memref<16x128xf32, #tpu.memory_space<vmem>>, vector<1x128xf32>
    tpu.vector_store %arg9[%c5_146, %c0_147], %163 {strides = array<i32>} : memref<16x128xf32, #tpu.memory_space<vmem>>, vector<1x128xf32>,
    %165 = arith.index_cast %161 : i32 to index
    %c0_148 = arith.constant 0 : index
    %166 = vector.load %arg3[%165, %c0_148] : memref<64x128xf32, #tpu.memory_space<vmem>>, vector<1x128xf32>
    %c5_149 = arith.constant 5 : index
    %c0_150 = arith.constant 0 : index
    %167 = vector.load %arg10[%c5_149, %c0_150] : memref<16x128xf32, #tpu.memory_space<vmem>>, vector<1x128xf32>
    tpu.vector_store %arg10[%c5_149, %c0_150], %166 {strides = array<i32>} : memref<16x128xf32, #tpu.memory_space<vmem>>, vector<1x128xf32>,
    %c22 = arith.constant 22 : index
    %168 = memref.load %arg0[%c22] : memref<128xi32, #tpu.memory_space<smem>>
    %169 = arith.index_cast %168 : i32 to index
    %c0_151 = arith.constant 0 : index
    %170 = vector.load %arg2[%169, %c0_151] : memref<64x128xf32, #tpu.memory_space<vmem>>, vector<1x128xf32>
    %c6_152 = arith.constant 6 : index
    %c0_153 = arith.constant 0 : index
    %171 = vector.load %arg9[%c6_152, %c0_153] : memref<16x128xf32, #tpu.memory_space<vmem>>, vector<1x128xf32>
    tpu.vector_store %arg9[%c6_152, %c0_153], %170 {strides = array<i32>} : memref<16x128xf32, #tpu.memory_space<vmem>>, vector<1x128xf32>,
    %172 = arith.index_cast %168 : i32 to index
    %c0_154 = arith.constant 0 : index
    %173 = vector.load %arg3[%172, %c0_154] : memref<64x128xf32, #tpu.memory_space<vmem>>, vector<1x128xf32>
    %c6_155 = arith.constant 6 : index
    %c0_156 = arith.constant 0 : index
    %174 = vector.load %arg10[%c6_155, %c0_156] : memref<16x128xf32, #tpu.memory_space<vmem>>, vector<1x128xf32>
    tpu.vector_store %arg10[%c6_155, %c0_156], %173 {strides = array<i32>} : memref<16x128xf32, #tpu.memory_space<vmem>>, vector<1x128xf32>,
    %c23 = arith.constant 23 : index
    %175 = memref.load %arg0[%c23] : memref<128xi32, #tpu.memory_space<smem>>
    %176 = arith.index_cast %175 : i32 to index
    %c0_157 = arith.constant 0 : index
    %177 = vector.load %arg2[%176, %c0_157] : memref<64x128xf32, #tpu.memory_space<vmem>>, vector<1x128xf32>
    %c7_158 = arith.constant 7 : index
    %c0_159 = arith.constant 0 : index
    %178 = vector.load %arg9[%c7_158, %c0_159] : memref<16x128xf32, #tpu.memory_space<vmem>>, vector<1x128xf32>
    tpu.vector_store %arg9[%c7_158, %c0_159], %177 {strides = array<i32>} : memref<16x128xf32, #tpu.memory_space<vmem>>, vector<1x128xf32>,
    %179 = arith.index_cast %175 : i32 to index
    %c0_160 = arith.constant 0 : index
    %180 = vector.load %arg3[%179, %c0_160] : memref<64x128xf32, #tpu.memory_space<vmem>>, vector<1x128xf32>
    %c7_161 = arith.constant 7 : index
    %c0_162 = arith.constant 0 : index
    %181 = vector.load %arg10[%c7_161, %c0_162] : memref<16x128xf32, #tpu.memory_space<vmem>>, vector<1x128xf32>
    tpu.vector_store %arg10[%c7_161, %c0_162], %180 {strides = array<i32>} : memref<16x128xf32, #tpu.memory_space<vmem>>, vector<1x128xf32>,
    %c24 = arith.constant 24 : index
    %182 = memref.load %arg0[%c24] : memref<128xi32, #tpu.memory_space<smem>>
    %183 = arith.index_cast %182 : i32 to index
    %c0_163 = arith.constant 0 : index
    %184 = vector.load %arg2[%183, %c0_163] : memref<64x128xf32, #tpu.memory_space<vmem>>, vector<1x128xf32>
    %c8_164 = arith.constant 8 : index
    %c0_165 = arith.constant 0 : index
    %185 = vector.load %arg9[%c8_164, %c0_165] : memref<16x128xf32, #tpu.memory_space<vmem>>, vector<1x128xf32>
    tpu.vector_store %arg9[%c8_164, %c0_165], %184 {strides = array<i32>} : memref<16x128xf32, #tpu.memory_space<vmem>>, vector<1x128xf32>,
    %186 = arith.index_cast %182 : i32 to index
    %c0_166 = arith.constant 0 : index
    %187 = vector.load %arg3[%186, %c0_166] : memref<64x128xf32, #tpu.memory_space<vmem>>, vector<1x128xf32>
    %c8_167 = arith.constant 8 : index
    %c0_168 = arith.constant 0 : index
    %188 = vector.load %arg10[%c8_167, %c0_168] : memref<16x128xf32, #tpu.memory_space<vmem>>, vector<1x128xf32>
    tpu.vector_store %arg10[%c8_167, %c0_168], %187 {strides = array<i32>} : memref<16x128xf32, #tpu.memory_space<vmem>>, vector<1x128xf32>,
    %c25 = arith.constant 25 : index
    %189 = memref.load %arg0[%c25] : memref<128xi32, #tpu.memory_space<smem>>
    %190 = arith.index_cast %189 : i32 to index
    %c0_169 = arith.constant 0 : index
    %191 = vector.load %arg2[%190, %c0_169] : memref<64x128xf32, #tpu.memory_space<vmem>>, vector<1x128xf32>
    %c9_170 = arith.constant 9 : index
    %c0_171 = arith.constant 0 : index
    %192 = vector.load %arg9[%c9_170, %c0_171] : memref<16x128xf32, #tpu.memory_space<vmem>>, vector<1x128xf32>
    tpu.vector_store %arg9[%c9_170, %c0_171], %191 {strides = array<i32>} : memref<16x128xf32, #tpu.memory_space<vmem>>, vector<1x128xf32>,
    %193 = arith.index_cast %189 : i32 to index
    %c0_172 = arith.constant 0 : index
    %194 = vector.load %arg3[%193, %c0_172] : memref<64x128xf32, #tpu.memory_space<vmem>>, vector<1x128xf32>
    %c9_173 = arith.constant 9 : index
    %c0_174 = arith.constant 0 : index
    %195 = vector.load %arg10[%c9_173, %c0_174] : memref<16x128xf32, #tpu.memory_space<vmem>>, vector<1x128xf32>
    tpu.vector_store %arg10[%c9_173, %c0_174], %194 {strides = array<i32>} : memref<16x128xf32, #tpu.memory_space<vmem>>, vector<1x128xf32>,
    %c26 = arith.constant 26 : index
    %196 = memref.load %arg0[%c26] : memref<128xi32, #tpu.memory_space<smem>>
    %197 = arith.index_cast %196 : i32 to index
    %c0_175 = arith.constant 0 : index
    %198 = vector.load %arg2[%197, %c0_175] : memref<64x128xf32, #tpu.memory_space<vmem>>, vector<1x128xf32>
    %c10_176 = arith.constant 10 : index
    %c0_177 = arith.constant 0 : index
    %199 = vector.load %arg9[%c10_176, %c0_177] : memref<16x128xf32, #tpu.memory_space<vmem>>, vector<1x128xf32>
    tpu.vector_store %arg9[%c10_176, %c0_177], %198 {strides = array<i32>} : memref<16x128xf32, #tpu.memory_space<vmem>>, vector<1x128xf32>,
    %200 = arith.index_cast %196 : i32 to index
    %c0_178 = arith.constant 0 : index
    %201 = vector.load %arg3[%200, %c0_178] : memref<64x128xf32, #tpu.memory_space<vmem>>, vector<1x128xf32>
    %c10_179 = arith.constant 10 : index
    %c0_180 = arith.constant 0 : index
    %202 = vector.load %arg10[%c10_179, %c0_180] : memref<16x128xf32, #tpu.memory_space<vmem>>, vector<1x128xf32>
    tpu.vector_store %arg10[%c10_179, %c0_180], %201 {strides = array<i32>} : memref<16x128xf32, #tpu.memory_space<vmem>>, vector<1x128xf32>,
    %c27 = arith.constant 27 : index
    %203 = memref.load %arg0[%c27] : memref<128xi32, #tpu.memory_space<smem>>
    %204 = arith.index_cast %203 : i32 to index
    %c0_181 = arith.constant 0 : index
    %205 = vector.load %arg2[%204, %c0_181] : memref<64x128xf32, #tpu.memory_space<vmem>>, vector<1x128xf32>
    %c11_182 = arith.constant 11 : index
    %c0_183 = arith.constant 0 : index
    %206 = vector.load %arg9[%c11_182, %c0_183] : memref<16x128xf32, #tpu.memory_space<vmem>>, vector<1x128xf32>
    tpu.vector_store %arg9[%c11_182, %c0_183], %205 {strides = array<i32>} : memref<16x128xf32, #tpu.memory_space<vmem>>, vector<1x128xf32>,
    %207 = arith.index_cast %203 : i32 to index
    %c0_184 = arith.constant 0 : index
    %208 = vector.load %arg3[%207, %c0_184] : memref<64x128xf32, #tpu.memory_space<vmem>>, vector<1x128xf32>
    %c11_185 = arith.constant 11 : index
    %c0_186 = arith.constant 0 : index
    %209 = vector.load %arg10[%c11_185, %c0_186] : memref<16x128xf32, #tpu.memory_space<vmem>>, vector<1x128xf32>
    tpu.vector_store %arg10[%c11_185, %c0_186], %208 {strides = array<i32>} : memref<16x128xf32, #tpu.memory_space<vmem>>, vector<1x128xf32>,
    %c28 = arith.constant 28 : index
    %210 = memref.load %arg0[%c28] : memref<128xi32, #tpu.memory_space<smem>>
    %211 = arith.index_cast %210 : i32 to index
    %c0_187 = arith.constant 0 : index
    %212 = vector.load %arg2[%211, %c0_187] : memref<64x128xf32, #tpu.memory_space<vmem>>, vector<1x128xf32>
    %c12_188 = arith.constant 12 : index
    %c0_189 = arith.constant 0 : index
    %213 = vector.load %arg9[%c12_188, %c0_189] : memref<16x128xf32, #tpu.memory_space<vmem>>, vector<1x128xf32>
    tpu.vector_store %arg9[%c12_188, %c0_189], %212 {strides = array<i32>} : memref<16x128xf32, #tpu.memory_space<vmem>>, vector<1x128xf32>,
    %214 = arith.index_cast %210 : i32 to index
    %c0_190 = arith.constant 0 : index
    %215 = vector.load %arg3[%214, %c0_190] : memref<64x128xf32, #tpu.memory_space<vmem>>, vector<1x128xf32>
    %c12_191 = arith.constant 12 : index
    %c0_192 = arith.constant 0 : index
    %216 = vector.load %arg10[%c12_191, %c0_192] : memref<16x128xf32, #tpu.memory_space<vmem>>, vector<1x128xf32>
    tpu.vector_store %arg10[%c12_191, %c0_192], %215 {strides = array<i32>} : memref<16x128xf32, #tpu.memory_space<vmem>>, vector<1x128xf32>,
    %c29 = arith.constant 29 : index
    %217 = memref.load %arg0[%c29] : memref<128xi32, #tpu.memory_space<smem>>
    %218 = arith.index_cast %217 : i32 to index
    %c0_193 = arith.constant 0 : index
    %219 = vector.load %arg2[%218, %c0_193] : memref<64x128xf32, #tpu.memory_space<vmem>>, vector<1x128xf32>
    %c13_194 = arith.constant 13 : index
    %c0_195 = arith.constant 0 : index
    %220 = vector.load %arg9[%c13_194, %c0_195] : memref<16x128xf32, #tpu.memory_space<vmem>>, vector<1x128xf32>
    tpu.vector_store %arg9[%c13_194, %c0_195], %219 {strides = array<i32>} : memref<16x128xf32, #tpu.memory_space<vmem>>, vector<1x128xf32>,
    %221 = arith.index_cast %217 : i32 to index
    %c0_196 = arith.constant 0 : index
    %222 = vector.load %arg3[%221, %c0_196] : memref<64x128xf32, #tpu.memory_space<vmem>>, vector<1x128xf32>
    %c13_197 = arith.constant 13 : index
    %c0_198 = arith.constant 0 : index
    %223 = vector.load %arg10[%c13_197, %c0_198] : memref<16x128xf32, #tpu.memory_space<vmem>>, vector<1x128xf32>
    tpu.vector_store %arg10[%c13_197, %c0_198], %222 {strides = array<i32>} : memref<16x128xf32, #tpu.memory_space<vmem>>, vector<1x128xf32>,
    %c30 = arith.constant 30 : index
    %224 = memref.load %arg0[%c30] : memref<128xi32, #tpu.memory_space<smem>>
    %225 = arith.index_cast %224 : i32 to index
    %c0_199 = arith.constant 0 : index
    %226 = vector.load %arg2[%225, %c0_199] : memref<64x128xf32, #tpu.memory_space<vmem>>, vector<1x128xf32>
    %c14_200 = arith.constant 14 : index
    %c0_201 = arith.constant 0 : index
    %227 = vector.load %arg9[%c14_200, %c0_201] : memref<16x128xf32, #tpu.memory_space<vmem>>, vector<1x128xf32>
    tpu.vector_store %arg9[%c14_200, %c0_201], %226 {strides = array<i32>} : memref<16x128xf32, #tpu.memory_space<vmem>>, vector<1x128xf32>,
    %228 = arith.index_cast %224 : i32 to index
    %c0_202 = arith.constant 0 : index
    %229 = vector.load %arg3[%228, %c0_202] : memref<64x128xf32, #tpu.memory_space<vmem>>, vector<1x128xf32>
    %c14_203 = arith.constant 14 : index
    %c0_204 = arith.constant 0 : index
    %230 = vector.load %arg10[%c14_203, %c0_204] : memref<16x128xf32, #tpu.memory_space<vmem>>, vector<1x128xf32>
    tpu.vector_store %arg10[%c14_203, %c0_204], %229 {strides = array<i32>} : memref<16x128xf32, #tpu.memory_space<vmem>>, vector<1x128xf32>,
    %c31 = arith.constant 31 : index
    %231 = memref.load %arg0[%c31] : memref<128xi32, #tpu.memory_space<smem>>
    %232 = arith.index_cast %231 : i32 to index
    %c0_205 = arith.constant 0 : index
    %233 = vector.load %arg2[%232, %c0_205] : memref<64x128xf32, #tpu.memory_space<vmem>>, vector<1x128xf32>
    %c15_206 = arith.constant 15 : index
    %c0_207 = arith.constant 0 : index
    %234 = vector.load %arg9[%c15_206, %c0_207] : memref<16x128xf32, #tpu.memory_space<vmem>>, vector<1x128xf32>
    tpu.vector_store %arg9[%c15_206, %c0_207], %233 {strides = array<i32>} : memref<16x128xf32, #tpu.memory_space<vmem>>, vector<1x128xf32>,
    %235 = arith.index_cast %231 : i32 to index
    %c0_208 = arith.constant 0 : index
    %236 = vector.load %arg3[%235, %c0_208] : memref<64x128xf32, #tpu.memory_space<vmem>>, vector<1x128xf32>
    %c15_209 = arith.constant 15 : index
    %c0_210 = arith.constant 0 : index
    %237 = vector.load %arg10[%c15_209, %c0_210] : memref<16x128xf32, #tpu.memory_space<vmem>>, vector<1x128xf32>
    tpu.vector_store %arg10[%c15_209, %c0_210], %236 {strides = array<i32>} : memref<16x128xf32, #tpu.memory_space<vmem>>, vector<1x128xf32>,
    %c0_211 = arith.constant 0 : index
    %c0_212 = arith.constant 0 : index
    %238 = vector.load %arg9[%c0_211, %c0_212] : memref<16x128xf32, #tpu.memory_space<vmem>>, vector<16x128xf32>
    %cst_213 = arith.constant dense<0.000000e+00> : vector<1x16xf32>
    %239 = tpu.matmul %124, %238, %cst_213 {dimension_numbers = #tpu.dot_dimension_numbers<[1], [1], [0], [0], [0, 0, 1, 0], [], []>} : vector<1x128xf32>, vector<16x128xf32>, vector<1x16xf32> -> vector<1x16xf32>
    %cst_214 = arith.constant 14.2857141 : f32
    %240 = vector.broadcast %cst_214 : f32 to vector<1x16xf32>
    %241 = arith.mulf %239, %240 : vector<1x16xf32>
    %c0_215 = arith.constant 0 : index
    %c0_216 = arith.constant 0 : index
    %242 = vector.load %arg10[%c0_215, %c0_216] : memref<16x128xf32, #tpu.memory_space<vmem>>, vector<16x128xf32>
    %cst_217 = arith.constant dense<0.000000e+00> : vector<1x16xf32>
    %243 = tpu.matmul %125, %242, %cst_217 {dimension_numbers = #tpu.dot_dimension_numbers<[1], [1], [0], [0], [0, 0, 1, 0], [], []>} : vector<1x128xf32>, vector<16x128xf32>, vector<1x16xf32> -> vector<1x16xf32>
    %cst_218 = arith.constant 14.2857141 : f32
    %244 = vector.broadcast %cst_218 : f32 to vector<1x16xf32>
    %245 = arith.mulf %243, %244 : vector<1x16xf32>
    %c1_219 = arith.constant 1 : index
    %c0_220 = arith.constant 0 : index
    %246 = vector.load %arg11[%c1_219, %c0_220] : memref<8x16xf32, #tpu.memory_space<vmem>>, vector<1x16xf32>
    tpu.vector_store %arg11[%c1_219, %c0_220], %241 {strides = array<i32>} : memref<8x16xf32, #tpu.memory_space<vmem>>, vector<1x16xf32>,
    %c1_221 = arith.constant 1 : index
    %c0_222 = arith.constant 0 : index
    %247 = vector.load %arg12[%c1_221, %c0_222] : memref<8x16xf32, #tpu.memory_space<vmem>>, vector<1x16xf32>
    tpu.vector_store %arg12[%c1_221, %c0_222], %245 {strides = array<i32>} : memref<8x16xf32, #tpu.memory_space<vmem>>, vector<1x16xf32>,
    %c2_223 = arith.constant 2 : index
    %c0_224 = arith.constant 0 : index
    %248 = vector.load %arg4[%c2_223, %c0_224] : memref<8x128xf32, #tpu.memory_space<vmem>>, vector<1x128xf32>
    %c2_225 = arith.constant 2 : index
    %c0_226 = arith.constant 0 : index
    %249 = vector.load %arg5[%c2_225, %c0_226] : memref<8x128xf32, #tpu.memory_space<vmem>>, vector<1x128xf32>
    %c32 = arith.constant 32 : index
    %250 = memref.load %arg0[%c32] : memref<128xi32, #tpu.memory_space<smem>>
    %251 = arith.index_cast %250 : i32 to index
    %c0_227 = arith.constant 0 : index
    %252 = vector.load %arg2[%251, %c0_227] : memref<64x128xf32, #tpu.memory_space<vmem>>, vector<1x128xf32>
    %c0_228 = arith.constant 0 : index
    %c0_229 = arith.constant 0 : index
    %253 = vector.load %arg9[%c0_228, %c0_229] : memref<16x128xf32, #tpu.memory_space<vmem>>, vector<1x128xf32>
    tpu.vector_store %arg9[%c0_228, %c0_229], %252 {strides = array<i32>} : memref<16x128xf32, #tpu.memory_space<vmem>>, vector<1x128xf32>,
    %254 = arith.index_cast %250 : i32 to index
    %c0_230 = arith.constant 0 : index
    %255 = vector.load %arg3[%254, %c0_230] : memref<64x128xf32, #tpu.memory_space<vmem>>, vector<1x128xf32>
    %c0_231 = arith.constant 0 : index
    %c0_232 = arith.constant 0 : index
    %256 = vector.load %arg10[%c0_231, %c0_232] : memref<16x128xf32, #tpu.memory_space<vmem>>, vector<1x128xf32>
    tpu.vector_store %arg10[%c0_231, %c0_232], %255 {strides = array<i32>} : memref<16x128xf32, #tpu.memory_space<vmem>>, vector<1x128xf32>,
    %c33 = arith.constant 33 : index
    %257 = memref.load %arg0[%c33] : memref<128xi32, #tpu.memory_space<smem>>
    %258 = arith.index_cast %257 : i32 to index
    %c0_233 = arith.constant 0 : index
    %259 = vector.load %arg2[%258, %c0_233] : memref<64x128xf32, #tpu.memory_space<vmem>>, vector<1x128xf32>
    %c1_234 = arith.constant 1 : index
    %c0_235 = arith.constant 0 : index
    %260 = vector.load %arg9[%c1_234, %c0_235] : memref<16x128xf32, #tpu.memory_space<vmem>>, vector<1x128xf32>
    tpu.vector_store %arg9[%c1_234, %c0_235], %259 {strides = array<i32>} : memref<16x128xf32, #tpu.memory_space<vmem>>, vector<1x128xf32>,
    %261 = arith.index_cast %257 : i32 to index
    %c0_236 = arith.constant 0 : index
    %262 = vector.load %arg3[%261, %c0_236] : memref<64x128xf32, #tpu.memory_space<vmem>>, vector<1x128xf32>
    %c1_237 = arith.constant 1 : index
    %c0_238 = arith.constant 0 : index
    %263 = vector.load %arg10[%c1_237, %c0_238] : memref<16x128xf32, #tpu.memory_space<vmem>>, vector<1x128xf32>
    tpu.vector_store %arg10[%c1_237, %c0_238], %262 {strides = array<i32>} : memref<16x128xf32, #tpu.memory_space<vmem>>, vector<1x128xf32>,
    %c34 = arith.constant 34 : index
    %264 = memref.load %arg0[%c34] : memref<128xi32, #tpu.memory_space<smem>>
    %265 = arith.index_cast %264 : i32 to index
    %c0_239 = arith.constant 0 : index
    %266 = vector.load %arg2[%265, %c0_239] : memref<64x128xf32, #tpu.memory_space<vmem>>, vector<1x128xf32>
    %c2_240 = arith.constant 2 : index
    %c0_241 = arith.constant 0 : index
    %267 = vector.load %arg9[%c2_240, %c0_241] : memref<16x128xf32, #tpu.memory_space<vmem>>, vector<1x128xf32>
    tpu.vector_store %arg9[%c2_240, %c0_241], %266 {strides = array<i32>} : memref<16x128xf32, #tpu.memory_space<vmem>>, vector<1x128xf32>,
    %268 = arith.index_cast %264 : i32 to index
    %c0_242 = arith.constant 0 : index
    %269 = vector.load %arg3[%268, %c0_242] : memref<64x128xf32, #tpu.memory_space<vmem>>, vector<1x128xf32>
    %c2_243 = arith.constant 2 : index
    %c0_244 = arith.constant 0 : index
    %270 = vector.load %arg10[%c2_243, %c0_244] : memref<16x128xf32, #tpu.memory_space<vmem>>, vector<1x128xf32>
    tpu.vector_store %arg10[%c2_243, %c0_244], %269 {strides = array<i32>} : memref<16x128xf32, #tpu.memory_space<vmem>>, vector<1x128xf32>,
    %c35 = arith.constant 35 : index
    %271 = memref.load %arg0[%c35] : memref<128xi32, #tpu.memory_space<smem>>
    %272 = arith.index_cast %271 : i32 to index
    %c0_245 = arith.constant 0 : index
    %273 = vector.load %arg2[%272, %c0_245] : memref<64x128xf32, #tpu.memory_space<vmem>>, vector<1x128xf32>
    %c3_246 = arith.constant 3 : index
    %c0_247 = arith.constant 0 : index
    %274 = vector.load %arg9[%c3_246, %c0_247] : memref<16x128xf32, #tpu.memory_space<vmem>>, vector<1x128xf32>
    tpu.vector_store %arg9[%c3_246, %c0_247], %273 {strides = array<i32>} : memref<16x128xf32, #tpu.memory_space<vmem>>, vector<1x128xf32>,
    %275 = arith.index_cast %271 : i32 to index
    %c0_248 = arith.constant 0 : index
    %276 = vector.load %arg3[%275, %c0_248] : memref<64x128xf32, #tpu.memory_space<vmem>>, vector<1x128xf32>
    %c3_249 = arith.constant 3 : index
    %c0_250 = arith.constant 0 : index
    %277 = vector.load %arg10[%c3_249, %c0_250] : memref<16x128xf32, #tpu.memory_space<vmem>>, vector<1x128xf32>
    tpu.vector_store %arg10[%c3_249, %c0_250], %276 {strides = array<i32>} : memref<16x128xf32, #tpu.memory_space<vmem>>, vector<1x128xf32>,
    %c36 = arith.constant 36 : index
    %278 = memref.load %arg0[%c36] : memref<128xi32, #tpu.memory_space<smem>>
    %279 = arith.index_cast %278 : i32 to index
    %c0_251 = arith.constant 0 : index
    %280 = vector.load %arg2[%279, %c0_251] : memref<64x128xf32, #tpu.memory_space<vmem>>, vector<1x128xf32>
    %c4_252 = arith.constant 4 : index
    %c0_253 = arith.constant 0 : index
    %281 = vector.load %arg9[%c4_252, %c0_253] : memref<16x128xf32, #tpu.memory_space<vmem>>, vector<1x128xf32>
    tpu.vector_store %arg9[%c4_252, %c0_253], %280 {strides = array<i32>} : memref<16x128xf32, #tpu.memory_space<vmem>>, vector<1x128xf32>,
    %282 = arith.index_cast %278 : i32 to index
    %c0_254 = arith.constant 0 : index
    %283 = vector.load %arg3[%282, %c0_254] : memref<64x128xf32, #tpu.memory_space<vmem>>, vector<1x128xf32>
    %c4_255 = arith.constant 4 : index
    %c0_256 = arith.constant 0 : index
    %284 = vector.load %arg10[%c4_255, %c0_256] : memref<16x128xf32, #tpu.memory_space<vmem>>, vector<1x128xf32>
    tpu.vector_store %arg10[%c4_255, %c0_256], %283 {strides = array<i32>} : memref<16x128xf32, #tpu.memory_space<vmem>>, vector<1x128xf32>,
    %c37 = arith.constant 37 : index
    %285 = memref.load %arg0[%c37] : memref<128xi32, #tpu.memory_space<smem>>
    %286 = arith.index_cast %285 : i32 to index
    %c0_257 = arith.constant 0 : index
    %287 = vector.load %arg2[%286, %c0_257] : memref<64x128xf32, #tpu.memory_space<vmem>>, vector<1x128xf32>
    %c5_258 = arith.constant 5 : index
    %c0_259 = arith.constant 0 : index
    %288 = vector.load %arg9[%c5_258, %c0_259] : memref<16x128xf32, #tpu.memory_space<vmem>>, vector<1x128xf32>
    tpu.vector_store %arg9[%c5_258, %c0_259], %287 {strides = array<i32>} : memref<16x128xf32, #tpu.memory_space<vmem>>, vector<1x128xf32>,
    %289 = arith.index_cast %285 : i32 to index
    %c0_260 = arith.constant 0 : index
    %290 = vector.load %arg3[%289, %c0_260] : memref<64x128xf32, #tpu.memory_space<vmem>>, vector<1x128xf32>
    %c5_261 = arith.constant 5 : index
    %c0_262 = arith.constant 0 : index
    %291 = vector.load %arg10[%c5_261, %c0_262] : memref<16x128xf32, #tpu.memory_space<vmem>>, vector<1x128xf32>
    tpu.vector_store %arg10[%c5_261, %c0_262], %290 {strides = array<i32>} : memref<16x128xf32, #tpu.memory_space<vmem>>, vector<1x128xf32>,
    %c38 = arith.constant 38 : index
    %292 = memref.load %arg0[%c38] : memref<128xi32, #tpu.memory_space<smem>>
    %293 = arith.index_cast %292 : i32 to index
    %c0_263 = arith.constant 0 : index
    %294 = vector.load %arg2[%293, %c0_263] : memref<64x128xf32, #tpu.memory_space<vmem>>, vector<1x128xf32>
    %c6_264 = arith.constant 6 : index
    %c0_265 = arith.constant 0 : index
    %295 = vector.load %arg9[%c6_264, %c0_265] : memref<16x128xf32, #tpu.memory_space<vmem>>, vector<1x128xf32>
    tpu.vector_store %arg9[%c6_264, %c0_265], %294 {strides = array<i32>} : memref<16x128xf32, #tpu.memory_space<vmem>>, vector<1x128xf32>,
    %296 = arith.index_cast %292 : i32 to index
    %c0_266 = arith.constant 0 : index
    %297 = vector.load %arg3[%296, %c0_266] : memref<64x128xf32, #tpu.memory_space<vmem>>, vector<1x128xf32>
    %c6_267 = arith.constant 6 : index
    %c0_268 = arith.constant 0 : index
    %298 = vector.load %arg10[%c6_267, %c0_268] : memref<16x128xf32, #tpu.memory_space<vmem>>, vector<1x128xf32>
    tpu.vector_store %arg10[%c6_267, %c0_268], %297 {strides = array<i32>} : memref<16x128xf32, #tpu.memory_space<vmem>>, vector<1x128xf32>,
    %c39 = arith.constant 39 : index
    %299 = memref.load %arg0[%c39] : memref<128xi32, #tpu.memory_space<smem>>
    %300 = arith.index_cast %299 : i32 to index
    %c0_269 = arith.constant 0 : index
    %301 = vector.load %arg2[%300, %c0_269] : memref<64x128xf32, #tpu.memory_space<vmem>>, vector<1x128xf32>
    %c7_270 = arith.constant 7 : index
    %c0_271 = arith.constant 0 : index
    %302 = vector.load %arg9[%c7_270, %c0_271] : memref<16x128xf32, #tpu.memory_space<vmem>>, vector<1x128xf32>
    tpu.vector_store %arg9[%c7_270, %c0_271], %301 {strides = array<i32>} : memref<16x128xf32, #tpu.memory_space<vmem>>, vector<1x128xf32>,
    %303 = arith.index_cast %299 : i32 to index
    %c0_272 = arith.constant 0 : index
    %304 = vector.load %arg3[%303, %c0_272] : memref<64x128xf32, #tpu.memory_space<vmem>>, vector<1x128xf32>
    %c7_273 = arith.constant 7 : index
    %c0_274 = arith.constant 0 : index
    %305 = vector.load %arg10[%c7_273, %c0_274] : memref<16x128xf32, #tpu.memory_space<vmem>>, vector<1x128xf32>
    tpu.vector_store %arg10[%c7_273, %c0_274], %304 {strides = array<i32>} : memref<16x128xf32, #tpu.memory_space<vmem>>, vector<1x128xf32>,
    %c40 = arith.constant 40 : index
    %306 = memref.load %arg0[%c40] : memref<128xi32, #tpu.memory_space<smem>>
    %307 = arith.index_cast %306 : i32 to index
    %c0_275 = arith.constant 0 : index
    %308 = vector.load %arg2[%307, %c0_275] : memref<64x128xf32, #tpu.memory_space<vmem>>, vector<1x128xf32>
    %c8_276 = arith.constant 8 : index
    %c0_277 = arith.constant 0 : index
    %309 = vector.load %arg9[%c8_276, %c0_277] : memref<16x128xf32, #tpu.memory_space<vmem>>, vector<1x128xf32>
    tpu.vector_store %arg9[%c8_276, %c0_277], %308 {strides = array<i32>} : memref<16x128xf32, #tpu.memory_space<vmem>>, vector<1x128xf32>,
    %310 = arith.index_cast %306 : i32 to index
    %c0_278 = arith.constant 0 : index
    %311 = vector.load %arg3[%310, %c0_278] : memref<64x128xf32, #tpu.memory_space<vmem>>, vector<1x128xf32>
    %c8_279 = arith.constant 8 : index
    %c0_280 = arith.constant 0 : index
    %312 = vector.load %arg10[%c8_279, %c0_280] : memref<16x128xf32, #tpu.memory_space<vmem>>, vector<1x128xf32>
    tpu.vector_store %arg10[%c8_279, %c0_280], %311 {strides = array<i32>} : memref<16x128xf32, #tpu.memory_space<vmem>>, vector<1x128xf32>,
    %c41 = arith.constant 41 : index
    %313 = memref.load %arg0[%c41] : memref<128xi32, #tpu.memory_space<smem>>
    %314 = arith.index_cast %313 : i32 to index
    %c0_281 = arith.constant 0 : index
    %315 = vector.load %arg2[%314, %c0_281] : memref<64x128xf32, #tpu.memory_space<vmem>>, vector<1x128xf32>
    %c9_282 = arith.constant 9 : index
    %c0_283 = arith.constant 0 : index
    %316 = vector.load %arg9[%c9_282, %c0_283] : memref<16x128xf32, #tpu.memory_space<vmem>>, vector<1x128xf32>
    tpu.vector_store %arg9[%c9_282, %c0_283], %315 {strides = array<i32>} : memref<16x128xf32, #tpu.memory_space<vmem>>, vector<1x128xf32>,
    %317 = arith.index_cast %313 : i32 to index
    %c0_284 = arith.constant 0 : index
    %318 = vector.load %arg3[%317, %c0_284] : memref<64x128xf32, #tpu.memory_space<vmem>>, vector<1x128xf32>
    %c9_285 = arith.constant 9 : index
    %c0_286 = arith.constant 0 : index
    %319 = vector.load %arg10[%c9_285, %c0_286] : memref<16x128xf32, #tpu.memory_space<vmem>>, vector<1x128xf32>
    tpu.vector_store %arg10[%c9_285, %c0_286], %318 {strides = array<i32>} : memref<16x128xf32, #tpu.memory_space<vmem>>, vector<1x128xf32>,
    %c42 = arith.constant 42 : index
    %320 = memref.load %arg0[%c42] : memref<128xi32, #tpu.memory_space<smem>>
    %321 = arith.index_cast %320 : i32 to index
    %c0_287 = arith.constant 0 : index
    %322 = vector.load %arg2[%321, %c0_287] : memref<64x128xf32, #tpu.memory_space<vmem>>, vector<1x128xf32>
    %c10_288 = arith.constant 10 : index
    %c0_289 = arith.constant 0 : index
    %323 = vector.load %arg9[%c10_288, %c0_289] : memref<16x128xf32, #tpu.memory_space<vmem>>, vector<1x128xf32>
    tpu.vector_store %arg9[%c10_288, %c0_289], %322 {strides = array<i32>} : memref<16x128xf32, #tpu.memory_space<vmem>>, vector<1x128xf32>,
    %324 = arith.index_cast %320 : i32 to index
    %c0_290 = arith.constant 0 : index
    %325 = vector.load %arg3[%324, %c0_290] : memref<64x128xf32, #tpu.memory_space<vmem>>, vector<1x128xf32>
    %c10_291 = arith.constant 10 : index
    %c0_292 = arith.constant 0 : index
    %326 = vector.load %arg10[%c10_291, %c0_292] : memref<16x128xf32, #tpu.memory_space<vmem>>, vector<1x128xf32>
    tpu.vector_store %arg10[%c10_291, %c0_292], %325 {strides = array<i32>} : memref<16x128xf32, #tpu.memory_space<vmem>>, vector<1x128xf32>,
    %c43 = arith.constant 43 : index
    %327 = memref.load %arg0[%c43] : memref<128xi32, #tpu.memory_space<smem>>
    %328 = arith.index_cast %327 : i32 to index
    %c0_293 = arith.constant 0 : index
    %329 = vector.load %arg2[%328, %c0_293] : memref<64x128xf32, #tpu.memory_space<vmem>>, vector<1x128xf32>
    %c11_294 = arith.constant 11 : index
    %c0_295 = arith.constant 0 : index
    %330 = vector.load %arg9[%c11_294, %c0_295] : memref<16x128xf32, #tpu.memory_space<vmem>>, vector<1x128xf32>
    tpu.vector_store %arg9[%c11_294, %c0_295], %329 {strides = array<i32>} : memref<16x128xf32, #tpu.memory_space<vmem>>, vector<1x128xf32>,
    %331 = arith.index_cast %327 : i32 to index
    %c0_296 = arith.constant 0 : index
    %332 = vector.load %arg3[%331, %c0_296] : memref<64x128xf32, #tpu.memory_space<vmem>>, vector<1x128xf32>
    %c11_297 = arith.constant 11 : index
    %c0_298 = arith.constant 0 : index
    %333 = vector.load %arg10[%c11_297, %c0_298] : memref<16x128xf32, #tpu.memory_space<vmem>>, vector<1x128xf32>
    tpu.vector_store %arg10[%c11_297, %c0_298], %332 {strides = array<i32>} : memref<16x128xf32, #tpu.memory_space<vmem>>, vector<1x128xf32>,
    %c44 = arith.constant 44 : index
    %334 = memref.load %arg0[%c44] : memref<128xi32, #tpu.memory_space<smem>>
    %335 = arith.index_cast %334 : i32 to index
    %c0_299 = arith.constant 0 : index
    %336 = vector.load %arg2[%335, %c0_299] : memref<64x128xf32, #tpu.memory_space<vmem>>, vector<1x128xf32>
    %c12_300 = arith.constant 12 : index
    %c0_301 = arith.constant 0 : index
    %337 = vector.load %arg9[%c12_300, %c0_301] : memref<16x128xf32, #tpu.memory_space<vmem>>, vector<1x128xf32>
    tpu.vector_store %arg9[%c12_300, %c0_301], %336 {strides = array<i32>} : memref<16x128xf32, #tpu.memory_space<vmem>>, vector<1x128xf32>,
    %338 = arith.index_cast %334 : i32 to index
    %c0_302 = arith.constant 0 : index
    %339 = vector.load %arg3[%338, %c0_302] : memref<64x128xf32, #tpu.memory_space<vmem>>, vector<1x128xf32>
    %c12_303 = arith.constant 12 : index
    %c0_304 = arith.constant 0 : index
    %340 = vector.load %arg10[%c12_303, %c0_304] : memref<16x128xf32, #tpu.memory_space<vmem>>, vector<1x128xf32>
    tpu.vector_store %arg10[%c12_303, %c0_304], %339 {strides = array<i32>} : memref<16x128xf32, #tpu.memory_space<vmem>>, vector<1x128xf32>,
    %c45 = arith.constant 45 : index
    %341 = memref.load %arg0[%c45] : memref<128xi32, #tpu.memory_space<smem>>
    %342 = arith.index_cast %341 : i32 to index
    %c0_305 = arith.constant 0 : index
    %343 = vector.load %arg2[%342, %c0_305] : memref<64x128xf32, #tpu.memory_space<vmem>>, vector<1x128xf32>
    %c13_306 = arith.constant 13 : index
    %c0_307 = arith.constant 0 : index
    %344 = vector.load %arg9[%c13_306, %c0_307] : memref<16x128xf32, #tpu.memory_space<vmem>>, vector<1x128xf32>
    tpu.vector_store %arg9[%c13_306, %c0_307], %343 {strides = array<i32>} : memref<16x128xf32, #tpu.memory_space<vmem>>, vector<1x128xf32>,
    %345 = arith.index_cast %341 : i32 to index
    %c0_308 = arith.constant 0 : index
    %346 = vector.load %arg3[%345, %c0_308] : memref<64x128xf32, #tpu.memory_space<vmem>>, vector<1x128xf32>
    %c13_309 = arith.constant 13 : index
    %c0_310 = arith.constant 0 : index
    %347 = vector.load %arg10[%c13_309, %c0_310] : memref<16x128xf32, #tpu.memory_space<vmem>>, vector<1x128xf32>
    tpu.vector_store %arg10[%c13_309, %c0_310], %346 {strides = array<i32>} : memref<16x128xf32, #tpu.memory_space<vmem>>, vector<1x128xf32>,
    %c46 = arith.constant 46 : index
    %348 = memref.load %arg0[%c46] : memref<128xi32, #tpu.memory_space<smem>>
    %349 = arith.index_cast %348 : i32 to index
    %c0_311 = arith.constant 0 : index
    %350 = vector.load %arg2[%349, %c0_311] : memref<64x128xf32, #tpu.memory_space<vmem>>, vector<1x128xf32>
    %c14_312 = arith.constant 14 : index
    %c0_313 = arith.constant 0 : index
    %351 = vector.load %arg9[%c14_312, %c0_313] : memref<16x128xf32, #tpu.memory_space<vmem>>, vector<1x128xf32>
    tpu.vector_store %arg9[%c14_312, %c0_313], %350 {strides = array<i32>} : memref<16x128xf32, #tpu.memory_space<vmem>>, vector<1x128xf32>,
    %352 = arith.index_cast %348 : i32 to index
    %c0_314 = arith.constant 0 : index
    %353 = vector.load %arg3[%352, %c0_314] : memref<64x128xf32, #tpu.memory_space<vmem>>, vector<1x128xf32>
    %c14_315 = arith.constant 14 : index
    %c0_316 = arith.constant 0 : index
    %354 = vector.load %arg10[%c14_315, %c0_316] : memref<16x128xf32, #tpu.memory_space<vmem>>, vector<1x128xf32>
    tpu.vector_store %arg10[%c14_315, %c0_316], %353 {strides = array<i32>} : memref<16x128xf32, #tpu.memory_space<vmem>>, vector<1x128xf32>,
    %c47 = arith.constant 47 : index
    %355 = memref.load %arg0[%c47] : memref<128xi32, #tpu.memory_space<smem>>
    %356 = arith.index_cast %355 : i32 to index
    %c0_317 = arith.constant 0 : index
    %357 = vector.load %arg2[%356, %c0_317] : memref<64x128xf32, #tpu.memory_space<vmem>>, vector<1x128xf32>
    %c15_318 = arith.constant 15 : index
    %c0_319 = arith.constant 0 : index
    %358 = vector.load %arg9[%c15_318, %c0_319] : memref<16x128xf32, #tpu.memory_space<vmem>>, vector<1x128xf32>
    tpu.vector_store %arg9[%c15_318, %c0_319], %357 {strides = array<i32>} : memref<16x128xf32, #tpu.memory_space<vmem>>, vector<1x128xf32>,
    %359 = arith.index_cast %355 : i32 to index
    %c0_320 = arith.constant 0 : index
    %360 = vector.load %arg3[%359, %c0_320] : memref<64x128xf32, #tpu.memory_space<vmem>>, vector<1x128xf32>
    %c15_321 = arith.constant 15 : index
    %c0_322 = arith.constant 0 : index
    %361 = vector.load %arg10[%c15_321, %c0_322] : memref<16x128xf32, #tpu.memory_space<vmem>>, vector<1x128xf32>
    tpu.vector_store %arg10[%c15_321, %c0_322], %360 {strides = array<i32>} : memref<16x128xf32, #tpu.memory_space<vmem>>, vector<1x128xf32>,
    %c0_323 = arith.constant 0 : index
    %c0_324 = arith.constant 0 : index
    %362 = vector.load %arg9[%c0_323, %c0_324] : memref<16x128xf32, #tpu.memory_space<vmem>>, vector<16x128xf32>
    %cst_325 = arith.constant dense<0.000000e+00> : vector<1x16xf32>
    %363 = tpu.matmul %248, %362, %cst_325 {dimension_numbers = #tpu.dot_dimension_numbers<[1], [1], [0], [0], [0, 0, 1, 0], [], []>} : vector<1x128xf32>, vector<16x128xf32>, vector<1x16xf32> -> vector<1x16xf32>
    %cst_326 = arith.constant 14.2857141 : f32
    %364 = vector.broadcast %cst_326 : f32 to vector<1x16xf32>
    %365 = arith.mulf %363, %364 : vector<1x16xf32>
    %c0_327 = arith.constant 0 : index
    %c0_328 = arith.constant 0 : index
    %366 = vector.load %arg10[%c0_327, %c0_328] : memref<16x128xf32, #tpu.memory_space<vmem>>, vector<16x128xf32>
    %cst_329 = arith.constant dense<0.000000e+00> : vector<1x16xf32>
    %367 = tpu.matmul %249, %366, %cst_329 {dimension_numbers = #tpu.dot_dimension_numbers<[1], [1], [0], [0], [0, 0, 1, 0], [], []>} : vector<1x128xf32>, vector<16x128xf32>, vector<1x16xf32> -> vector<1x16xf32>
    %cst_330 = arith.constant 14.2857141 : f32
    %368 = vector.broadcast %cst_330 : f32 to vector<1x16xf32>
    %369 = arith.mulf %367, %368 : vector<1x16xf32>
    %c2_331 = arith.constant 2 : index
    %c0_332 = arith.constant 0 : index
    %370 = vector.load %arg11[%c2_331, %c0_332] : memref<8x16xf32, #tpu.memory_space<vmem>>, vector<1x16xf32>
    tpu.vector_store %arg11[%c2_331, %c0_332], %365 {strides = array<i32>} : memref<8x16xf32, #tpu.memory_space<vmem>>, vector<1x16xf32>,
    %c2_333 = arith.constant 2 : index
    %c0_334 = arith.constant 0 : index
    %371 = vector.load %arg12[%c2_333, %c0_334] : memref<8x16xf32, #tpu.memory_space<vmem>>, vector<1x16xf32>
    tpu.vector_store %arg12[%c2_333, %c0_334], %369 {strides = array<i32>} : memref<8x16xf32, #tpu.memory_space<vmem>>, vector<1x16xf32>,
    %c3_335 = arith.constant 3 : index
    %c0_336 = arith.constant 0 : index
    %372 = vector.load %arg4[%c3_335, %c0_336] : memref<8x128xf32, #tpu.memory_space<vmem>>, vector<1x128xf32>
    %c3_337 = arith.constant 3 : index
    %c0_338 = arith.constant 0 : index
    %373 = vector.load %arg5[%c3_337, %c0_338] : memref<8x128xf32, #tpu.memory_space<vmem>>, vector<1x128xf32>
    %c48 = arith.constant 48 : index
    %374 = memref.load %arg0[%c48] : memref<128xi32, #tpu.memory_space<smem>>
    %375 = arith.index_cast %374 : i32 to index
    %c0_339 = arith.constant 0 : index
    %376 = vector.load %arg2[%375, %c0_339] : memref<64x128xf32, #tpu.memory_space<vmem>>, vector<1x128xf32>
    %c0_340 = arith.constant 0 : index
    %c0_341 = arith.constant 0 : index
    %377 = vector.load %arg9[%c0_340, %c0_341] : memref<16x128xf32, #tpu.memory_space<vmem>>, vector<1x128xf32>
    tpu.vector_store %arg9[%c0_340, %c0_341], %376 {strides = array<i32>} : memref<16x128xf32, #tpu.memory_space<vmem>>, vector<1x128xf32>,
    %378 = arith.index_cast %374 : i32 to index
    %c0_342 = arith.constant 0 : index
    %379 = vector.load %arg3[%378, %c0_342] : memref<64x128xf32, #tpu.memory_space<vmem>>, vector<1x128xf32>
    %c0_343 = arith.constant 0 : index
    %c0_344 = arith.constant 0 : index
    %380 = vector.load %arg10[%c0_343, %c0_344] : memref<16x128xf32, #tpu.memory_space<vmem>>, vector<1x128xf32>
    tpu.vector_store %arg10[%c0_343, %c0_344], %379 {strides = array<i32>} : memref<16x128xf32, #tpu.memory_space<vmem>>, vector<1x128xf32>,
    %c49 = arith.constant 49 : index
    %381 = memref.load %arg0[%c49] : memref<128xi32, #tpu.memory_space<smem>>
    %382 = arith.index_cast %381 : i32 to index
    %c0_345 = arith.constant 0 : index
    %383 = vector.load %arg2[%382, %c0_345] : memref<64x128xf32, #tpu.memory_space<vmem>>, vector<1x128xf32>
    %c1_346 = arith.constant 1 : index
    %c0_347 = arith.constant 0 : index
    %384 = vector.load %arg9[%c1_346, %c0_347] : memref<16x128xf32, #tpu.memory_space<vmem>>, vector<1x128xf32>
    tpu.vector_store %arg9[%c1_346, %c0_347], %383 {strides = array<i32>} : memref<16x128xf32, #tpu.memory_space<vmem>>, vector<1x128xf32>,
    %385 = arith.index_cast %381 : i32 to index
    %c0_348 = arith.constant 0 : index
    %386 = vector.load %arg3[%385, %c0_348] : memref<64x128xf32, #tpu.memory_space<vmem>>, vector<1x128xf32>
    %c1_349 = arith.constant 1 : index
    %c0_350 = arith.constant 0 : index
    %387 = vector.load %arg10[%c1_349, %c0_350] : memref<16x128xf32, #tpu.memory_space<vmem>>, vector<1x128xf32>
    tpu.vector_store %arg10[%c1_349, %c0_350], %386 {strides = array<i32>} : memref<16x128xf32, #tpu.memory_space<vmem>>, vector<1x128xf32>,
    %c50 = arith.constant 50 : index
    %388 = memref.load %arg0[%c50] : memref<128xi32, #tpu.memory_space<smem>>
    %389 = arith.index_cast %388 : i32 to index
    %c0_351 = arith.constant 0 : index
    %390 = vector.load %arg2[%389, %c0_351] : memref<64x128xf32, #tpu.memory_space<vmem>>, vector<1x128xf32>
    %c2_352 = arith.constant 2 : index
    %c0_353 = arith.constant 0 : index
    %391 = vector.load %arg9[%c2_352, %c0_353] : memref<16x128xf32, #tpu.memory_space<vmem>>, vector<1x128xf32>
    tpu.vector_store %arg9[%c2_352, %c0_353], %390 {strides = array<i32>} : memref<16x128xf32, #tpu.memory_space<vmem>>, vector<1x128xf32>,
    %392 = arith.index_cast %388 : i32 to index
    %c0_354 = arith.constant 0 : index
    %393 = vector.load %arg3[%392, %c0_354] : memref<64x128xf32, #tpu.memory_space<vmem>>, vector<1x128xf32>
    %c2_355 = arith.constant 2 : index
    %c0_356 = arith.constant 0 : index
    %394 = vector.load %arg10[%c2_355, %c0_356] : memref<16x128xf32, #tpu.memory_space<vmem>>, vector<1x128xf32>
    tpu.vector_store %arg10[%c2_355, %c0_356], %393 {strides = array<i32>} : memref<16x128xf32, #tpu.memory_space<vmem>>, vector<1x128xf32>,
    %c51 = arith.constant 51 : index
    %395 = memref.load %arg0[%c51] : memref<128xi32, #tpu.memory_space<smem>>
    %396 = arith.index_cast %395 : i32 to index
    %c0_357 = arith.constant 0 : index
    %397 = vector.load %arg2[%396, %c0_357] : memref<64x128xf32, #tpu.memory_space<vmem>>, vector<1x128xf32>
    %c3_358 = arith.constant 3 : index
    %c0_359 = arith.constant 0 : index
    %398 = vector.load %arg9[%c3_358, %c0_359] : memref<16x128xf32, #tpu.memory_space<vmem>>, vector<1x128xf32>
    tpu.vector_store %arg9[%c3_358, %c0_359], %397 {strides = array<i32>} : memref<16x128xf32, #tpu.memory_space<vmem>>, vector<1x128xf32>,
    %399 = arith.index_cast %395 : i32 to index
    %c0_360 = arith.constant 0 : index
    %400 = vector.load %arg3[%399, %c0_360] : memref<64x128xf32, #tpu.memory_space<vmem>>, vector<1x128xf32>
    %c3_361 = arith.constant 3 : index
    %c0_362 = arith.constant 0 : index
    %401 = vector.load %arg10[%c3_361, %c0_362] : memref<16x128xf32, #tpu.memory_space<vmem>>, vector<1x128xf32>
    tpu.vector_store %arg10[%c3_361, %c0_362], %400 {strides = array<i32>} : memref<16x128xf32, #tpu.memory_space<vmem>>, vector<1x128xf32>,
    %c52 = arith.constant 52 : index
    %402 = memref.load %arg0[%c52] : memref<128xi32, #tpu.memory_space<smem>>
    %403 = arith.index_cast %402 : i32 to index
    %c0_363 = arith.constant 0 : index
    %404 = vector.load %arg2[%403, %c0_363] : memref<64x128xf32, #tpu.memory_space<vmem>>, vector<1x128xf32>
    %c4_364 = arith.constant 4 : index
    %c0_365 = arith.constant 0 : index
    %405 = vector.load %arg9[%c4_364, %c0_365] : memref<16x128xf32, #tpu.memory_space<vmem>>, vector<1x128xf32>
    tpu.vector_store %arg9[%c4_364, %c0_365], %404 {strides = array<i32>} : memref<16x128xf32, #tpu.memory_space<vmem>>, vector<1x128xf32>,
    %406 = arith.index_cast %402 : i32 to index
    %c0_366 = arith.constant 0 : index
    %407 = vector.load %arg3[%406, %c0_366] : memref<64x128xf32, #tpu.memory_space<vmem>>, vector<1x128xf32>
    %c4_367 = arith.constant 4 : index
    %c0_368 = arith.constant 0 : index
    %408 = vector.load %arg10[%c4_367, %c0_368] : memref<16x128xf32, #tpu.memory_space<vmem>>, vector<1x128xf32>
    tpu.vector_store %arg10[%c4_367, %c0_368], %407 {strides = array<i32>} : memref<16x128xf32, #tpu.memory_space<vmem>>, vector<1x128xf32>,
    %c53 = arith.constant 53 : index
    %409 = memref.load %arg0[%c53] : memref<128xi32, #tpu.memory_space<smem>>
    %410 = arith.index_cast %409 : i32 to index
    %c0_369 = arith.constant 0 : index
    %411 = vector.load %arg2[%410, %c0_369] : memref<64x128xf32, #tpu.memory_space<vmem>>, vector<1x128xf32>
    %c5_370 = arith.constant 5 : index
    %c0_371 = arith.constant 0 : index
    %412 = vector.load %arg9[%c5_370, %c0_371] : memref<16x128xf32, #tpu.memory_space<vmem>>, vector<1x128xf32>
    tpu.vector_store %arg9[%c5_370, %c0_371], %411 {strides = array<i32>} : memref<16x128xf32, #tpu.memory_space<vmem>>, vector<1x128xf32>,
    %413 = arith.index_cast %409 : i32 to index
    %c0_372 = arith.constant 0 : index
    %414 = vector.load %arg3[%413, %c0_372] : memref<64x128xf32, #tpu.memory_space<vmem>>, vector<1x128xf32>
    %c5_373 = arith.constant 5 : index
    %c0_374 = arith.constant 0 : index
    %415 = vector.load %arg10[%c5_373, %c0_374] : memref<16x128xf32, #tpu.memory_space<vmem>>, vector<1x128xf32>
    tpu.vector_store %arg10[%c5_373, %c0_374], %414 {strides = array<i32>} : memref<16x128xf32, #tpu.memory_space<vmem>>, vector<1x128xf32>,
    %c54 = arith.constant 54 : index
    %416 = memref.load %arg0[%c54] : memref<128xi32, #tpu.memory_space<smem>>
    %417 = arith.index_cast %416 : i32 to index
    %c0_375 = arith.constant 0 : index
    %418 = vector.load %arg2[%417, %c0_375] : memref<64x128xf32, #tpu.memory_space<vmem>>, vector<1x128xf32>
    %c6_376 = arith.constant 6 : index
    %c0_377 = arith.constant 0 : index
    %419 = vector.load %arg9[%c6_376, %c0_377] : memref<16x128xf32, #tpu.memory_space<vmem>>, vector<1x128xf32>
    tpu.vector_store %arg9[%c6_376, %c0_377], %418 {strides = array<i32>} : memref<16x128xf32, #tpu.memory_space<vmem>>, vector<1x128xf32>,
    %420 = arith.index_cast %416 : i32 to index
    %c0_378 = arith.constant 0 : index
    %421 = vector.load %arg3[%420, %c0_378] : memref<64x128xf32, #tpu.memory_space<vmem>>, vector<1x128xf32>
    %c6_379 = arith.constant 6 : index
    %c0_380 = arith.constant 0 : index
    %422 = vector.load %arg10[%c6_379, %c0_380] : memref<16x128xf32, #tpu.memory_space<vmem>>, vector<1x128xf32>
    tpu.vector_store %arg10[%c6_379, %c0_380], %421 {strides = array<i32>} : memref<16x128xf32, #tpu.memory_space<vmem>>, vector<1x128xf32>,
    %c55 = arith.constant 55 : index
    %423 = memref.load %arg0[%c55] : memref<128xi32, #tpu.memory_space<smem>>
    %424 = arith.index_cast %423 : i32 to index
    %c0_381 = arith.constant 0 : index
    %425 = vector.load %arg2[%424, %c0_381] : memref<64x128xf32, #tpu.memory_space<vmem>>, vector<1x128xf32>
    %c7_382 = arith.constant 7 : index
    %c0_383 = arith.constant 0 : index
    %426 = vector.load %arg9[%c7_382, %c0_383] : memref<16x128xf32, #tpu.memory_space<vmem>>, vector<1x128xf32>
    tpu.vector_store %arg9[%c7_382, %c0_383], %425 {strides = array<i32>} : memref<16x128xf32, #tpu.memory_space<vmem>>, vector<1x128xf32>,
    %427 = arith.index_cast %423 : i32 to index
    %c0_384 = arith.constant 0 : index
    %428 = vector.load %arg3[%427, %c0_384] : memref<64x128xf32, #tpu.memory_space<vmem>>, vector<1x128xf32>
    %c7_385 = arith.constant 7 : index
    %c0_386 = arith.constant 0 : index
    %429 = vector.load %arg10[%c7_385, %c0_386] : memref<16x128xf32, #tpu.memory_space<vmem>>, vector<1x128xf32>
    tpu.vector_store %arg10[%c7_385, %c0_386], %428 {strides = array<i32>} : memref<16x128xf32, #tpu.memory_space<vmem>>, vector<1x128xf32>,
    %c56 = arith.constant 56 : index
    %430 = memref.load %arg0[%c56] : memref<128xi32, #tpu.memory_space<smem>>
    %431 = arith.index_cast %430 : i32 to index
    %c0_387 = arith.constant 0 : index
    %432 = vector.load %arg2[%431, %c0_387] : memref<64x128xf32, #tpu.memory_space<vmem>>, vector<1x128xf32>
    %c8_388 = arith.constant 8 : index
    %c0_389 = arith.constant 0 : index
    %433 = vector.load %arg9[%c8_388, %c0_389] : memref<16x128xf32, #tpu.memory_space<vmem>>, vector<1x128xf32>
    tpu.vector_store %arg9[%c8_388, %c0_389], %432 {strides = array<i32>} : memref<16x128xf32, #tpu.memory_space<vmem>>, vector<1x128xf32>,
    %434 = arith.index_cast %430 : i32 to index
    %c0_390 = arith.constant 0 : index
    %435 = vector.load %arg3[%434, %c0_390] : memref<64x128xf32, #tpu.memory_space<vmem>>, vector<1x128xf32>
    %c8_391 = arith.constant 8 : index
    %c0_392 = arith.constant 0 : index
    %436 = vector.load %arg10[%c8_391, %c0_392] : memref<16x128xf32, #tpu.memory_space<vmem>>, vector<1x128xf32>
    tpu.vector_store %arg10[%c8_391, %c0_392], %435 {strides = array<i32>} : memref<16x128xf32, #tpu.memory_space<vmem>>, vector<1x128xf32>,
    %c57 = arith.constant 57 : index
    %437 = memref.load %arg0[%c57] : memref<128xi32, #tpu.memory_space<smem>>
    %438 = arith.index_cast %437 : i32 to index
    %c0_393 = arith.constant 0 : index
    %439 = vector.load %arg2[%438, %c0_393] : memref<64x128xf32, #tpu.memory_space<vmem>>, vector<1x128xf32>
    %c9_394 = arith.constant 9 : index
    %c0_395 = arith.constant 0 : index
    %440 = vector.load %arg9[%c9_394, %c0_395] : memref<16x128xf32, #tpu.memory_space<vmem>>, vector<1x128xf32>
    tpu.vector_store %arg9[%c9_394, %c0_395], %439 {strides = array<i32>} : memref<16x128xf32, #tpu.memory_space<vmem>>, vector<1x128xf32>,
    %441 = arith.index_cast %437 : i32 to index
    %c0_396 = arith.constant 0 : index
    %442 = vector.load %arg3[%441, %c0_396] : memref<64x128xf32, #tpu.memory_space<vmem>>, vector<1x128xf32>
    %c9_397 = arith.constant 9 : index
    %c0_398 = arith.constant 0 : index
    %443 = vector.load %arg10[%c9_397, %c0_398] : memref<16x128xf32, #tpu.memory_space<vmem>>, vector<1x128xf32>
    tpu.vector_store %arg10[%c9_397, %c0_398], %442 {strides = array<i32>} : memref<16x128xf32, #tpu.memory_space<vmem>>, vector<1x128xf32>,
    %c58 = arith.constant 58 : index
    %444 = memref.load %arg0[%c58] : memref<128xi32, #tpu.memory_space<smem>>
    %445 = arith.index_cast %444 : i32 to index
    %c0_399 = arith.constant 0 : index
    %446 = vector.load %arg2[%445, %c0_399] : memref<64x128xf32, #tpu.memory_space<vmem>>, vector<1x128xf32>
    %c10_400 = arith.constant 10 : index
    %c0_401 = arith.constant 0 : index
    %447 = vector.load %arg9[%c10_400, %c0_401] : memref<16x128xf32, #tpu.memory_space<vmem>>, vector<1x128xf32>
    tpu.vector_store %arg9[%c10_400, %c0_401], %446 {strides = array<i32>} : memref<16x128xf32, #tpu.memory_space<vmem>>, vector<1x128xf32>,
    %448 = arith.index_cast %444 : i32 to index
    %c0_402 = arith.constant 0 : index
    %449 = vector.load %arg3[%448, %c0_402] : memref<64x128xf32, #tpu.memory_space<vmem>>, vector<1x128xf32>
    %c10_403 = arith.constant 10 : index
    %c0_404 = arith.constant 0 : index
    %450 = vector.load %arg10[%c10_403, %c0_404] : memref<16x128xf32, #tpu.memory_space<vmem>>, vector<1x128xf32>
    tpu.vector_store %arg10[%c10_403, %c0_404], %449 {strides = array<i32>} : memref<16x128xf32, #tpu.memory_space<vmem>>, vector<1x128xf32>,
    %c59 = arith.constant 59 : index
    %451 = memref.load %arg0[%c59] : memref<128xi32, #tpu.memory_space<smem>>
    %452 = arith.index_cast %451 : i32 to index
    %c0_405 = arith.constant 0 : index
    %453 = vector.load %arg2[%452, %c0_405] : memref<64x128xf32, #tpu.memory_space<vmem>>, vector<1x128xf32>
    %c11_406 = arith.constant 11 : index
    %c0_407 = arith.constant 0 : index
    %454 = vector.load %arg9[%c11_406, %c0_407] : memref<16x128xf32, #tpu.memory_space<vmem>>, vector<1x128xf32>
    tpu.vector_store %arg9[%c11_406, %c0_407], %453 {strides = array<i32>} : memref<16x128xf32, #tpu.memory_space<vmem>>, vector<1x128xf32>,
    %455 = arith.index_cast %451 : i32 to index
    %c0_408 = arith.constant 0 : index
    %456 = vector.load %arg3[%455, %c0_408] : memref<64x128xf32, #tpu.memory_space<vmem>>, vector<1x128xf32>
    %c11_409 = arith.constant 11 : index
    %c0_410 = arith.constant 0 : index
    %457 = vector.load %arg10[%c11_409, %c0_410] : memref<16x128xf32, #tpu.memory_space<vmem>>, vector<1x128xf32>
    tpu.vector_store %arg10[%c11_409, %c0_410], %456 {strides = array<i32>} : memref<16x128xf32, #tpu.memory_space<vmem>>, vector<1x128xf32>,
    %c60 = arith.constant 60 : index
    %458 = memref.load %arg0[%c60] : memref<128xi32, #tpu.memory_space<smem>>
    %459 = arith.index_cast %458 : i32 to index
    %c0_411 = arith.constant 0 : index
    %460 = vector.load %arg2[%459, %c0_411] : memref<64x128xf32, #tpu.memory_space<vmem>>, vector<1x128xf32>
    %c12_412 = arith.constant 12 : index
    %c0_413 = arith.constant 0 : index
    %461 = vector.load %arg9[%c12_412, %c0_413] : memref<16x128xf32, #tpu.memory_space<vmem>>, vector<1x128xf32>
    tpu.vector_store %arg9[%c12_412, %c0_413], %460 {strides = array<i32>} : memref<16x128xf32, #tpu.memory_space<vmem>>, vector<1x128xf32>,
    %462 = arith.index_cast %458 : i32 to index
    %c0_414 = arith.constant 0 : index
    %463 = vector.load %arg3[%462, %c0_414] : memref<64x128xf32, #tpu.memory_space<vmem>>, vector<1x128xf32>
    %c12_415 = arith.constant 12 : index
    %c0_416 = arith.constant 0 : index
    %464 = vector.load %arg10[%c12_415, %c0_416] : memref<16x128xf32, #tpu.memory_space<vmem>>, vector<1x128xf32>
    tpu.vector_store %arg10[%c12_415, %c0_416], %463 {strides = array<i32>} : memref<16x128xf32, #tpu.memory_space<vmem>>, vector<1x128xf32>,
    %c61 = arith.constant 61 : index
    %465 = memref.load %arg0[%c61] : memref<128xi32, #tpu.memory_space<smem>>
    %466 = arith.index_cast %465 : i32 to index
    %c0_417 = arith.constant 0 : index
    %467 = vector.load %arg2[%466, %c0_417] : memref<64x128xf32, #tpu.memory_space<vmem>>, vector<1x128xf32>
    %c13_418 = arith.constant 13 : index
    %c0_419 = arith.constant 0 : index
    %468 = vector.load %arg9[%c13_418, %c0_419] : memref<16x128xf32, #tpu.memory_space<vmem>>, vector<1x128xf32>
    tpu.vector_store %arg9[%c13_418, %c0_419], %467 {strides = array<i32>} : memref<16x128xf32, #tpu.memory_space<vmem>>, vector<1x128xf32>,
    %469 = arith.index_cast %465 : i32 to index
    %c0_420 = arith.constant 0 : index
    %470 = vector.load %arg3[%469, %c0_420] : memref<64x128xf32, #tpu.memory_space<vmem>>, vector<1x128xf32>
    %c13_421 = arith.constant 13 : index
    %c0_422 = arith.constant 0 : index
    %471 = vector.load %arg10[%c13_421, %c0_422] : memref<16x128xf32, #tpu.memory_space<vmem>>, vector<1x128xf32>
    tpu.vector_store %arg10[%c13_421, %c0_422], %470 {strides = array<i32>} : memref<16x128xf32, #tpu.memory_space<vmem>>, vector<1x128xf32>,
    %c62 = arith.constant 62 : index
    %472 = memref.load %arg0[%c62] : memref<128xi32, #tpu.memory_space<smem>>
    %473 = arith.index_cast %472 : i32 to index
    %c0_423 = arith.constant 0 : index
    %474 = vector.load %arg2[%473, %c0_423] : memref<64x128xf32, #tpu.memory_space<vmem>>, vector<1x128xf32>
    %c14_424 = arith.constant 14 : index
    %c0_425 = arith.constant 0 : index
    %475 = vector.load %arg9[%c14_424, %c0_425] : memref<16x128xf32, #tpu.memory_space<vmem>>, vector<1x128xf32>
    tpu.vector_store %arg9[%c14_424, %c0_425], %474 {strides = array<i32>} : memref<16x128xf32, #tpu.memory_space<vmem>>, vector<1x128xf32>,
    %476 = arith.index_cast %472 : i32 to index
    %c0_426 = arith.constant 0 : index
    %477 = vector.load %arg3[%476, %c0_426] : memref<64x128xf32, #tpu.memory_space<vmem>>, vector<1x128xf32>
    %c14_427 = arith.constant 14 : index
    %c0_428 = arith.constant 0 : index
    %478 = vector.load %arg10[%c14_427, %c0_428] : memref<16x128xf32, #tpu.memory_space<vmem>>, vector<1x128xf32>
    tpu.vector_store %arg10[%c14_427, %c0_428], %477 {strides = array<i32>} : memref<16x128xf32, #tpu.memory_space<vmem>>, vector<1x128xf32>,
    %c63 = arith.constant 63 : index
    %479 = memref.load %arg0[%c63] : memref<128xi32, #tpu.memory_space<smem>>
    %480 = arith.index_cast %479 : i32 to index
    %c0_429 = arith.constant 0 : index
    %481 = vector.load %arg2[%480, %c0_429] : memref<64x128xf32, #tpu.memory_space<vmem>>, vector<1x128xf32>
    %c15_430 = arith.constant 15 : index
    %c0_431 = arith.constant 0 : index
    %482 = vector.load %arg9[%c15_430, %c0_431] : memref<16x128xf32, #tpu.memory_space<vmem>>, vector<1x128xf32>
    tpu.vector_store %arg9[%c15_430, %c0_431], %481 {strides = array<i32>} : memref<16x128xf32, #tpu.memory_space<vmem>>, vector<1x128xf32>,
    %483 = arith.index_cast %479 : i32 to index
    %c0_432 = arith.constant 0 : index
    %484 = vector.load %arg3[%483, %c0_432] : memref<64x128xf32, #tpu.memory_space<vmem>>, vector<1x128xf32>
    %c15_433 = arith.constant 15 : index
    %c0_434 = arith.constant 0 : index
    %485 = vector.load %arg10[%c15_433, %c0_434] : memref<16x128xf32, #tpu.memory_space<vmem>>, vector<1x128xf32>
    tpu.vector_store %arg10[%c15_433, %c0_434], %484 {strides = array<i32>} : memref<16x128xf32, #tpu.memory_space<vmem>>, vector<1x128xf32>,
    %c0_435 = arith.constant 0 : index
    %c0_436 = arith.constant 0 : index
    %486 = vector.load %arg9[%c0_435, %c0_436] : memref<16x128xf32, #tpu.memory_space<vmem>>, vector<16x128xf32>
    %cst_437 = arith.constant dense<0.000000e+00> : vector<1x16xf32>
    %487 = tpu.matmul %372, %486, %cst_437 {dimension_numbers = #tpu.dot_dimension_numbers<[1], [1], [0], [0], [0, 0, 1, 0], [], []>} : vector<1x128xf32>, vector<16x128xf32>, vector<1x16xf32> -> vector<1x16xf32>
    %cst_438 = arith.constant 14.2857141 : f32
    %488 = vector.broadcast %cst_438 : f32 to vector<1x16xf32>
    %489 = arith.mulf %487, %488 : vector<1x16xf32>
    %c0_439 = arith.constant 0 : index
    %c0_440 = arith.constant 0 : index
    %490 = vector.load %arg10[%c0_439, %c0_440] : memref<16x128xf32, #tpu.memory_space<vmem>>, vector<16x128xf32>
    %cst_441 = arith.constant dense<0.000000e+00> : vector<1x16xf32>
    %491 = tpu.matmul %373, %490, %cst_441 {dimension_numbers = #tpu.dot_dimension_numbers<[1], [1], [0], [0], [0, 0, 1, 0], [], []>} : vector<1x128xf32>, vector<16x128xf32>, vector<1x16xf32> -> vector<1x16xf32>
    %cst_442 = arith.constant 14.2857141 : f32
    %492 = vector.broadcast %cst_442 : f32 to vector<1x16xf32>
    %493 = arith.mulf %491, %492 : vector<1x16xf32>
    %c3_443 = arith.constant 3 : index
    %c0_444 = arith.constant 0 : index
    %494 = vector.load %arg11[%c3_443, %c0_444] : memref<8x16xf32, #tpu.memory_space<vmem>>, vector<1x16xf32>
    tpu.vector_store %arg11[%c3_443, %c0_444], %489 {strides = array<i32>} : memref<8x16xf32, #tpu.memory_space<vmem>>, vector<1x16xf32>,
    %c3_445 = arith.constant 3 : index
    %c0_446 = arith.constant 0 : index
    %495 = vector.load %arg12[%c3_445, %c0_446] : memref<8x16xf32, #tpu.memory_space<vmem>>, vector<1x16xf32>
    tpu.vector_store %arg12[%c3_445, %c0_446], %493 {strides = array<i32>} : memref<8x16xf32, #tpu.memory_space<vmem>>, vector<1x16xf32>,
    %c4_447 = arith.constant 4 : index
    %c0_448 = arith.constant 0 : index
    %496 = vector.load %arg4[%c4_447, %c0_448] : memref<8x128xf32, #tpu.memory_space<vmem>>, vector<1x128xf32>
    %c4_449 = arith.constant 4 : index
    %c0_450 = arith.constant 0 : index
    %497 = vector.load %arg5[%c4_449, %c0_450] : memref<8x128xf32, #tpu.memory_space<vmem>>, vector<1x128xf32>
    %c64 = arith.constant 64 : index
    %498 = memref.load %arg0[%c64] : memref<128xi32, #tpu.memory_space<smem>>
    %499 = arith.index_cast %498 : i32 to index
    %c0_451 = arith.constant 0 : index
    %500 = vector.load %arg2[%499, %c0_451] : memref<64x128xf32, #tpu.memory_space<vmem>>, vector<1x128xf32>
    %c0_452 = arith.constant 0 : index
    %c0_453 = arith.constant 0 : index
    %501 = vector.load %arg9[%c0_452, %c0_453] : memref<16x128xf32, #tpu.memory_space<vmem>>, vector<1x128xf32>
    tpu.vector_store %arg9[%c0_452, %c0_453], %500 {strides = array<i32>} : memref<16x128xf32, #tpu.memory_space<vmem>>, vector<1x128xf32>,
    %502 = arith.index_cast %498 : i32 to index
    %c0_454 = arith.constant 0 : index
    %503 = vector.load %arg3[%502, %c0_454] : memref<64x128xf32, #tpu.memory_space<vmem>>, vector<1x128xf32>
    %c0_455 = arith.constant 0 : index
    %c0_456 = arith.constant 0 : index
    %504 = vector.load %arg10[%c0_455, %c0_456] : memref<16x128xf32, #tpu.memory_space<vmem>>, vector<1x128xf32>
    tpu.vector_store %arg10[%c0_455, %c0_456], %503 {strides = array<i32>} : memref<16x128xf32, #tpu.memory_space<vmem>>, vector<1x128xf32>,
    %c65 = arith.constant 65 : index
    %505 = memref.load %arg0[%c65] : memref<128xi32, #tpu.memory_space<smem>>
    %506 = arith.index_cast %505 : i32 to index
    %c0_457 = arith.constant 0 : index
    %507 = vector.load %arg2[%506, %c0_457] : memref<64x128xf32, #tpu.memory_space<vmem>>, vector<1x128xf32>
    %c1_458 = arith.constant 1 : index
    %c0_459 = arith.constant 0 : index
    %508 = vector.load %arg9[%c1_458, %c0_459] : memref<16x128xf32, #tpu.memory_space<vmem>>, vector<1x128xf32>
    tpu.vector_store %arg9[%c1_458, %c0_459], %507 {strides = array<i32>} : memref<16x128xf32, #tpu.memory_space<vmem>>, vector<1x128xf32>,
    %509 = arith.index_cast %505 : i32 to index
    %c0_460 = arith.constant 0 : index
    %510 = vector.load %arg3[%509, %c0_460] : memref<64x128xf32, #tpu.memory_space<vmem>>, vector<1x128xf32>
    %c1_461 = arith.constant 1 : index
    %c0_462 = arith.constant 0 : index
    %511 = vector.load %arg10[%c1_461, %c0_462] : memref<16x128xf32, #tpu.memory_space<vmem>>, vector<1x128xf32>
    tpu.vector_store %arg10[%c1_461, %c0_462], %510 {strides = array<i32>} : memref<16x128xf32, #tpu.memory_space<vmem>>, vector<1x128xf32>,
    %c66 = arith.constant 66 : index
    %512 = memref.load %arg0[%c66] : memref<128xi32, #tpu.memory_space<smem>>
    %513 = arith.index_cast %512 : i32 to index
    %c0_463 = arith.constant 0 : index
    %514 = vector.load %arg2[%513, %c0_463] : memref<64x128xf32, #tpu.memory_space<vmem>>, vector<1x128xf32>
    %c2_464 = arith.constant 2 : index
    %c0_465 = arith.constant 0 : index
    %515 = vector.load %arg9[%c2_464, %c0_465] : memref<16x128xf32, #tpu.memory_space<vmem>>, vector<1x128xf32>
    tpu.vector_store %arg9[%c2_464, %c0_465], %514 {strides = array<i32>} : memref<16x128xf32, #tpu.memory_space<vmem>>, vector<1x128xf32>,
    %516 = arith.index_cast %512 : i32 to index
    %c0_466 = arith.constant 0 : index
    %517 = vector.load %arg3[%516, %c0_466] : memref<64x128xf32, #tpu.memory_space<vmem>>, vector<1x128xf32>
    %c2_467 = arith.constant 2 : index
    %c0_468 = arith.constant 0 : index
    %518 = vector.load %arg10[%c2_467, %c0_468] : memref<16x128xf32, #tpu.memory_space<vmem>>, vector<1x128xf32>
    tpu.vector_store %arg10[%c2_467, %c0_468], %517 {strides = array<i32>} : memref<16x128xf32, #tpu.memory_space<vmem>>, vector<1x128xf32>,
    %c67 = arith.constant 67 : index
    %519 = memref.load %arg0[%c67] : memref<128xi32, #tpu.memory_space<smem>>
    %520 = arith.index_cast %519 : i32 to index
    %c0_469 = arith.constant 0 : index
    %521 = vector.load %arg2[%520, %c0_469] : memref<64x128xf32, #tpu.memory_space<vmem>>, vector<1x128xf32>
    %c3_470 = arith.constant 3 : index
    %c0_471 = arith.constant 0 : index
    %522 = vector.load %arg9[%c3_470, %c0_471] : memref<16x128xf32, #tpu.memory_space<vmem>>, vector<1x128xf32>
    tpu.vector_store %arg9[%c3_470, %c0_471], %521 {strides = array<i32>} : memref<16x128xf32, #tpu.memory_space<vmem>>, vector<1x128xf32>,
    %523 = arith.index_cast %519 : i32 to index
    %c0_472 = arith.constant 0 : index
    %524 = vector.load %arg3[%523, %c0_472] : memref<64x128xf32, #tpu.memory_space<vmem>>, vector<1x128xf32>
    %c3_473 = arith.constant 3 : index
    %c0_474 = arith.constant 0 : index
    %525 = vector.load %arg10[%c3_473, %c0_474] : memref<16x128xf32, #tpu.memory_space<vmem>>, vector<1x128xf32>
    tpu.vector_store %arg10[%c3_473, %c0_474], %524 {strides = array<i32>} : memref<16x128xf32, #tpu.memory_space<vmem>>, vector<1x128xf32>,
    %c68 = arith.constant 68 : index
    %526 = memref.load %arg0[%c68] : memref<128xi32, #tpu.memory_space<smem>>
    %527 = arith.index_cast %526 : i32 to index
    %c0_475 = arith.constant 0 : index
    %528 = vector.load %arg2[%527, %c0_475] : memref<64x128xf32, #tpu.memory_space<vmem>>, vector<1x128xf32>
    %c4_476 = arith.constant 4 : index
    %c0_477 = arith.constant 0 : index
    %529 = vector.load %arg9[%c4_476, %c0_477] : memref<16x128xf32, #tpu.memory_space<vmem>>, vector<1x128xf32>
    tpu.vector_store %arg9[%c4_476, %c0_477], %528 {strides = array<i32>} : memref<16x128xf32, #tpu.memory_space<vmem>>, vector<1x128xf32>,
    %530 = arith.index_cast %526 : i32 to index
    %c0_478 = arith.constant 0 : index
    %531 = vector.load %arg3[%530, %c0_478] : memref<64x128xf32, #tpu.memory_space<vmem>>, vector<1x128xf32>
    %c4_479 = arith.constant 4 : index
    %c0_480 = arith.constant 0 : index
    %532 = vector.load %arg10[%c4_479, %c0_480] : memref<16x128xf32, #tpu.memory_space<vmem>>, vector<1x128xf32>
    tpu.vector_store %arg10[%c4_479, %c0_480], %531 {strides = array<i32>} : memref<16x128xf32, #tpu.memory_space<vmem>>, vector<1x128xf32>,
    %c69 = arith.constant 69 : index
    %533 = memref.load %arg0[%c69] : memref<128xi32, #tpu.memory_space<smem>>
    %534 = arith.index_cast %533 : i32 to index
    %c0_481 = arith.constant 0 : index
    %535 = vector.load %arg2[%534, %c0_481] : memref<64x128xf32, #tpu.memory_space<vmem>>, vector<1x128xf32>
    %c5_482 = arith.constant 5 : index
    %c0_483 = arith.constant 0 : index
    %536 = vector.load %arg9[%c5_482, %c0_483] : memref<16x128xf32, #tpu.memory_space<vmem>>, vector<1x128xf32>
    tpu.vector_store %arg9[%c5_482, %c0_483], %535 {strides = array<i32>} : memref<16x128xf32, #tpu.memory_space<vmem>>, vector<1x128xf32>,
    %537 = arith.index_cast %533 : i32 to index
    %c0_484 = arith.constant 0 : index
    %538 = vector.load %arg3[%537, %c0_484] : memref<64x128xf32, #tpu.memory_space<vmem>>, vector<1x128xf32>
    %c5_485 = arith.constant 5 : index
    %c0_486 = arith.constant 0 : index
    %539 = vector.load %arg10[%c5_485, %c0_486] : memref<16x128xf32, #tpu.memory_space<vmem>>, vector<1x128xf32>
    tpu.vector_store %arg10[%c5_485, %c0_486], %538 {strides = array<i32>} : memref<16x128xf32, #tpu.memory_space<vmem>>, vector<1x128xf32>,
    %c70 = arith.constant 70 : index
    %540 = memref.load %arg0[%c70] : memref<128xi32, #tpu.memory_space<smem>>
    %541 = arith.index_cast %540 : i32 to index
    %c0_487 = arith.constant 0 : index
    %542 = vector.load %arg2[%541, %c0_487] : memref<64x128xf32, #tpu.memory_space<vmem>>, vector<1x128xf32>
    %c6_488 = arith.constant 6 : index
    %c0_489 = arith.constant 0 : index
    %543 = vector.load %arg9[%c6_488, %c0_489] : memref<16x128xf32, #tpu.memory_space<vmem>>, vector<1x128xf32>
    tpu.vector_store %arg9[%c6_488, %c0_489], %542 {strides = array<i32>} : memref<16x128xf32, #tpu.memory_space<vmem>>, vector<1x128xf32>,
    %544 = arith.index_cast %540 : i32 to index
    %c0_490 = arith.constant 0 : index
    %545 = vector.load %arg3[%544, %c0_490] : memref<64x128xf32, #tpu.memory_space<vmem>>, vector<1x128xf32>
    %c6_491 = arith.constant 6 : index
    %c0_492 = arith.constant 0 : index
    %546 = vector.load %arg10[%c6_491, %c0_492] : memref<16x128xf32, #tpu.memory_space<vmem>>, vector<1x128xf32>
    tpu.vector_store %arg10[%c6_491, %c0_492], %545 {strides = array<i32>} : memref<16x128xf32, #tpu.memory_space<vmem>>, vector<1x128xf32>,
    %c71 = arith.constant 71 : index
    %547 = memref.load %arg0[%c71] : memref<128xi32, #tpu.memory_space<smem>>
    %548 = arith.index_cast %547 : i32 to index
    %c0_493 = arith.constant 0 : index
    %549 = vector.load %arg2[%548, %c0_493] : memref<64x128xf32, #tpu.memory_space<vmem>>, vector<1x128xf32>
    %c7_494 = arith.constant 7 : index
    %c0_495 = arith.constant 0 : index
    %550 = vector.load %arg9[%c7_494, %c0_495] : memref<16x128xf32, #tpu.memory_space<vmem>>, vector<1x128xf32>
    tpu.vector_store %arg9[%c7_494, %c0_495], %549 {strides = array<i32>} : memref<16x128xf32, #tpu.memory_space<vmem>>, vector<1x128xf32>,
    %551 = arith.index_cast %547 : i32 to index
    %c0_496 = arith.constant 0 : index
    %552 = vector.load %arg3[%551, %c0_496] : memref<64x128xf32, #tpu.memory_space<vmem>>, vector<1x128xf32>
    %c7_497 = arith.constant 7 : index
    %c0_498 = arith.constant 0 : index
    %553 = vector.load %arg10[%c7_497, %c0_498] : memref<16x128xf32, #tpu.memory_space<vmem>>, vector<1x128xf32>
    tpu.vector_store %arg10[%c7_497, %c0_498], %552 {strides = array<i32>} : memref<16x128xf32, #tpu.memory_space<vmem>>, vector<1x128xf32>,
    %c72 = arith.constant 72 : index
    %554 = memref.load %arg0[%c72] : memref<128xi32, #tpu.memory_space<smem>>
    %555 = arith.index_cast %554 : i32 to index
    %c0_499 = arith.constant 0 : index
    %556 = vector.load %arg2[%555, %c0_499] : memref<64x128xf32, #tpu.memory_space<vmem>>, vector<1x128xf32>
    %c8_500 = arith.constant 8 : index
    %c0_501 = arith.constant 0 : index
    %557 = vector.load %arg9[%c8_500, %c0_501] : memref<16x128xf32, #tpu.memory_space<vmem>>, vector<1x128xf32>
    tpu.vector_store %arg9[%c8_500, %c0_501], %556 {strides = array<i32>} : memref<16x128xf32, #tpu.memory_space<vmem>>, vector<1x128xf32>,
    %558 = arith.index_cast %554 : i32 to index
    %c0_502 = arith.constant 0 : index
    %559 = vector.load %arg3[%558, %c0_502] : memref<64x128xf32, #tpu.memory_space<vmem>>, vector<1x128xf32>
    %c8_503 = arith.constant 8 : index
    %c0_504 = arith.constant 0 : index
    %560 = vector.load %arg10[%c8_503, %c0_504] : memref<16x128xf32, #tpu.memory_space<vmem>>, vector<1x128xf32>
    tpu.vector_store %arg10[%c8_503, %c0_504], %559 {strides = array<i32>} : memref<16x128xf32, #tpu.memory_space<vmem>>, vector<1x128xf32>,
    %c73 = arith.constant 73 : index
    %561 = memref.load %arg0[%c73] : memref<128xi32, #tpu.memory_space<smem>>
    %562 = arith.index_cast %561 : i32 to index
    %c0_505 = arith.constant 0 : index
    %563 = vector.load %arg2[%562, %c0_505] : memref<64x128xf32, #tpu.memory_space<vmem>>, vector<1x128xf32>
    %c9_506 = arith.constant 9 : index
    %c0_507 = arith.constant 0 : index
    %564 = vector.load %arg9[%c9_506, %c0_507] : memref<16x128xf32, #tpu.memory_space<vmem>>, vector<1x128xf32>
    tpu.vector_store %arg9[%c9_506, %c0_507], %563 {strides = array<i32>} : memref<16x128xf32, #tpu.memory_space<vmem>>, vector<1x128xf32>,
    %565 = arith.index_cast %561 : i32 to index
    %c0_508 = arith.constant 0 : index
    %566 = vector.load %arg3[%565, %c0_508] : memref<64x128xf32, #tpu.memory_space<vmem>>, vector<1x128xf32>
    %c9_509 = arith.constant 9 : index
    %c0_510 = arith.constant 0 : index
    %567 = vector.load %arg10[%c9_509, %c0_510] : memref<16x128xf32, #tpu.memory_space<vmem>>, vector<1x128xf32>
    tpu.vector_store %arg10[%c9_509, %c0_510], %566 {strides = array<i32>} : memref<16x128xf32, #tpu.memory_space<vmem>>, vector<1x128xf32>,
    %c74 = arith.constant 74 : index
    %568 = memref.load %arg0[%c74] : memref<128xi32, #tpu.memory_space<smem>>
    %569 = arith.index_cast %568 : i32 to index
    %c0_511 = arith.constant 0 : index
    %570 = vector.load %arg2[%569, %c0_511] : memref<64x128xf32, #tpu.memory_space<vmem>>, vector<1x128xf32>
    %c10_512 = arith.constant 10 : index
    %c0_513 = arith.constant 0 : index
    %571 = vector.load %arg9[%c10_512, %c0_513] : memref<16x128xf32, #tpu.memory_space<vmem>>, vector<1x128xf32>
    tpu.vector_store %arg9[%c10_512, %c0_513], %570 {strides = array<i32>} : memref<16x128xf32, #tpu.memory_space<vmem>>, vector<1x128xf32>,
    %572 = arith.index_cast %568 : i32 to index
    %c0_514 = arith.constant 0 : index
    %573 = vector.load %arg3[%572, %c0_514] : memref<64x128xf32, #tpu.memory_space<vmem>>, vector<1x128xf32>
    %c10_515 = arith.constant 10 : index
    %c0_516 = arith.constant 0 : index
    %574 = vector.load %arg10[%c10_515, %c0_516] : memref<16x128xf32, #tpu.memory_space<vmem>>, vector<1x128xf32>
    tpu.vector_store %arg10[%c10_515, %c0_516], %573 {strides = array<i32>} : memref<16x128xf32, #tpu.memory_space<vmem>>, vector<1x128xf32>,
    %c75 = arith.constant 75 : index
    %575 = memref.load %arg0[%c75] : memref<128xi32, #tpu.memory_space<smem>>
    %576 = arith.index_cast %575 : i32 to index
    %c0_517 = arith.constant 0 : index
    %577 = vector.load %arg2[%576, %c0_517] : memref<64x128xf32, #tpu.memory_space<vmem>>, vector<1x128xf32>
    %c11_518 = arith.constant 11 : index
    %c0_519 = arith.constant 0 : index
    %578 = vector.load %arg9[%c11_518, %c0_519] : memref<16x128xf32, #tpu.memory_space<vmem>>, vector<1x128xf32>
    tpu.vector_store %arg9[%c11_518, %c0_519], %577 {strides = array<i32>} : memref<16x128xf32, #tpu.memory_space<vmem>>, vector<1x128xf32>,
    %579 = arith.index_cast %575 : i32 to index
    %c0_520 = arith.constant 0 : index
    %580 = vector.load %arg3[%579, %c0_520] : memref<64x128xf32, #tpu.memory_space<vmem>>, vector<1x128xf32>
    %c11_521 = arith.constant 11 : index
    %c0_522 = arith.constant 0 : index
    %581 = vector.load %arg10[%c11_521, %c0_522] : memref<16x128xf32, #tpu.memory_space<vmem>>, vector<1x128xf32>
    tpu.vector_store %arg10[%c11_521, %c0_522], %580 {strides = array<i32>} : memref<16x128xf32, #tpu.memory_space<vmem>>, vector<1x128xf32>,
    %c76 = arith.constant 76 : index
    %582 = memref.load %arg0[%c76] : memref<128xi32, #tpu.memory_space<smem>>
    %583 = arith.index_cast %582 : i32 to index
    %c0_523 = arith.constant 0 : index
    %584 = vector.load %arg2[%583, %c0_523] : memref<64x128xf32, #tpu.memory_space<vmem>>, vector<1x128xf32>
    %c12_524 = arith.constant 12 : index
    %c0_525 = arith.constant 0 : index
    %585 = vector.load %arg9[%c12_524, %c0_525] : memref<16x128xf32, #tpu.memory_space<vmem>>, vector<1x128xf32>
    tpu.vector_store %arg9[%c12_524, %c0_525], %584 {strides = array<i32>} : memref<16x128xf32, #tpu.memory_space<vmem>>, vector<1x128xf32>,
    %586 = arith.index_cast %582 : i32 to index
    %c0_526 = arith.constant 0 : index
    %587 = vector.load %arg3[%586, %c0_526] : memref<64x128xf32, #tpu.memory_space<vmem>>, vector<1x128xf32>
    %c12_527 = arith.constant 12 : index
    %c0_528 = arith.constant 0 : index
    %588 = vector.load %arg10[%c12_527, %c0_528] : memref<16x128xf32, #tpu.memory_space<vmem>>, vector<1x128xf32>
    tpu.vector_store %arg10[%c12_527, %c0_528], %587 {strides = array<i32>} : memref<16x128xf32, #tpu.memory_space<vmem>>, vector<1x128xf32>,
    %c77 = arith.constant 77 : index
    %589 = memref.load %arg0[%c77] : memref<128xi32, #tpu.memory_space<smem>>
    %590 = arith.index_cast %589 : i32 to index
    %c0_529 = arith.constant 0 : index
    %591 = vector.load %arg2[%590, %c0_529] : memref<64x128xf32, #tpu.memory_space<vmem>>, vector<1x128xf32>
    %c13_530 = arith.constant 13 : index
    %c0_531 = arith.constant 0 : index
    %592 = vector.load %arg9[%c13_530, %c0_531] : memref<16x128xf32, #tpu.memory_space<vmem>>, vector<1x128xf32>
    tpu.vector_store %arg9[%c13_530, %c0_531], %591 {strides = array<i32>} : memref<16x128xf32, #tpu.memory_space<vmem>>, vector<1x128xf32>,
    %593 = arith.index_cast %589 : i32 to index
    %c0_532 = arith.constant 0 : index
    %594 = vector.load %arg3[%593, %c0_532] : memref<64x128xf32, #tpu.memory_space<vmem>>, vector<1x128xf32>
    %c13_533 = arith.constant 13 : index
    %c0_534 = arith.constant 0 : index
    %595 = vector.load %arg10[%c13_533, %c0_534] : memref<16x128xf32, #tpu.memory_space<vmem>>, vector<1x128xf32>
    tpu.vector_store %arg10[%c13_533, %c0_534], %594 {strides = array<i32>} : memref<16x128xf32, #tpu.memory_space<vmem>>, vector<1x128xf32>,
    %c78 = arith.constant 78 : index
    %596 = memref.load %arg0[%c78] : memref<128xi32, #tpu.memory_space<smem>>
    %597 = arith.index_cast %596 : i32 to index
    %c0_535 = arith.constant 0 : index
    %598 = vector.load %arg2[%597, %c0_535] : memref<64x128xf32, #tpu.memory_space<vmem>>, vector<1x128xf32>
    %c14_536 = arith.constant 14 : index
    %c0_537 = arith.constant 0 : index
    %599 = vector.load %arg9[%c14_536, %c0_537] : memref<16x128xf32, #tpu.memory_space<vmem>>, vector<1x128xf32>
    tpu.vector_store %arg9[%c14_536, %c0_537], %598 {strides = array<i32>} : memref<16x128xf32, #tpu.memory_space<vmem>>, vector<1x128xf32>,
    %600 = arith.index_cast %596 : i32 to index
    %c0_538 = arith.constant 0 : index
    %601 = vector.load %arg3[%600, %c0_538] : memref<64x128xf32, #tpu.memory_space<vmem>>, vector<1x128xf32>
    %c14_539 = arith.constant 14 : index
    %c0_540 = arith.constant 0 : index
    %602 = vector.load %arg10[%c14_539, %c0_540] : memref<16x128xf32, #tpu.memory_space<vmem>>, vector<1x128xf32>
    tpu.vector_store %arg10[%c14_539, %c0_540], %601 {strides = array<i32>} : memref<16x128xf32, #tpu.memory_space<vmem>>, vector<1x128xf32>,
    %c79 = arith.constant 79 : index
    %603 = memref.load %arg0[%c79] : memref<128xi32, #tpu.memory_space<smem>>
    %604 = arith.index_cast %603 : i32 to index
    %c0_541 = arith.constant 0 : index
    %605 = vector.load %arg2[%604, %c0_541] : memref<64x128xf32, #tpu.memory_space<vmem>>, vector<1x128xf32>
    %c15_542 = arith.constant 15 : index
    %c0_543 = arith.constant 0 : index
    %606 = vector.load %arg9[%c15_542, %c0_543] : memref<16x128xf32, #tpu.memory_space<vmem>>, vector<1x128xf32>
    tpu.vector_store %arg9[%c15_542, %c0_543], %605 {strides = array<i32>} : memref<16x128xf32, #tpu.memory_space<vmem>>, vector<1x128xf32>,
    %607 = arith.index_cast %603 : i32 to index
    %c0_544 = arith.constant 0 : index
    %608 = vector.load %arg3[%607, %c0_544] : memref<64x128xf32, #tpu.memory_space<vmem>>, vector<1x128xf32>
    %c15_545 = arith.constant 15 : index
    %c0_546 = arith.constant 0 : index
    %609 = vector.load %arg10[%c15_545, %c0_546] : memref<16x128xf32, #tpu.memory_space<vmem>>, vector<1x128xf32>
    tpu.vector_store %arg10[%c15_545, %c0_546], %608 {strides = array<i32>} : memref<16x128xf32, #tpu.memory_space<vmem>>, vector<1x128xf32>,
    %c0_547 = arith.constant 0 : index
    %c0_548 = arith.constant 0 : index
    %610 = vector.load %arg9[%c0_547, %c0_548] : memref<16x128xf32, #tpu.memory_space<vmem>>, vector<16x128xf32>
    %cst_549 = arith.constant dense<0.000000e+00> : vector<1x16xf32>
    %611 = tpu.matmul %496, %610, %cst_549 {dimension_numbers = #tpu.dot_dimension_numbers<[1], [1], [0], [0], [0, 0, 1, 0], [], []>} : vector<1x128xf32>, vector<16x128xf32>, vector<1x16xf32> -> vector<1x16xf32>
    %cst_550 = arith.constant 14.2857141 : f32
    %612 = vector.broadcast %cst_550 : f32 to vector<1x16xf32>
    %613 = arith.mulf %611, %612 : vector<1x16xf32>
    %c0_551 = arith.constant 0 : index
    %c0_552 = arith.constant 0 : index
    %614 = vector.load %arg10[%c0_551, %c0_552] : memref<16x128xf32, #tpu.memory_space<vmem>>, vector<16x128xf32>
    %cst_553 = arith.constant dense<0.000000e+00> : vector<1x16xf32>
    %615 = tpu.matmul %497, %614, %cst_553 {dimension_numbers = #tpu.dot_dimension_numbers<[1], [1], [0], [0], [0, 0, 1, 0], [], []>} : vector<1x128xf32>, vector<16x128xf32>, vector<1x16xf32> -> vector<1x16xf32>
    %cst_554 = arith.constant 14.2857141 : f32
    %616 = vector.broadcast %cst_554 : f32 to vector<1x16xf32>
    %617 = arith.mulf %615, %616 : vector<1x16xf32>
    %c4_555 = arith.constant 4 : index
    %c0_556 = arith.constant 0 : index
    %618 = vector.load %arg11[%c4_555, %c0_556] : memref<8x16xf32, #tpu.memory_space<vmem>>, vector<1x16xf32>
    tpu.vector_store %arg11[%c4_555, %c0_556], %613 {strides = array<i32>} : memref<8x16xf32, #tpu.memory_space<vmem>>, vector<1x16xf32>,
    %c4_557 = arith.constant 4 : index
    %c0_558 = arith.constant 0 : index
    %619 = vector.load %arg12[%c4_557, %c0_558] : memref<8x16xf32, #tpu.memory_space<vmem>>, vector<1x16xf32>
    tpu.vector_store %arg12[%c4_557, %c0_558], %617 {strides = array<i32>} : memref<8x16xf32, #tpu.memory_space<vmem>>, vector<1x16xf32>,
    %c5_559 = arith.constant 5 : index
    %c0_560 = arith.constant 0 : index
    %620 = vector.load %arg4[%c5_559, %c0_560] : memref<8x128xf32, #tpu.memory_space<vmem>>, vector<1x128xf32>
    %c5_561 = arith.constant 5 : index
    %c0_562 = arith.constant 0 : index
    %621 = vector.load %arg5[%c5_561, %c0_562] : memref<8x128xf32, #tpu.memory_space<vmem>>, vector<1x128xf32>
    %c80 = arith.constant 80 : index
    %622 = memref.load %arg0[%c80] : memref<128xi32, #tpu.memory_space<smem>>
    %623 = arith.index_cast %622 : i32 to index
    %c0_563 = arith.constant 0 : index
    %624 = vector.load %arg2[%623, %c0_563] : memref<64x128xf32, #tpu.memory_space<vmem>>, vector<1x128xf32>
    %c0_564 = arith.constant 0 : index
    %c0_565 = arith.constant 0 : index
    %625 = vector.load %arg9[%c0_564, %c0_565] : memref<16x128xf32, #tpu.memory_space<vmem>>, vector<1x128xf32>
    tpu.vector_store %arg9[%c0_564, %c0_565], %624 {strides = array<i32>} : memref<16x128xf32, #tpu.memory_space<vmem>>, vector<1x128xf32>,
    %626 = arith.index_cast %622 : i32 to index
    %c0_566 = arith.constant 0 : index
    %627 = vector.load %arg3[%626, %c0_566] : memref<64x128xf32, #tpu.memory_space<vmem>>, vector<1x128xf32>
    %c0_567 = arith.constant 0 : index
    %c0_568 = arith.constant 0 : index
    %628 = vector.load %arg10[%c0_567, %c0_568] : memref<16x128xf32, #tpu.memory_space<vmem>>, vector<1x128xf32>
    tpu.vector_store %arg10[%c0_567, %c0_568], %627 {strides = array<i32>} : memref<16x128xf32, #tpu.memory_space<vmem>>, vector<1x128xf32>,
    %c81 = arith.constant 81 : index
    %629 = memref.load %arg0[%c81] : memref<128xi32, #tpu.memory_space<smem>>
    %630 = arith.index_cast %629 : i32 to index
    %c0_569 = arith.constant 0 : index
    %631 = vector.load %arg2[%630, %c0_569] : memref<64x128xf32, #tpu.memory_space<vmem>>, vector<1x128xf32>
    %c1_570 = arith.constant 1 : index
    %c0_571 = arith.constant 0 : index
    %632 = vector.load %arg9[%c1_570, %c0_571] : memref<16x128xf32, #tpu.memory_space<vmem>>, vector<1x128xf32>
    tpu.vector_store %arg9[%c1_570, %c0_571], %631 {strides = array<i32>} : memref<16x128xf32, #tpu.memory_space<vmem>>, vector<1x128xf32>,
    %633 = arith.index_cast %629 : i32 to index
    %c0_572 = arith.constant 0 : index
    %634 = vector.load %arg3[%633, %c0_572] : memref<64x128xf32, #tpu.memory_space<vmem>>, vector<1x128xf32>
    %c1_573 = arith.constant 1 : index
    %c0_574 = arith.constant 0 : index
    %635 = vector.load %arg10[%c1_573, %c0_574] : memref<16x128xf32, #tpu.memory_space<vmem>>, vector<1x128xf32>
    tpu.vector_store %arg10[%c1_573, %c0_574], %634 {strides = array<i32>} : memref<16x128xf32, #tpu.memory_space<vmem>>, vector<1x128xf32>,
    %c82 = arith.constant 82 : index
    %636 = memref.load %arg0[%c82] : memref<128xi32, #tpu.memory_space<smem>>
    %637 = arith.index_cast %636 : i32 to index
    %c0_575 = arith.constant 0 : index
    %638 = vector.load %arg2[%637, %c0_575] : memref<64x128xf32, #tpu.memory_space<vmem>>, vector<1x128xf32>
    %c2_576 = arith.constant 2 : index
    %c0_577 = arith.constant 0 : index
    %639 = vector.load %arg9[%c2_576, %c0_577] : memref<16x128xf32, #tpu.memory_space<vmem>>, vector<1x128xf32>
    tpu.vector_store %arg9[%c2_576, %c0_577], %638 {strides = array<i32>} : memref<16x128xf32, #tpu.memory_space<vmem>>, vector<1x128xf32>,
    %640 = arith.index_cast %636 : i32 to index
    %c0_578 = arith.constant 0 : index
    %641 = vector.load %arg3[%640, %c0_578] : memref<64x128xf32, #tpu.memory_space<vmem>>, vector<1x128xf32>
    %c2_579 = arith.constant 2 : index
    %c0_580 = arith.constant 0 : index
    %642 = vector.load %arg10[%c2_579, %c0_580] : memref<16x128xf32, #tpu.memory_space<vmem>>, vector<1x128xf32>
    tpu.vector_store %arg10[%c2_579, %c0_580], %641 {strides = array<i32>} : memref<16x128xf32, #tpu.memory_space<vmem>>, vector<1x128xf32>,
    %c83 = arith.constant 83 : index
    %643 = memref.load %arg0[%c83] : memref<128xi32, #tpu.memory_space<smem>>
    %644 = arith.index_cast %643 : i32 to index
    %c0_581 = arith.constant 0 : index
    %645 = vector.load %arg2[%644, %c0_581] : memref<64x128xf32, #tpu.memory_space<vmem>>, vector<1x128xf32>
    %c3_582 = arith.constant 3 : index
    %c0_583 = arith.constant 0 : index
    %646 = vector.load %arg9[%c3_582, %c0_583] : memref<16x128xf32, #tpu.memory_space<vmem>>, vector<1x128xf32>
    tpu.vector_store %arg9[%c3_582, %c0_583], %645 {strides = array<i32>} : memref<16x128xf32, #tpu.memory_space<vmem>>, vector<1x128xf32>,
    %647 = arith.index_cast %643 : i32 to index
    %c0_584 = arith.constant 0 : index
    %648 = vector.load %arg3[%647, %c0_584] : memref<64x128xf32, #tpu.memory_space<vmem>>, vector<1x128xf32>
    %c3_585 = arith.constant 3 : index
    %c0_586 = arith.constant 0 : index
    %649 = vector.load %arg10[%c3_585, %c0_586] : memref<16x128xf32, #tpu.memory_space<vmem>>, vector<1x128xf32>
    tpu.vector_store %arg10[%c3_585, %c0_586], %648 {strides = array<i32>} : memref<16x128xf32, #tpu.memory_space<vmem>>, vector<1x128xf32>,
    %c84 = arith.constant 84 : index
    %650 = memref.load %arg0[%c84] : memref<128xi32, #tpu.memory_space<smem>>
    %651 = arith.index_cast %650 : i32 to index
    %c0_587 = arith.constant 0 : index
    %652 = vector.load %arg2[%651, %c0_587] : memref<64x128xf32, #tpu.memory_space<vmem>>, vector<1x128xf32>
    %c4_588 = arith.constant 4 : index
    %c0_589 = arith.constant 0 : index
    %653 = vector.load %arg9[%c4_588, %c0_589] : memref<16x128xf32, #tpu.memory_space<vmem>>, vector<1x128xf32>
    tpu.vector_store %arg9[%c4_588, %c0_589], %652 {strides = array<i32>} : memref<16x128xf32, #tpu.memory_space<vmem>>, vector<1x128xf32>,
    %654 = arith.index_cast %650 : i32 to index
    %c0_590 = arith.constant 0 : index
    %655 = vector.load %arg3[%654, %c0_590] : memref<64x128xf32, #tpu.memory_space<vmem>>, vector<1x128xf32>
    %c4_591 = arith.constant 4 : index
    %c0_592 = arith.constant 0 : index
    %656 = vector.load %arg10[%c4_591, %c0_592] : memref<16x128xf32, #tpu.memory_space<vmem>>, vector<1x128xf32>
    tpu.vector_store %arg10[%c4_591, %c0_592], %655 {strides = array<i32>} : memref<16x128xf32, #tpu.memory_space<vmem>>, vector<1x128xf32>,
    %c85 = arith.constant 85 : index
    %657 = memref.load %arg0[%c85] : memref<128xi32, #tpu.memory_space<smem>>
    %658 = arith.index_cast %657 : i32 to index
    %c0_593 = arith.constant 0 : index
    %659 = vector.load %arg2[%658, %c0_593] : memref<64x128xf32, #tpu.memory_space<vmem>>, vector<1x128xf32>
    %c5_594 = arith.constant 5 : index
    %c0_595 = arith.constant 0 : index
    %660 = vector.load %arg9[%c5_594, %c0_595] : memref<16x128xf32, #tpu.memory_space<vmem>>, vector<1x128xf32>
    tpu.vector_store %arg9[%c5_594, %c0_595], %659 {strides = array<i32>} : memref<16x128xf32, #tpu.memory_space<vmem>>, vector<1x128xf32>,
    %661 = arith.index_cast %657 : i32 to index
    %c0_596 = arith.constant 0 : index
    %662 = vector.load %arg3[%661, %c0_596] : memref<64x128xf32, #tpu.memory_space<vmem>>, vector<1x128xf32>
    %c5_597 = arith.constant 5 : index
    %c0_598 = arith.constant 0 : index
    %663 = vector.load %arg10[%c5_597, %c0_598] : memref<16x128xf32, #tpu.memory_space<vmem>>, vector<1x128xf32>
    tpu.vector_store %arg10[%c5_597, %c0_598], %662 {strides = array<i32>} : memref<16x128xf32, #tpu.memory_space<vmem>>, vector<1x128xf32>,
    %c86 = arith.constant 86 : index
    %664 = memref.load %arg0[%c86] : memref<128xi32, #tpu.memory_space<smem>>
    %665 = arith.index_cast %664 : i32 to index
    %c0_599 = arith.constant 0 : index
    %666 = vector.load %arg2[%665, %c0_599] : memref<64x128xf32, #tpu.memory_space<vmem>>, vector<1x128xf32>
    %c6_600 = arith.constant 6 : index
    %c0_601 = arith.constant 0 : index
    %667 = vector.load %arg9[%c6_600, %c0_601] : memref<16x128xf32, #tpu.memory_space<vmem>>, vector<1x128xf32>
    tpu.vector_store %arg9[%c6_600, %c0_601], %666 {strides = array<i32>} : memref<16x128xf32, #tpu.memory_space<vmem>>, vector<1x128xf32>,
    %668 = arith.index_cast %664 : i32 to index
    %c0_602 = arith.constant 0 : index
    %669 = vector.load %arg3[%668, %c0_602] : memref<64x128xf32, #tpu.memory_space<vmem>>, vector<1x128xf32>
    %c6_603 = arith.constant 6 : index
    %c0_604 = arith.constant 0 : index
    %670 = vector.load %arg10[%c6_603, %c0_604] : memref<16x128xf32, #tpu.memory_space<vmem>>, vector<1x128xf32>
    tpu.vector_store %arg10[%c6_603, %c0_604], %669 {strides = array<i32>} : memref<16x128xf32, #tpu.memory_space<vmem>>, vector<1x128xf32>,
    %c87 = arith.constant 87 : index
    %671 = memref.load %arg0[%c87] : memref<128xi32, #tpu.memory_space<smem>>
    %672 = arith.index_cast %671 : i32 to index
    %c0_605 = arith.constant 0 : index
    %673 = vector.load %arg2[%672, %c0_605] : memref<64x128xf32, #tpu.memory_space<vmem>>, vector<1x128xf32>
    %c7_606 = arith.constant 7 : index
    %c0_607 = arith.constant 0 : index
    %674 = vector.load %arg9[%c7_606, %c0_607] : memref<16x128xf32, #tpu.memory_space<vmem>>, vector<1x128xf32>
    tpu.vector_store %arg9[%c7_606, %c0_607], %673 {strides = array<i32>} : memref<16x128xf32, #tpu.memory_space<vmem>>, vector<1x128xf32>,
    %675 = arith.index_cast %671 : i32 to index
    %c0_608 = arith.constant 0 : index
    %676 = vector.load %arg3[%675, %c0_608] : memref<64x128xf32, #tpu.memory_space<vmem>>, vector<1x128xf32>
    %c7_609 = arith.constant 7 : index
    %c0_610 = arith.constant 0 : index
    %677 = vector.load %arg10[%c7_609, %c0_610] : memref<16x128xf32, #tpu.memory_space<vmem>>, vector<1x128xf32>
    tpu.vector_store %arg10[%c7_609, %c0_610], %676 {strides = array<i32>} : memref<16x128xf32, #tpu.memory_space<vmem>>, vector<1x128xf32>,
    %c88 = arith.constant 88 : index
    %678 = memref.load %arg0[%c88] : memref<128xi32, #tpu.memory_space<smem>>
    %679 = arith.index_cast %678 : i32 to index
    %c0_611 = arith.constant 0 : index
    %680 = vector.load %arg2[%679, %c0_611] : memref<64x128xf32, #tpu.memory_space<vmem>>, vector<1x128xf32>
    %c8_612 = arith.constant 8 : index
    %c0_613 = arith.constant 0 : index
    %681 = vector.load %arg9[%c8_612, %c0_613] : memref<16x128xf32, #tpu.memory_space<vmem>>, vector<1x128xf32>
    tpu.vector_store %arg9[%c8_612, %c0_613], %680 {strides = array<i32>} : memref<16x128xf32, #tpu.memory_space<vmem>>, vector<1x128xf32>,
    %682 = arith.index_cast %678 : i32 to index
    %c0_614 = arith.constant 0 : index
    %683 = vector.load %arg3[%682, %c0_614] : memref<64x128xf32, #tpu.memory_space<vmem>>, vector<1x128xf32>
    %c8_615 = arith.constant 8 : index
    %c0_616 = arith.constant 0 : index
    %684 = vector.load %arg10[%c8_615, %c0_616] : memref<16x128xf32, #tpu.memory_space<vmem>>, vector<1x128xf32>
    tpu.vector_store %arg10[%c8_615, %c0_616], %683 {strides = array<i32>} : memref<16x128xf32, #tpu.memory_space<vmem>>, vector<1x128xf32>,
    %c89 = arith.constant 89 : index
    %685 = memref.load %arg0[%c89] : memref<128xi32, #tpu.memory_space<smem>>
    %686 = arith.index_cast %685 : i32 to index
    %c0_617 = arith.constant 0 : index
    %687 = vector.load %arg2[%686, %c0_617] : memref<64x128xf32, #tpu.memory_space<vmem>>, vector<1x128xf32>
    %c9_618 = arith.constant 9 : index
    %c0_619 = arith.constant 0 : index
    %688 = vector.load %arg9[%c9_618, %c0_619] : memref<16x128xf32, #tpu.memory_space<vmem>>, vector<1x128xf32>
    tpu.vector_store %arg9[%c9_618, %c0_619], %687 {strides = array<i32>} : memref<16x128xf32, #tpu.memory_space<vmem>>, vector<1x128xf32>,
    %689 = arith.index_cast %685 : i32 to index
    %c0_620 = arith.constant 0 : index
    %690 = vector.load %arg3[%689, %c0_620] : memref<64x128xf32, #tpu.memory_space<vmem>>, vector<1x128xf32>
    %c9_621 = arith.constant 9 : index
    %c0_622 = arith.constant 0 : index
    %691 = vector.load %arg10[%c9_621, %c0_622] : memref<16x128xf32, #tpu.memory_space<vmem>>, vector<1x128xf32>
    tpu.vector_store %arg10[%c9_621, %c0_622], %690 {strides = array<i32>} : memref<16x128xf32, #tpu.memory_space<vmem>>, vector<1x128xf32>,
    %c90 = arith.constant 90 : index
    %692 = memref.load %arg0[%c90] : memref<128xi32, #tpu.memory_space<smem>>
    %693 = arith.index_cast %692 : i32 to index
    %c0_623 = arith.constant 0 : index
    %694 = vector.load %arg2[%693, %c0_623] : memref<64x128xf32, #tpu.memory_space<vmem>>, vector<1x128xf32>
    %c10_624 = arith.constant 10 : index
    %c0_625 = arith.constant 0 : index
    %695 = vector.load %arg9[%c10_624, %c0_625] : memref<16x128xf32, #tpu.memory_space<vmem>>, vector<1x128xf32>
    tpu.vector_store %arg9[%c10_624, %c0_625], %694 {strides = array<i32>} : memref<16x128xf32, #tpu.memory_space<vmem>>, vector<1x128xf32>,
    %696 = arith.index_cast %692 : i32 to index
    %c0_626 = arith.constant 0 : index
    %697 = vector.load %arg3[%696, %c0_626] : memref<64x128xf32, #tpu.memory_space<vmem>>, vector<1x128xf32>
    %c10_627 = arith.constant 10 : index
    %c0_628 = arith.constant 0 : index
    %698 = vector.load %arg10[%c10_627, %c0_628] : memref<16x128xf32, #tpu.memory_space<vmem>>, vector<1x128xf32>
    tpu.vector_store %arg10[%c10_627, %c0_628], %697 {strides = array<i32>} : memref<16x128xf32, #tpu.memory_space<vmem>>, vector<1x128xf32>,
    %c91 = arith.constant 91 : index
    %699 = memref.load %arg0[%c91] : memref<128xi32, #tpu.memory_space<smem>>
    %700 = arith.index_cast %699 : i32 to index
    %c0_629 = arith.constant 0 : index
    %701 = vector.load %arg2[%700, %c0_629] : memref<64x128xf32, #tpu.memory_space<vmem>>, vector<1x128xf32>
    %c11_630 = arith.constant 11 : index
    %c0_631 = arith.constant 0 : index
    %702 = vector.load %arg9[%c11_630, %c0_631] : memref<16x128xf32, #tpu.memory_space<vmem>>, vector<1x128xf32>
    tpu.vector_store %arg9[%c11_630, %c0_631], %701 {strides = array<i32>} : memref<16x128xf32, #tpu.memory_space<vmem>>, vector<1x128xf32>,
    %703 = arith.index_cast %699 : i32 to index
    %c0_632 = arith.constant 0 : index
    %704 = vector.load %arg3[%703, %c0_632] : memref<64x128xf32, #tpu.memory_space<vmem>>, vector<1x128xf32>
    %c11_633 = arith.constant 11 : index
    %c0_634 = arith.constant 0 : index
    %705 = vector.load %arg10[%c11_633, %c0_634] : memref<16x128xf32, #tpu.memory_space<vmem>>, vector<1x128xf32>
    tpu.vector_store %arg10[%c11_633, %c0_634], %704 {strides = array<i32>} : memref<16x128xf32, #tpu.memory_space<vmem>>, vector<1x128xf32>,
    %c92 = arith.constant 92 : index
    %706 = memref.load %arg0[%c92] : memref<128xi32, #tpu.memory_space<smem>>
    %707 = arith.index_cast %706 : i32 to index
    %c0_635 = arith.constant 0 : index
    %708 = vector.load %arg2[%707, %c0_635] : memref<64x128xf32, #tpu.memory_space<vmem>>, vector<1x128xf32>
    %c12_636 = arith.constant 12 : index
    %c0_637 = arith.constant 0 : index
    %709 = vector.load %arg9[%c12_636, %c0_637] : memref<16x128xf32, #tpu.memory_space<vmem>>, vector<1x128xf32>
    tpu.vector_store %arg9[%c12_636, %c0_637], %708 {strides = array<i32>} : memref<16x128xf32, #tpu.memory_space<vmem>>, vector<1x128xf32>,
    %710 = arith.index_cast %706 : i32 to index
    %c0_638 = arith.constant 0 : index
    %711 = vector.load %arg3[%710, %c0_638] : memref<64x128xf32, #tpu.memory_space<vmem>>, vector<1x128xf32>
    %c12_639 = arith.constant 12 : index
    %c0_640 = arith.constant 0 : index
    %712 = vector.load %arg10[%c12_639, %c0_640] : memref<16x128xf32, #tpu.memory_space<vmem>>, vector<1x128xf32>
    tpu.vector_store %arg10[%c12_639, %c0_640], %711 {strides = array<i32>} : memref<16x128xf32, #tpu.memory_space<vmem>>, vector<1x128xf32>,
    %c93 = arith.constant 93 : index
    %713 = memref.load %arg0[%c93] : memref<128xi32, #tpu.memory_space<smem>>
    %714 = arith.index_cast %713 : i32 to index
    %c0_641 = arith.constant 0 : index
    %715 = vector.load %arg2[%714, %c0_641] : memref<64x128xf32, #tpu.memory_space<vmem>>, vector<1x128xf32>
    %c13_642 = arith.constant 13 : index
    %c0_643 = arith.constant 0 : index
    %716 = vector.load %arg9[%c13_642, %c0_643] : memref<16x128xf32, #tpu.memory_space<vmem>>, vector<1x128xf32>
    tpu.vector_store %arg9[%c13_642, %c0_643], %715 {strides = array<i32>} : memref<16x128xf32, #tpu.memory_space<vmem>>, vector<1x128xf32>,
    %717 = arith.index_cast %713 : i32 to index
    %c0_644 = arith.constant 0 : index
    %718 = vector.load %arg3[%717, %c0_644] : memref<64x128xf32, #tpu.memory_space<vmem>>, vector<1x128xf32>
    %c13_645 = arith.constant 13 : index
    %c0_646 = arith.constant 0 : index
    %719 = vector.load %arg10[%c13_645, %c0_646] : memref<16x128xf32, #tpu.memory_space<vmem>>, vector<1x128xf32>
    tpu.vector_store %arg10[%c13_645, %c0_646], %718 {strides = array<i32>} : memref<16x128xf32, #tpu.memory_space<vmem>>, vector<1x128xf32>,
    %c94 = arith.constant 94 : index
    %720 = memref.load %arg0[%c94] : memref<128xi32, #tpu.memory_space<smem>>
    %721 = arith.index_cast %720 : i32 to index
    %c0_647 = arith.constant 0 : index
    %722 = vector.load %arg2[%721, %c0_647] : memref<64x128xf32, #tpu.memory_space<vmem>>, vector<1x128xf32>
    %c14_648 = arith.constant 14 : index
    %c0_649 = arith.constant 0 : index
    %723 = vector.load %arg9[%c14_648, %c0_649] : memref<16x128xf32, #tpu.memory_space<vmem>>, vector<1x128xf32>
    tpu.vector_store %arg9[%c14_648, %c0_649], %722 {strides = array<i32>} : memref<16x128xf32, #tpu.memory_space<vmem>>, vector<1x128xf32>,
    %724 = arith.index_cast %720 : i32 to index
    %c0_650 = arith.constant 0 : index
    %725 = vector.load %arg3[%724, %c0_650] : memref<64x128xf32, #tpu.memory_space<vmem>>, vector<1x128xf32>
    %c14_651 = arith.constant 14 : index
    %c0_652 = arith.constant 0 : index
    %726 = vector.load %arg10[%c14_651, %c0_652] : memref<16x128xf32, #tpu.memory_space<vmem>>, vector<1x128xf32>
    tpu.vector_store %arg10[%c14_651, %c0_652], %725 {strides = array<i32>} : memref<16x128xf32, #tpu.memory_space<vmem>>, vector<1x128xf32>,
    %c95 = arith.constant 95 : index
    %727 = memref.load %arg0[%c95] : memref<128xi32, #tpu.memory_space<smem>>
    %728 = arith.index_cast %727 : i32 to index
    %c0_653 = arith.constant 0 : index
    %729 = vector.load %arg2[%728, %c0_653] : memref<64x128xf32, #tpu.memory_space<vmem>>, vector<1x128xf32>
    %c15_654 = arith.constant 15 : index
    %c0_655 = arith.constant 0 : index
    %730 = vector.load %arg9[%c15_654, %c0_655] : memref<16x128xf32, #tpu.memory_space<vmem>>, vector<1x128xf32>
    tpu.vector_store %arg9[%c15_654, %c0_655], %729 {strides = array<i32>} : memref<16x128xf32, #tpu.memory_space<vmem>>, vector<1x128xf32>,
    %731 = arith.index_cast %727 : i32 to index
    %c0_656 = arith.constant 0 : index
    %732 = vector.load %arg3[%731, %c0_656] : memref<64x128xf32, #tpu.memory_space<vmem>>, vector<1x128xf32>
    %c15_657 = arith.constant 15 : index
    %c0_658 = arith.constant 0 : index
    %733 = vector.load %arg10[%c15_657, %c0_658] : memref<16x128xf32, #tpu.memory_space<vmem>>, vector<1x128xf32>
    tpu.vector_store %arg10[%c15_657, %c0_658], %732 {strides = array<i32>} : memref<16x128xf32, #tpu.memory_space<vmem>>, vector<1x128xf32>,
    %c0_659 = arith.constant 0 : index
    %c0_660 = arith.constant 0 : index
    %734 = vector.load %arg9[%c0_659, %c0_660] : memref<16x128xf32, #tpu.memory_space<vmem>>, vector<16x128xf32>
    %cst_661 = arith.constant dense<0.000000e+00> : vector<1x16xf32>
    %735 = tpu.matmul %620, %734, %cst_661 {dimension_numbers = #tpu.dot_dimension_numbers<[1], [1], [0], [0], [0, 0, 1, 0], [], []>} : vector<1x128xf32>, vector<16x128xf32>, vector<1x16xf32> -> vector<1x16xf32>
    %cst_662 = arith.constant 14.2857141 : f32
    %736 = vector.broadcast %cst_662 : f32 to vector<1x16xf32>
    %737 = arith.mulf %735, %736 : vector<1x16xf32>
    %c0_663 = arith.constant 0 : index
    %c0_664 = arith.constant 0 : index
    %738 = vector.load %arg10[%c0_663, %c0_664] : memref<16x128xf32, #tpu.memory_space<vmem>>, vector<16x128xf32>
    %cst_665 = arith.constant dense<0.000000e+00> : vector<1x16xf32>
    %739 = tpu.matmul %621, %738, %cst_665 {dimension_numbers = #tpu.dot_dimension_numbers<[1], [1], [0], [0], [0, 0, 1, 0], [], []>} : vector<1x128xf32>, vector<16x128xf32>, vector<1x16xf32> -> vector<1x16xf32>
    %cst_666 = arith.constant 14.2857141 : f32
    %740 = vector.broadcast %cst_666 : f32 to vector<1x16xf32>
    %741 = arith.mulf %739, %740 : vector<1x16xf32>
    %c5_667 = arith.constant 5 : index
    %c0_668 = arith.constant 0 : index
    %742 = vector.load %arg11[%c5_667, %c0_668] : memref<8x16xf32, #tpu.memory_space<vmem>>, vector<1x16xf32>
    tpu.vector_store %arg11[%c5_667, %c0_668], %737 {strides = array<i32>} : memref<8x16xf32, #tpu.memory_space<vmem>>, vector<1x16xf32>,
    %c5_669 = arith.constant 5 : index
    %c0_670 = arith.constant 0 : index
    %743 = vector.load %arg12[%c5_669, %c0_670] : memref<8x16xf32, #tpu.memory_space<vmem>>, vector<1x16xf32>
    tpu.vector_store %arg12[%c5_669, %c0_670], %741 {strides = array<i32>} : memref<8x16xf32, #tpu.memory_space<vmem>>, vector<1x16xf32>,
    %c6_671 = arith.constant 6 : index
    %c0_672 = arith.constant 0 : index
    %744 = vector.load %arg4[%c6_671, %c0_672] : memref<8x128xf32, #tpu.memory_space<vmem>>, vector<1x128xf32>
    %c6_673 = arith.constant 6 : index
    %c0_674 = arith.constant 0 : index
    %745 = vector.load %arg5[%c6_673, %c0_674] : memref<8x128xf32, #tpu.memory_space<vmem>>, vector<1x128xf32>
    %c96 = arith.constant 96 : index
    %746 = memref.load %arg0[%c96] : memref<128xi32, #tpu.memory_space<smem>>
    %747 = arith.index_cast %746 : i32 to index
    %c0_675 = arith.constant 0 : index
    %748 = vector.load %arg2[%747, %c0_675] : memref<64x128xf32, #tpu.memory_space<vmem>>, vector<1x128xf32>
    %c0_676 = arith.constant 0 : index
    %c0_677 = arith.constant 0 : index
    %749 = vector.load %arg9[%c0_676, %c0_677] : memref<16x128xf32, #tpu.memory_space<vmem>>, vector<1x128xf32>
    tpu.vector_store %arg9[%c0_676, %c0_677], %748 {strides = array<i32>} : memref<16x128xf32, #tpu.memory_space<vmem>>, vector<1x128xf32>,
    %750 = arith.index_cast %746 : i32 to index
    %c0_678 = arith.constant 0 : index
    %751 = vector.load %arg3[%750, %c0_678] : memref<64x128xf32, #tpu.memory_space<vmem>>, vector<1x128xf32>
    %c0_679 = arith.constant 0 : index
    %c0_680 = arith.constant 0 : index
    %752 = vector.load %arg10[%c0_679, %c0_680] : memref<16x128xf32, #tpu.memory_space<vmem>>, vector<1x128xf32>
    tpu.vector_store %arg10[%c0_679, %c0_680], %751 {strides = array<i32>} : memref<16x128xf32, #tpu.memory_space<vmem>>, vector<1x128xf32>,
    %c97 = arith.constant 97 : index
    %753 = memref.load %arg0[%c97] : memref<128xi32, #tpu.memory_space<smem>>
    %754 = arith.index_cast %753 : i32 to index
    %c0_681 = arith.constant 0 : index
    %755 = vector.load %arg2[%754, %c0_681] : memref<64x128xf32, #tpu.memory_space<vmem>>, vector<1x128xf32>
    %c1_682 = arith.constant 1 : index
    %c0_683 = arith.constant 0 : index
    %756 = vector.load %arg9[%c1_682, %c0_683] : memref<16x128xf32, #tpu.memory_space<vmem>>, vector<1x128xf32>
    tpu.vector_store %arg9[%c1_682, %c0_683], %755 {strides = array<i32>} : memref<16x128xf32, #tpu.memory_space<vmem>>, vector<1x128xf32>,
    %757 = arith.index_cast %753 : i32 to index
    %c0_684 = arith.constant 0 : index
    %758 = vector.load %arg3[%757, %c0_684] : memref<64x128xf32, #tpu.memory_space<vmem>>, vector<1x128xf32>
    %c1_685 = arith.constant 1 : index
    %c0_686 = arith.constant 0 : index
    %759 = vector.load %arg10[%c1_685, %c0_686] : memref<16x128xf32, #tpu.memory_space<vmem>>, vector<1x128xf32>
    tpu.vector_store %arg10[%c1_685, %c0_686], %758 {strides = array<i32>} : memref<16x128xf32, #tpu.memory_space<vmem>>, vector<1x128xf32>,
    %c98 = arith.constant 98 : index
    %760 = memref.load %arg0[%c98] : memref<128xi32, #tpu.memory_space<smem>>
    %761 = arith.index_cast %760 : i32 to index
    %c0_687 = arith.constant 0 : index
    %762 = vector.load %arg2[%761, %c0_687] : memref<64x128xf32, #tpu.memory_space<vmem>>, vector<1x128xf32>
    %c2_688 = arith.constant 2 : index
    %c0_689 = arith.constant 0 : index
    %763 = vector.load %arg9[%c2_688, %c0_689] : memref<16x128xf32, #tpu.memory_space<vmem>>, vector<1x128xf32>
    tpu.vector_store %arg9[%c2_688, %c0_689], %762 {strides = array<i32>} : memref<16x128xf32, #tpu.memory_space<vmem>>, vector<1x128xf32>,
    %764 = arith.index_cast %760 : i32 to index
    %c0_690 = arith.constant 0 : index
    %765 = vector.load %arg3[%764, %c0_690] : memref<64x128xf32, #tpu.memory_space<vmem>>, vector<1x128xf32>
    %c2_691 = arith.constant 2 : index
    %c0_692 = arith.constant 0 : index
    %766 = vector.load %arg10[%c2_691, %c0_692] : memref<16x128xf32, #tpu.memory_space<vmem>>, vector<1x128xf32>
    tpu.vector_store %arg10[%c2_691, %c0_692], %765 {strides = array<i32>} : memref<16x128xf32, #tpu.memory_space<vmem>>, vector<1x128xf32>,
    %c99 = arith.constant 99 : index
    %767 = memref.load %arg0[%c99] : memref<128xi32, #tpu.memory_space<smem>>
    %768 = arith.index_cast %767 : i32 to index
    %c0_693 = arith.constant 0 : index
    %769 = vector.load %arg2[%768, %c0_693] : memref<64x128xf32, #tpu.memory_space<vmem>>, vector<1x128xf32>
    %c3_694 = arith.constant 3 : index
    %c0_695 = arith.constant 0 : index
    %770 = vector.load %arg9[%c3_694, %c0_695] : memref<16x128xf32, #tpu.memory_space<vmem>>, vector<1x128xf32>
    tpu.vector_store %arg9[%c3_694, %c0_695], %769 {strides = array<i32>} : memref<16x128xf32, #tpu.memory_space<vmem>>, vector<1x128xf32>,
    %771 = arith.index_cast %767 : i32 to index
    %c0_696 = arith.constant 0 : index
    %772 = vector.load %arg3[%771, %c0_696] : memref<64x128xf32, #tpu.memory_space<vmem>>, vector<1x128xf32>
    %c3_697 = arith.constant 3 : index
    %c0_698 = arith.constant 0 : index
    %773 = vector.load %arg10[%c3_697, %c0_698] : memref<16x128xf32, #tpu.memory_space<vmem>>, vector<1x128xf32>
    tpu.vector_store %arg10[%c3_697, %c0_698], %772 {strides = array<i32>} : memref<16x128xf32, #tpu.memory_space<vmem>>, vector<1x128xf32>,
    %c100 = arith.constant 100 : index
    %774 = memref.load %arg0[%c100] : memref<128xi32, #tpu.memory_space<smem>>
    %775 = arith.index_cast %774 : i32 to index
    %c0_699 = arith.constant 0 : index
    %776 = vector.load %arg2[%775, %c0_699] : memref<64x128xf32, #tpu.memory_space<vmem>>, vector<1x128xf32>
    %c4_700 = arith.constant 4 : index
    %c0_701 = arith.constant 0 : index
    %777 = vector.load %arg9[%c4_700, %c0_701] : memref<16x128xf32, #tpu.memory_space<vmem>>, vector<1x128xf32>
    tpu.vector_store %arg9[%c4_700, %c0_701], %776 {strides = array<i32>} : memref<16x128xf32, #tpu.memory_space<vmem>>, vector<1x128xf32>,
    %778 = arith.index_cast %774 : i32 to index
    %c0_702 = arith.constant 0 : index
    %779 = vector.load %arg3[%778, %c0_702] : memref<64x128xf32, #tpu.memory_space<vmem>>, vector<1x128xf32>
    %c4_703 = arith.constant 4 : index
    %c0_704 = arith.constant 0 : index
    %780 = vector.load %arg10[%c4_703, %c0_704] : memref<16x128xf32, #tpu.memory_space<vmem>>, vector<1x128xf32>
    tpu.vector_store %arg10[%c4_703, %c0_704], %779 {strides = array<i32>} : memref<16x128xf32, #tpu.memory_space<vmem>>, vector<1x128xf32>,
    %c101 = arith.constant 101 : index
    %781 = memref.load %arg0[%c101] : memref<128xi32, #tpu.memory_space<smem>>
    %782 = arith.index_cast %781 : i32 to index
    %c0_705 = arith.constant 0 : index
    %783 = vector.load %arg2[%782, %c0_705] : memref<64x128xf32, #tpu.memory_space<vmem>>, vector<1x128xf32>
    %c5_706 = arith.constant 5 : index
    %c0_707 = arith.constant 0 : index
    %784 = vector.load %arg9[%c5_706, %c0_707] : memref<16x128xf32, #tpu.memory_space<vmem>>, vector<1x128xf32>
    tpu.vector_store %arg9[%c5_706, %c0_707], %783 {strides = array<i32>} : memref<16x128xf32, #tpu.memory_space<vmem>>, vector<1x128xf32>,
    %785 = arith.index_cast %781 : i32 to index
    %c0_708 = arith.constant 0 : index
    %786 = vector.load %arg3[%785, %c0_708] : memref<64x128xf32, #tpu.memory_space<vmem>>, vector<1x128xf32>
    %c5_709 = arith.constant 5 : index
    %c0_710 = arith.constant 0 : index
    %787 = vector.load %arg10[%c5_709, %c0_710] : memref<16x128xf32, #tpu.memory_space<vmem>>, vector<1x128xf32>
    tpu.vector_store %arg10[%c5_709, %c0_710], %786 {strides = array<i32>} : memref<16x128xf32, #tpu.memory_space<vmem>>, vector<1x128xf32>,
    %c102 = arith.constant 102 : index
    %788 = memref.load %arg0[%c102] : memref<128xi32, #tpu.memory_space<smem>>
    %789 = arith.index_cast %788 : i32 to index
    %c0_711 = arith.constant 0 : index
    %790 = vector.load %arg2[%789, %c0_711] : memref<64x128xf32, #tpu.memory_space<vmem>>, vector<1x128xf32>
    %c6_712 = arith.constant 6 : index
    %c0_713 = arith.constant 0 : index
    %791 = vector.load %arg9[%c6_712, %c0_713] : memref<16x128xf32, #tpu.memory_space<vmem>>, vector<1x128xf32>
    tpu.vector_store %arg9[%c6_712, %c0_713], %790 {strides = array<i32>} : memref<16x128xf32, #tpu.memory_space<vmem>>, vector<1x128xf32>,
    %792 = arith.index_cast %788 : i32 to index
    %c0_714 = arith.constant 0 : index
    %793 = vector.load %arg3[%792, %c0_714] : memref<64x128xf32, #tpu.memory_space<vmem>>, vector<1x128xf32>
    %c6_715 = arith.constant 6 : index
    %c0_716 = arith.constant 0 : index
    %794 = vector.load %arg10[%c6_715, %c0_716] : memref<16x128xf32, #tpu.memory_space<vmem>>, vector<1x128xf32>
    tpu.vector_store %arg10[%c6_715, %c0_716], %793 {strides = array<i32>} : memref<16x128xf32, #tpu.memory_space<vmem>>, vector<1x128xf32>,
    %c103 = arith.constant 103 : index
    %795 = memref.load %arg0[%c103] : memref<128xi32, #tpu.memory_space<smem>>
    %796 = arith.index_cast %795 : i32 to index
    %c0_717 = arith.constant 0 : index
    %797 = vector.load %arg2[%796, %c0_717] : memref<64x128xf32, #tpu.memory_space<vmem>>, vector<1x128xf32>
    %c7_718 = arith.constant 7 : index
    %c0_719 = arith.constant 0 : index
    %798 = vector.load %arg9[%c7_718, %c0_719] : memref<16x128xf32, #tpu.memory_space<vmem>>, vector<1x128xf32>
    tpu.vector_store %arg9[%c7_718, %c0_719], %797 {strides = array<i32>} : memref<16x128xf32, #tpu.memory_space<vmem>>, vector<1x128xf32>,
    %799 = arith.index_cast %795 : i32 to index
    %c0_720 = arith.constant 0 : index
    %800 = vector.load %arg3[%799, %c0_720] : memref<64x128xf32, #tpu.memory_space<vmem>>, vector<1x128xf32>
    %c7_721 = arith.constant 7 : index
    %c0_722 = arith.constant 0 : index
    %801 = vector.load %arg10[%c7_721, %c0_722] : memref<16x128xf32, #tpu.memory_space<vmem>>, vector<1x128xf32>
    tpu.vector_store %arg10[%c7_721, %c0_722], %800 {strides = array<i32>} : memref<16x128xf32, #tpu.memory_space<vmem>>, vector<1x128xf32>,
    %c104 = arith.constant 104 : index
    %802 = memref.load %arg0[%c104] : memref<128xi32, #tpu.memory_space<smem>>
    %803 = arith.index_cast %802 : i32 to index
    %c0_723 = arith.constant 0 : index
    %804 = vector.load %arg2[%803, %c0_723] : memref<64x128xf32, #tpu.memory_space<vmem>>, vector<1x128xf32>
    %c8_724 = arith.constant 8 : index
    %c0_725 = arith.constant 0 : index
    %805 = vector.load %arg9[%c8_724, %c0_725] : memref<16x128xf32, #tpu.memory_space<vmem>>, vector<1x128xf32>
    tpu.vector_store %arg9[%c8_724, %c0_725], %804 {strides = array<i32>} : memref<16x128xf32, #tpu.memory_space<vmem>>, vector<1x128xf32>,
    %806 = arith.index_cast %802 : i32 to index
    %c0_726 = arith.constant 0 : index
    %807 = vector.load %arg3[%806, %c0_726] : memref<64x128xf32, #tpu.memory_space<vmem>>, vector<1x128xf32>
    %c8_727 = arith.constant 8 : index
    %c0_728 = arith.constant 0 : index
    %808 = vector.load %arg10[%c8_727, %c0_728] : memref<16x128xf32, #tpu.memory_space<vmem>>, vector<1x128xf32>
    tpu.vector_store %arg10[%c8_727, %c0_728], %807 {strides = array<i32>} : memref<16x128xf32, #tpu.memory_space<vmem>>, vector<1x128xf32>,
    %c105 = arith.constant 105 : index
    %809 = memref.load %arg0[%c105] : memref<128xi32, #tpu.memory_space<smem>>
    %810 = arith.index_cast %809 : i32 to index
    %c0_729 = arith.constant 0 : index
    %811 = vector.load %arg2[%810, %c0_729] : memref<64x128xf32, #tpu.memory_space<vmem>>, vector<1x128xf32>
    %c9_730 = arith.constant 9 : index
    %c0_731 = arith.constant 0 : index
    %812 = vector.load %arg9[%c9_730, %c0_731] : memref<16x128xf32, #tpu.memory_space<vmem>>, vector<1x128xf32>
    tpu.vector_store %arg9[%c9_730, %c0_731], %811 {strides = array<i32>} : memref<16x128xf32, #tpu.memory_space<vmem>>, vector<1x128xf32>,
    %813 = arith.index_cast %809 : i32 to index
    %c0_732 = arith.constant 0 : index
    %814 = vector.load %arg3[%813, %c0_732] : memref<64x128xf32, #tpu.memory_space<vmem>>, vector<1x128xf32>
    %c9_733 = arith.constant 9 : index
    %c0_734 = arith.constant 0 : index
    %815 = vector.load %arg10[%c9_733, %c0_734] : memref<16x128xf32, #tpu.memory_space<vmem>>, vector<1x128xf32>
    tpu.vector_store %arg10[%c9_733, %c0_734], %814 {strides = array<i32>} : memref<16x128xf32, #tpu.memory_space<vmem>>, vector<1x128xf32>,
    %c106 = arith.constant 106 : index
    %816 = memref.load %arg0[%c106] : memref<128xi32, #tpu.memory_space<smem>>
    %817 = arith.index_cast %816 : i32 to index
    %c0_735 = arith.constant 0 : index
    %818 = vector.load %arg2[%817, %c0_735] : memref<64x128xf32, #tpu.memory_space<vmem>>, vector<1x128xf32>
    %c10_736 = arith.constant 10 : index
    %c0_737 = arith.constant 0 : index
    %819 = vector.load %arg9[%c10_736, %c0_737] : memref<16x128xf32, #tpu.memory_space<vmem>>, vector<1x128xf32>
    tpu.vector_store %arg9[%c10_736, %c0_737], %818 {strides = array<i32>} : memref<16x128xf32, #tpu.memory_space<vmem>>, vector<1x128xf32>,
    %820 = arith.index_cast %816 : i32 to index
    %c0_738 = arith.constant 0 : index
    %821 = vector.load %arg3[%820, %c0_738] : memref<64x128xf32, #tpu.memory_space<vmem>>, vector<1x128xf32>
    %c10_739 = arith.constant 10 : index
    %c0_740 = arith.constant 0 : index
    %822 = vector.load %arg10[%c10_739, %c0_740] : memref<16x128xf32, #tpu.memory_space<vmem>>, vector<1x128xf32>
    tpu.vector_store %arg10[%c10_739, %c0_740], %821 {strides = array<i32>} : memref<16x128xf32, #tpu.memory_space<vmem>>, vector<1x128xf32>,
    %c107 = arith.constant 107 : index
    %823 = memref.load %arg0[%c107] : memref<128xi32, #tpu.memory_space<smem>>
    %824 = arith.index_cast %823 : i32 to index
    %c0_741 = arith.constant 0 : index
    %825 = vector.load %arg2[%824, %c0_741] : memref<64x128xf32, #tpu.memory_space<vmem>>, vector<1x128xf32>
    %c11_742 = arith.constant 11 : index
    %c0_743 = arith.constant 0 : index
    %826 = vector.load %arg9[%c11_742, %c0_743] : memref<16x128xf32, #tpu.memory_space<vmem>>, vector<1x128xf32>
    tpu.vector_store %arg9[%c11_742, %c0_743], %825 {strides = array<i32>} : memref<16x128xf32, #tpu.memory_space<vmem>>, vector<1x128xf32>,
    %827 = arith.index_cast %823 : i32 to index
    %c0_744 = arith.constant 0 : index
    %828 = vector.load %arg3[%827, %c0_744] : memref<64x128xf32, #tpu.memory_space<vmem>>, vector<1x128xf32>
    %c11_745 = arith.constant 11 : index
    %c0_746 = arith.constant 0 : index
    %829 = vector.load %arg10[%c11_745, %c0_746] : memref<16x128xf32, #tpu.memory_space<vmem>>, vector<1x128xf32>
    tpu.vector_store %arg10[%c11_745, %c0_746], %828 {strides = array<i32>} : memref<16x128xf32, #tpu.memory_space<vmem>>, vector<1x128xf32>,
    %c108 = arith.constant 108 : index
    %830 = memref.load %arg0[%c108] : memref<128xi32, #tpu.memory_space<smem>>
    %831 = arith.index_cast %830 : i32 to index
    %c0_747 = arith.constant 0 : index
    %832 = vector.load %arg2[%831, %c0_747] : memref<64x128xf32, #tpu.memory_space<vmem>>, vector<1x128xf32>
    %c12_748 = arith.constant 12 : index
    %c0_749 = arith.constant 0 : index
    %833 = vector.load %arg9[%c12_748, %c0_749] : memref<16x128xf32, #tpu.memory_space<vmem>>, vector<1x128xf32>
    tpu.vector_store %arg9[%c12_748, %c0_749], %832 {strides = array<i32>} : memref<16x128xf32, #tpu.memory_space<vmem>>, vector<1x128xf32>,
    %834 = arith.index_cast %830 : i32 to index
    %c0_750 = arith.constant 0 : index
    %835 = vector.load %arg3[%834, %c0_750] : memref<64x128xf32, #tpu.memory_space<vmem>>, vector<1x128xf32>
    %c12_751 = arith.constant 12 : index
    %c0_752 = arith.constant 0 : index
    %836 = vector.load %arg10[%c12_751, %c0_752] : memref<16x128xf32, #tpu.memory_space<vmem>>, vector<1x128xf32>
    tpu.vector_store %arg10[%c12_751, %c0_752], %835 {strides = array<i32>} : memref<16x128xf32, #tpu.memory_space<vmem>>, vector<1x128xf32>,
    %c109 = arith.constant 109 : index
    %837 = memref.load %arg0[%c109] : memref<128xi32, #tpu.memory_space<smem>>
    %838 = arith.index_cast %837 : i32 to index
    %c0_753 = arith.constant 0 : index
    %839 = vector.load %arg2[%838, %c0_753] : memref<64x128xf32, #tpu.memory_space<vmem>>, vector<1x128xf32>
    %c13_754 = arith.constant 13 : index
    %c0_755 = arith.constant 0 : index
    %840 = vector.load %arg9[%c13_754, %c0_755] : memref<16x128xf32, #tpu.memory_space<vmem>>, vector<1x128xf32>
    tpu.vector_store %arg9[%c13_754, %c0_755], %839 {strides = array<i32>} : memref<16x128xf32, #tpu.memory_space<vmem>>, vector<1x128xf32>,
    %841 = arith.index_cast %837 : i32 to index
    %c0_756 = arith.constant 0 : index
    %842 = vector.load %arg3[%841, %c0_756] : memref<64x128xf32, #tpu.memory_space<vmem>>, vector<1x128xf32>
    %c13_757 = arith.constant 13 : index
    %c0_758 = arith.constant 0 : index
    %843 = vector.load %arg10[%c13_757, %c0_758] : memref<16x128xf32, #tpu.memory_space<vmem>>, vector<1x128xf32>
    tpu.vector_store %arg10[%c13_757, %c0_758], %842 {strides = array<i32>} : memref<16x128xf32, #tpu.memory_space<vmem>>, vector<1x128xf32>,
    %c110 = arith.constant 110 : index
    %844 = memref.load %arg0[%c110] : memref<128xi32, #tpu.memory_space<smem>>
    %845 = arith.index_cast %844 : i32 to index
    %c0_759 = arith.constant 0 : index
    %846 = vector.load %arg2[%845, %c0_759] : memref<64x128xf32, #tpu.memory_space<vmem>>, vector<1x128xf32>
    %c14_760 = arith.constant 14 : index
    %c0_761 = arith.constant 0 : index
    %847 = vector.load %arg9[%c14_760, %c0_761] : memref<16x128xf32, #tpu.memory_space<vmem>>, vector<1x128xf32>
    tpu.vector_store %arg9[%c14_760, %c0_761], %846 {strides = array<i32>} : memref<16x128xf32, #tpu.memory_space<vmem>>, vector<1x128xf32>,
    %848 = arith.index_cast %844 : i32 to index
    %c0_762 = arith.constant 0 : index
    %849 = vector.load %arg3[%848, %c0_762] : memref<64x128xf32, #tpu.memory_space<vmem>>, vector<1x128xf32>
    %c14_763 = arith.constant 14 : index
    %c0_764 = arith.constant 0 : index
    %850 = vector.load %arg10[%c14_763, %c0_764] : memref<16x128xf32, #tpu.memory_space<vmem>>, vector<1x128xf32>
    tpu.vector_store %arg10[%c14_763, %c0_764], %849 {strides = array<i32>} : memref<16x128xf32, #tpu.memory_space<vmem>>, vector<1x128xf32>,
    %c111 = arith.constant 111 : index
    %851 = memref.load %arg0[%c111] : memref<128xi32, #tpu.memory_space<smem>>
    %852 = arith.index_cast %851 : i32 to index
    %c0_765 = arith.constant 0 : index
    %853 = vector.load %arg2[%852, %c0_765] : memref<64x128xf32, #tpu.memory_space<vmem>>, vector<1x128xf32>
    %c15_766 = arith.constant 15 : index
    %c0_767 = arith.constant 0 : index
    %854 = vector.load %arg9[%c15_766, %c0_767] : memref<16x128xf32, #tpu.memory_space<vmem>>, vector<1x128xf32>
    tpu.vector_store %arg9[%c15_766, %c0_767], %853 {strides = array<i32>} : memref<16x128xf32, #tpu.memory_space<vmem>>, vector<1x128xf32>,
    %855 = arith.index_cast %851 : i32 to index
    %c0_768 = arith.constant 0 : index
    %856 = vector.load %arg3[%855, %c0_768] : memref<64x128xf32, #tpu.memory_space<vmem>>, vector<1x128xf32>
    %c15_769 = arith.constant 15 : index
    %c0_770 = arith.constant 0 : index
    %857 = vector.load %arg10[%c15_769, %c0_770] : memref<16x128xf32, #tpu.memory_space<vmem>>, vector<1x128xf32>
    tpu.vector_store %arg10[%c15_769, %c0_770], %856 {strides = array<i32>} : memref<16x128xf32, #tpu.memory_space<vmem>>, vector<1x128xf32>,
    %c0_771 = arith.constant 0 : index
    %c0_772 = arith.constant 0 : index
    %858 = vector.load %arg9[%c0_771, %c0_772] : memref<16x128xf32, #tpu.memory_space<vmem>>, vector<16x128xf32>
    %cst_773 = arith.constant dense<0.000000e+00> : vector<1x16xf32>
    %859 = tpu.matmul %744, %858, %cst_773 {dimension_numbers = #tpu.dot_dimension_numbers<[1], [1], [0], [0], [0, 0, 1, 0], [], []>} : vector<1x128xf32>, vector<16x128xf32>, vector<1x16xf32> -> vector<1x16xf32>
    %cst_774 = arith.constant 14.2857141 : f32
    %860 = vector.broadcast %cst_774 : f32 to vector<1x16xf32>
    %861 = arith.mulf %859, %860 : vector<1x16xf32>
    %c0_775 = arith.constant 0 : index
    %c0_776 = arith.constant 0 : index
    %862 = vector.load %arg10[%c0_775, %c0_776] : memref<16x128xf32, #tpu.memory_space<vmem>>, vector<16x128xf32>
    %cst_777 = arith.constant dense<0.000000e+00> : vector<1x16xf32>
    %863 = tpu.matmul %745, %862, %cst_777 {dimension_numbers = #tpu.dot_dimension_numbers<[1], [1], [0], [0], [0, 0, 1, 0], [], []>} : vector<1x128xf32>, vector<16x128xf32>, vector<1x16xf32> -> vector<1x16xf32>
    %cst_778 = arith.constant 14.2857141 : f32
    %864 = vector.broadcast %cst_778 : f32 to vector<1x16xf32>
    %865 = arith.mulf %863, %864 : vector<1x16xf32>
    %c6_779 = arith.constant 6 : index
    %c0_780 = arith.constant 0 : index
    %866 = vector.load %arg11[%c6_779, %c0_780] : memref<8x16xf32, #tpu.memory_space<vmem>>, vector<1x16xf32>
    tpu.vector_store %arg11[%c6_779, %c0_780], %861 {strides = array<i32>} : memref<8x16xf32, #tpu.memory_space<vmem>>, vector<1x16xf32>,
    %c6_781 = arith.constant 6 : index
    %c0_782 = arith.constant 0 : index
    %867 = vector.load %arg12[%c6_781, %c0_782] : memref<8x16xf32, #tpu.memory_space<vmem>>, vector<1x16xf32>
    tpu.vector_store %arg12[%c6_781, %c0_782], %865 {strides = array<i32>} : memref<8x16xf32, #tpu.memory_space<vmem>>, vector<1x16xf32>,
    %c7_783 = arith.constant 7 : index
    %c0_784 = arith.constant 0 : index
    %868 = vector.load %arg4[%c7_783, %c0_784] : memref<8x128xf32, #tpu.memory_space<vmem>>, vector<1x128xf32>
    %c7_785 = arith.constant 7 : index
    %c0_786 = arith.constant 0 : index
    %869 = vector.load %arg5[%c7_785, %c0_786] : memref<8x128xf32, #tpu.memory_space<vmem>>, vector<1x128xf32>
    %c112 = arith.constant 112 : index
    %870 = memref.load %arg0[%c112] : memref<128xi32, #tpu.memory_space<smem>>
    %871 = arith.index_cast %870 : i32 to index
    %c0_787 = arith.constant 0 : index
    %872 = vector.load %arg2[%871, %c0_787] : memref<64x128xf32, #tpu.memory_space<vmem>>, vector<1x128xf32>
    %c0_788 = arith.constant 0 : index
    %c0_789 = arith.constant 0 : index
    %873 = vector.load %arg9[%c0_788, %c0_789] : memref<16x128xf32, #tpu.memory_space<vmem>>, vector<1x128xf32>
    tpu.vector_store %arg9[%c0_788, %c0_789], %872 {strides = array<i32>} : memref<16x128xf32, #tpu.memory_space<vmem>>, vector<1x128xf32>,
    %874 = arith.index_cast %870 : i32 to index
    %c0_790 = arith.constant 0 : index
    %875 = vector.load %arg3[%874, %c0_790] : memref<64x128xf32, #tpu.memory_space<vmem>>, vector<1x128xf32>
    %c0_791 = arith.constant 0 : index
    %c0_792 = arith.constant 0 : index
    %876 = vector.load %arg10[%c0_791, %c0_792] : memref<16x128xf32, #tpu.memory_space<vmem>>, vector<1x128xf32>
    tpu.vector_store %arg10[%c0_791, %c0_792], %875 {strides = array<i32>} : memref<16x128xf32, #tpu.memory_space<vmem>>, vector<1x128xf32>,
    %c113 = arith.constant 113 : index
    %877 = memref.load %arg0[%c113] : memref<128xi32, #tpu.memory_space<smem>>
    %878 = arith.index_cast %877 : i32 to index
    %c0_793 = arith.constant 0 : index
    %879 = vector.load %arg2[%878, %c0_793] : memref<64x128xf32, #tpu.memory_space<vmem>>, vector<1x128xf32>
    %c1_794 = arith.constant 1 : index
    %c0_795 = arith.constant 0 : index
    %880 = vector.load %arg9[%c1_794, %c0_795] : memref<16x128xf32, #tpu.memory_space<vmem>>, vector<1x128xf32>
    tpu.vector_store %arg9[%c1_794, %c0_795], %879 {strides = array<i32>} : memref<16x128xf32, #tpu.memory_space<vmem>>, vector<1x128xf32>,
    %881 = arith.index_cast %877 : i32 to index
    %c0_796 = arith.constant 0 : index
    %882 = vector.load %arg3[%881, %c0_796] : memref<64x128xf32, #tpu.memory_space<vmem>>, vector<1x128xf32>
    %c1_797 = arith.constant 1 : index
    %c0_798 = arith.constant 0 : index
    %883 = vector.load %arg10[%c1_797, %c0_798] : memref<16x128xf32, #tpu.memory_space<vmem>>, vector<1x128xf32>
    tpu.vector_store %arg10[%c1_797, %c0_798], %882 {strides = array<i32>} : memref<16x128xf32, #tpu.memory_space<vmem>>, vector<1x128xf32>,
    %c114 = arith.constant 114 : index
    %884 = memref.load %arg0[%c114] : memref<128xi32, #tpu.memory_space<smem>>
    %885 = arith.index_cast %884 : i32 to index
    %c0_799 = arith.constant 0 : index
    %886 = vector.load %arg2[%885, %c0_799] : memref<64x128xf32, #tpu.memory_space<vmem>>, vector<1x128xf32>
    %c2_800 = arith.constant 2 : index
    %c0_801 = arith.constant 0 : index
    %887 = vector.load %arg9[%c2_800, %c0_801] : memref<16x128xf32, #tpu.memory_space<vmem>>, vector<1x128xf32>
    tpu.vector_store %arg9[%c2_800, %c0_801], %886 {strides = array<i32>} : memref<16x128xf32, #tpu.memory_space<vmem>>, vector<1x128xf32>,
    %888 = arith.index_cast %884 : i32 to index
    %c0_802 = arith.constant 0 : index
    %889 = vector.load %arg3[%888, %c0_802] : memref<64x128xf32, #tpu.memory_space<vmem>>, vector<1x128xf32>
    %c2_803 = arith.constant 2 : index
    %c0_804 = arith.constant 0 : index
    %890 = vector.load %arg10[%c2_803, %c0_804] : memref<16x128xf32, #tpu.memory_space<vmem>>, vector<1x128xf32>
    tpu.vector_store %arg10[%c2_803, %c0_804], %889 {strides = array<i32>} : memref<16x128xf32, #tpu.memory_space<vmem>>, vector<1x128xf32>,
    %c115 = arith.constant 115 : index
    %891 = memref.load %arg0[%c115] : memref<128xi32, #tpu.memory_space<smem>>
    %892 = arith.index_cast %891 : i32 to index
    %c0_805 = arith.constant 0 : index
    %893 = vector.load %arg2[%892, %c0_805] : memref<64x128xf32, #tpu.memory_space<vmem>>, vector<1x128xf32>
    %c3_806 = arith.constant 3 : index
    %c0_807 = arith.constant 0 : index
    %894 = vector.load %arg9[%c3_806, %c0_807] : memref<16x128xf32, #tpu.memory_space<vmem>>, vector<1x128xf32>
    tpu.vector_store %arg9[%c3_806, %c0_807], %893 {strides = array<i32>} : memref<16x128xf32, #tpu.memory_space<vmem>>, vector<1x128xf32>,
    %895 = arith.index_cast %891 : i32 to index
    %c0_808 = arith.constant 0 : index
    %896 = vector.load %arg3[%895, %c0_808] : memref<64x128xf32, #tpu.memory_space<vmem>>, vector<1x128xf32>
    %c3_809 = arith.constant 3 : index
    %c0_810 = arith.constant 0 : index
    %897 = vector.load %arg10[%c3_809, %c0_810] : memref<16x128xf32, #tpu.memory_space<vmem>>, vector<1x128xf32>
    tpu.vector_store %arg10[%c3_809, %c0_810], %896 {strides = array<i32>} : memref<16x128xf32, #tpu.memory_space<vmem>>, vector<1x128xf32>,
    %c116 = arith.constant 116 : index
    %898 = memref.load %arg0[%c116] : memref<128xi32, #tpu.memory_space<smem>>
    %899 = arith.index_cast %898 : i32 to index
    %c0_811 = arith.constant 0 : index
    %900 = vector.load %arg2[%899, %c0_811] : memref<64x128xf32, #tpu.memory_space<vmem>>, vector<1x128xf32>
    %c4_812 = arith.constant 4 : index
    %c0_813 = arith.constant 0 : index
    %901 = vector.load %arg9[%c4_812, %c0_813] : memref<16x128xf32, #tpu.memory_space<vmem>>, vector<1x128xf32>
    tpu.vector_store %arg9[%c4_812, %c0_813], %900 {strides = array<i32>} : memref<16x128xf32, #tpu.memory_space<vmem>>, vector<1x128xf32>,
    %902 = arith.index_cast %898 : i32 to index
    %c0_814 = arith.constant 0 : index
    %903 = vector.load %arg3[%902, %c0_814] : memref<64x128xf32, #tpu.memory_space<vmem>>, vector<1x128xf32>
    %c4_815 = arith.constant 4 : index
    %c0_816 = arith.constant 0 : index
    %904 = vector.load %arg10[%c4_815, %c0_816] : memref<16x128xf32, #tpu.memory_space<vmem>>, vector<1x128xf32>
    tpu.vector_store %arg10[%c4_815, %c0_816], %903 {strides = array<i32>} : memref<16x128xf32, #tpu.memory_space<vmem>>, vector<1x128xf32>,
    %c117 = arith.constant 117 : index
    %905 = memref.load %arg0[%c117] : memref<128xi32, #tpu.memory_space<smem>>
    %906 = arith.index_cast %905 : i32 to index
    %c0_817 = arith.constant 0 : index
    %907 = vector.load %arg2[%906, %c0_817] : memref<64x128xf32, #tpu.memory_space<vmem>>, vector<1x128xf32>
    %c5_818 = arith.constant 5 : index
    %c0_819 = arith.constant 0 : index
    %908 = vector.load %arg9[%c5_818, %c0_819] : memref<16x128xf32, #tpu.memory_space<vmem>>, vector<1x128xf32>
    tpu.vector_store %arg9[%c5_818, %c0_819], %907 {strides = array<i32>} : memref<16x128xf32, #tpu.memory_space<vmem>>, vector<1x128xf32>,
    %909 = arith.index_cast %905 : i32 to index
    %c0_820 = arith.constant 0 : index
    %910 = vector.load %arg3[%909, %c0_820] : memref<64x128xf32, #tpu.memory_space<vmem>>, vector<1x128xf32>
    %c5_821 = arith.constant 5 : index
    %c0_822 = arith.constant 0 : index
    %911 = vector.load %arg10[%c5_821, %c0_822] : memref<16x128xf32, #tpu.memory_space<vmem>>, vector<1x128xf32>
    tpu.vector_store %arg10[%c5_821, %c0_822], %910 {strides = array<i32>} : memref<16x128xf32, #tpu.memory_space<vmem>>, vector<1x128xf32>,
    %c118 = arith.constant 118 : index
    %912 = memref.load %arg0[%c118] : memref<128xi32, #tpu.memory_space<smem>>
    %913 = arith.index_cast %912 : i32 to index
    %c0_823 = arith.constant 0 : index
    %914 = vector.load %arg2[%913, %c0_823] : memref<64x128xf32, #tpu.memory_space<vmem>>, vector<1x128xf32>
    %c6_824 = arith.constant 6 : index
    %c0_825 = arith.constant 0 : index
    %915 = vector.load %arg9[%c6_824, %c0_825] : memref<16x128xf32, #tpu.memory_space<vmem>>, vector<1x128xf32>
    tpu.vector_store %arg9[%c6_824, %c0_825], %914 {strides = array<i32>} : memref<16x128xf32, #tpu.memory_space<vmem>>, vector<1x128xf32>,
    %916 = arith.index_cast %912 : i32 to index
    %c0_826 = arith.constant 0 : index
    %917 = vector.load %arg3[%916, %c0_826] : memref<64x128xf32, #tpu.memory_space<vmem>>, vector<1x128xf32>
    %c6_827 = arith.constant 6 : index
    %c0_828 = arith.constant 0 : index
    %918 = vector.load %arg10[%c6_827, %c0_828] : memref<16x128xf32, #tpu.memory_space<vmem>>, vector<1x128xf32>
    tpu.vector_store %arg10[%c6_827, %c0_828], %917 {strides = array<i32>} : memref<16x128xf32, #tpu.memory_space<vmem>>, vector<1x128xf32>,
    %c119 = arith.constant 119 : index
    %919 = memref.load %arg0[%c119] : memref<128xi32, #tpu.memory_space<smem>>
    %920 = arith.index_cast %919 : i32 to index
    %c0_829 = arith.constant 0 : index
    %921 = vector.load %arg2[%920, %c0_829] : memref<64x128xf32, #tpu.memory_space<vmem>>, vector<1x128xf32>
    %c7_830 = arith.constant 7 : index
    %c0_831 = arith.constant 0 : index
    %922 = vector.load %arg9[%c7_830, %c0_831] : memref<16x128xf32, #tpu.memory_space<vmem>>, vector<1x128xf32>
    tpu.vector_store %arg9[%c7_830, %c0_831], %921 {strides = array<i32>} : memref<16x128xf32, #tpu.memory_space<vmem>>, vector<1x128xf32>,
    %923 = arith.index_cast %919 : i32 to index
    %c0_832 = arith.constant 0 : index
    %924 = vector.load %arg3[%923, %c0_832] : memref<64x128xf32, #tpu.memory_space<vmem>>, vector<1x128xf32>
    %c7_833 = arith.constant 7 : index
    %c0_834 = arith.constant 0 : index
    %925 = vector.load %arg10[%c7_833, %c0_834] : memref<16x128xf32, #tpu.memory_space<vmem>>, vector<1x128xf32>
    tpu.vector_store %arg10[%c7_833, %c0_834], %924 {strides = array<i32>} : memref<16x128xf32, #tpu.memory_space<vmem>>, vector<1x128xf32>,
    %c120 = arith.constant 120 : index
    %926 = memref.load %arg0[%c120] : memref<128xi32, #tpu.memory_space<smem>>
    %927 = arith.index_cast %926 : i32 to index
    %c0_835 = arith.constant 0 : index
    %928 = vector.load %arg2[%927, %c0_835] : memref<64x128xf32, #tpu.memory_space<vmem>>, vector<1x128xf32>
    %c8_836 = arith.constant 8 : index
    %c0_837 = arith.constant 0 : index
    %929 = vector.load %arg9[%c8_836, %c0_837] : memref<16x128xf32, #tpu.memory_space<vmem>>, vector<1x128xf32>
    tpu.vector_store %arg9[%c8_836, %c0_837], %928 {strides = array<i32>} : memref<16x128xf32, #tpu.memory_space<vmem>>, vector<1x128xf32>,
    %930 = arith.index_cast %926 : i32 to index
    %c0_838 = arith.constant 0 : index
    %931 = vector.load %arg3[%930, %c0_838] : memref<64x128xf32, #tpu.memory_space<vmem>>, vector<1x128xf32>
    %c8_839 = arith.constant 8 : index
    %c0_840 = arith.constant 0 : index
    %932 = vector.load %arg10[%c8_839, %c0_840] : memref<16x128xf32, #tpu.memory_space<vmem>>, vector<1x128xf32>
    tpu.vector_store %arg10[%c8_839, %c0_840], %931 {strides = array<i32>} : memref<16x128xf32, #tpu.memory_space<vmem>>, vector<1x128xf32>,
    %c121 = arith.constant 121 : index
    %933 = memref.load %arg0[%c121] : memref<128xi32, #tpu.memory_space<smem>>
    %934 = arith.index_cast %933 : i32 to index
    %c0_841 = arith.constant 0 : index
    %935 = vector.load %arg2[%934, %c0_841] : memref<64x128xf32, #tpu.memory_space<vmem>>, vector<1x128xf32>
    %c9_842 = arith.constant 9 : index
    %c0_843 = arith.constant 0 : index
    %936 = vector.load %arg9[%c9_842, %c0_843] : memref<16x128xf32, #tpu.memory_space<vmem>>, vector<1x128xf32>
    tpu.vector_store %arg9[%c9_842, %c0_843], %935 {strides = array<i32>} : memref<16x128xf32, #tpu.memory_space<vmem>>, vector<1x128xf32>,
    %937 = arith.index_cast %933 : i32 to index
    %c0_844 = arith.constant 0 : index
    %938 = vector.load %arg3[%937, %c0_844] : memref<64x128xf32, #tpu.memory_space<vmem>>, vector<1x128xf32>
    %c9_845 = arith.constant 9 : index
    %c0_846 = arith.constant 0 : index
    %939 = vector.load %arg10[%c9_845, %c0_846] : memref<16x128xf32, #tpu.memory_space<vmem>>, vector<1x128xf32>
    tpu.vector_store %arg10[%c9_845, %c0_846], %938 {strides = array<i32>} : memref<16x128xf32, #tpu.memory_space<vmem>>, vector<1x128xf32>,
    %c122 = arith.constant 122 : index
    %940 = memref.load %arg0[%c122] : memref<128xi32, #tpu.memory_space<smem>>
    %941 = arith.index_cast %940 : i32 to index
    %c0_847 = arith.constant 0 : index
    %942 = vector.load %arg2[%941, %c0_847] : memref<64x128xf32, #tpu.memory_space<vmem>>, vector<1x128xf32>
    %c10_848 = arith.constant 10 : index
    %c0_849 = arith.constant 0 : index
    %943 = vector.load %arg9[%c10_848, %c0_849] : memref<16x128xf32, #tpu.memory_space<vmem>>, vector<1x128xf32>
    tpu.vector_store %arg9[%c10_848, %c0_849], %942 {strides = array<i32>} : memref<16x128xf32, #tpu.memory_space<vmem>>, vector<1x128xf32>,
    %944 = arith.index_cast %940 : i32 to index
    %c0_850 = arith.constant 0 : index
    %945 = vector.load %arg3[%944, %c0_850] : memref<64x128xf32, #tpu.memory_space<vmem>>, vector<1x128xf32>
    %c10_851 = arith.constant 10 : index
    %c0_852 = arith.constant 0 : index
    %946 = vector.load %arg10[%c10_851, %c0_852] : memref<16x128xf32, #tpu.memory_space<vmem>>, vector<1x128xf32>
    tpu.vector_store %arg10[%c10_851, %c0_852], %945 {strides = array<i32>} : memref<16x128xf32, #tpu.memory_space<vmem>>, vector<1x128xf32>,
    %c123 = arith.constant 123 : index
    %947 = memref.load %arg0[%c123] : memref<128xi32, #tpu.memory_space<smem>>
    %948 = arith.index_cast %947 : i32 to index
    %c0_853 = arith.constant 0 : index
    %949 = vector.load %arg2[%948, %c0_853] : memref<64x128xf32, #tpu.memory_space<vmem>>, vector<1x128xf32>
    %c11_854 = arith.constant 11 : index
    %c0_855 = arith.constant 0 : index
    %950 = vector.load %arg9[%c11_854, %c0_855] : memref<16x128xf32, #tpu.memory_space<vmem>>, vector<1x128xf32>
    tpu.vector_store %arg9[%c11_854, %c0_855], %949 {strides = array<i32>} : memref<16x128xf32, #tpu.memory_space<vmem>>, vector<1x128xf32>,
    %951 = arith.index_cast %947 : i32 to index
    %c0_856 = arith.constant 0 : index
    %952 = vector.load %arg3[%951, %c0_856] : memref<64x128xf32, #tpu.memory_space<vmem>>, vector<1x128xf32>
    %c11_857 = arith.constant 11 : index
    %c0_858 = arith.constant 0 : index
    %953 = vector.load %arg10[%c11_857, %c0_858] : memref<16x128xf32, #tpu.memory_space<vmem>>, vector<1x128xf32>
    tpu.vector_store %arg10[%c11_857, %c0_858], %952 {strides = array<i32>} : memref<16x128xf32, #tpu.memory_space<vmem>>, vector<1x128xf32>,
    %c124 = arith.constant 124 : index
    %954 = memref.load %arg0[%c124] : memref<128xi32, #tpu.memory_space<smem>>
    %955 = arith.index_cast %954 : i32 to index
    %c0_859 = arith.constant 0 : index
    %956 = vector.load %arg2[%955, %c0_859] : memref<64x128xf32, #tpu.memory_space<vmem>>, vector<1x128xf32>
    %c12_860 = arith.constant 12 : index
    %c0_861 = arith.constant 0 : index
    %957 = vector.load %arg9[%c12_860, %c0_861] : memref<16x128xf32, #tpu.memory_space<vmem>>, vector<1x128xf32>
    tpu.vector_store %arg9[%c12_860, %c0_861], %956 {strides = array<i32>} : memref<16x128xf32, #tpu.memory_space<vmem>>, vector<1x128xf32>,
    %958 = arith.index_cast %954 : i32 to index
    %c0_862 = arith.constant 0 : index
    %959 = vector.load %arg3[%958, %c0_862] : memref<64x128xf32, #tpu.memory_space<vmem>>, vector<1x128xf32>
    %c12_863 = arith.constant 12 : index
    %c0_864 = arith.constant 0 : index
    %960 = vector.load %arg10[%c12_863, %c0_864] : memref<16x128xf32, #tpu.memory_space<vmem>>, vector<1x128xf32>
    tpu.vector_store %arg10[%c12_863, %c0_864], %959 {strides = array<i32>} : memref<16x128xf32, #tpu.memory_space<vmem>>, vector<1x128xf32>,
    %c125 = arith.constant 125 : index
    %961 = memref.load %arg0[%c125] : memref<128xi32, #tpu.memory_space<smem>>
    %962 = arith.index_cast %961 : i32 to index
    %c0_865 = arith.constant 0 : index
    %963 = vector.load %arg2[%962, %c0_865] : memref<64x128xf32, #tpu.memory_space<vmem>>, vector<1x128xf32>
    %c13_866 = arith.constant 13 : index
    %c0_867 = arith.constant 0 : index
    %964 = vector.load %arg9[%c13_866, %c0_867] : memref<16x128xf32, #tpu.memory_space<vmem>>, vector<1x128xf32>
    tpu.vector_store %arg9[%c13_866, %c0_867], %963 {strides = array<i32>} : memref<16x128xf32, #tpu.memory_space<vmem>>, vector<1x128xf32>,
    %965 = arith.index_cast %961 : i32 to index
    %c0_868 = arith.constant 0 : index
    %966 = vector.load %arg3[%965, %c0_868] : memref<64x128xf32, #tpu.memory_space<vmem>>, vector<1x128xf32>
    %c13_869 = arith.constant 13 : index
    %c0_870 = arith.constant 0 : index
    %967 = vector.load %arg10[%c13_869, %c0_870] : memref<16x128xf32, #tpu.memory_space<vmem>>, vector<1x128xf32>
    tpu.vector_store %arg10[%c13_869, %c0_870], %966 {strides = array<i32>} : memref<16x128xf32, #tpu.memory_space<vmem>>, vector<1x128xf32>,
    %c126 = arith.constant 126 : index
    %968 = memref.load %arg0[%c126] : memref<128xi32, #tpu.memory_space<smem>>
    %969 = arith.index_cast %968 : i32 to index
    %c0_871 = arith.constant 0 : index
    %970 = vector.load %arg2[%969, %c0_871] : memref<64x128xf32, #tpu.memory_space<vmem>>, vector<1x128xf32>
    %c14_872 = arith.constant 14 : index
    %c0_873 = arith.constant 0 : index
    %971 = vector.load %arg9[%c14_872, %c0_873] : memref<16x128xf32, #tpu.memory_space<vmem>>, vector<1x128xf32>
    tpu.vector_store %arg9[%c14_872, %c0_873], %970 {strides = array<i32>} : memref<16x128xf32, #tpu.memory_space<vmem>>, vector<1x128xf32>,
    %972 = arith.index_cast %968 : i32 to index
    %c0_874 = arith.constant 0 : index
    %973 = vector.load %arg3[%972, %c0_874] : memref<64x128xf32, #tpu.memory_space<vmem>>, vector<1x128xf32>
    %c14_875 = arith.constant 14 : index
    %c0_876 = arith.constant 0 : index
    %974 = vector.load %arg10[%c14_875, %c0_876] : memref<16x128xf32, #tpu.memory_space<vmem>>, vector<1x128xf32>
    tpu.vector_store %arg10[%c14_875, %c0_876], %973 {strides = array<i32>} : memref<16x128xf32, #tpu.memory_space<vmem>>, vector<1x128xf32>,
    %c127 = arith.constant 127 : index
    %975 = memref.load %arg0[%c127] : memref<128xi32, #tpu.memory_space<smem>>
    %976 = arith.index_cast %975 : i32 to index
    %c0_877 = arith.constant 0 : index
    %977 = vector.load %arg2[%976, %c0_877] : memref<64x128xf32, #tpu.memory_space<vmem>>, vector<1x128xf32>
    %c15_878 = arith.constant 15 : index
    %c0_879 = arith.constant 0 : index
    %978 = vector.load %arg9[%c15_878, %c0_879] : memref<16x128xf32, #tpu.memory_space<vmem>>, vector<1x128xf32>
    tpu.vector_store %arg9[%c15_878, %c0_879], %977 {strides = array<i32>} : memref<16x128xf32, #tpu.memory_space<vmem>>, vector<1x128xf32>,
    %979 = arith.index_cast %975 : i32 to index
    %c0_880 = arith.constant 0 : index
    %980 = vector.load %arg3[%979, %c0_880] : memref<64x128xf32, #tpu.memory_space<vmem>>, vector<1x128xf32>
    %c15_881 = arith.constant 15 : index
    %c0_882 = arith.constant 0 : index
    %981 = vector.load %arg10[%c15_881, %c0_882] : memref<16x128xf32, #tpu.memory_space<vmem>>, vector<1x128xf32>
    tpu.vector_store %arg10[%c15_881, %c0_882], %980 {strides = array<i32>} : memref<16x128xf32, #tpu.memory_space<vmem>>, vector<1x128xf32>,
    %c0_883 = arith.constant 0 : index
    %c0_884 = arith.constant 0 : index
    %982 = vector.load %arg9[%c0_883, %c0_884] : memref<16x128xf32, #tpu.memory_space<vmem>>, vector<16x128xf32>
    %cst_885 = arith.constant dense<0.000000e+00> : vector<1x16xf32>
    %983 = tpu.matmul %868, %982, %cst_885 {dimension_numbers = #tpu.dot_dimension_numbers<[1], [1], [0], [0], [0, 0, 1, 0], [], []>} : vector<1x128xf32>, vector<16x128xf32>, vector<1x16xf32> -> vector<1x16xf32>
    %cst_886 = arith.constant 14.2857141 : f32
    %984 = vector.broadcast %cst_886 : f32 to vector<1x16xf32>
    %985 = arith.mulf %983, %984 : vector<1x16xf32>
    %c0_887 = arith.constant 0 : index
    %c0_888 = arith.constant 0 : index
    %986 = vector.load %arg10[%c0_887, %c0_888] : memref<16x128xf32, #tpu.memory_space<vmem>>, vector<16x128xf32>
    %cst_889 = arith.constant dense<0.000000e+00> : vector<1x16xf32>
    %987 = tpu.matmul %869, %986, %cst_889 {dimension_numbers = #tpu.dot_dimension_numbers<[1], [1], [0], [0], [0, 0, 1, 0], [], []>} : vector<1x128xf32>, vector<16x128xf32>, vector<1x16xf32> -> vector<1x16xf32>
    %cst_890 = arith.constant 14.2857141 : f32
    %988 = vector.broadcast %cst_890 : f32 to vector<1x16xf32>
    %989 = arith.mulf %987, %988 : vector<1x16xf32>
    %c7_891 = arith.constant 7 : index
    %c0_892 = arith.constant 0 : index
    %990 = vector.load %arg11[%c7_891, %c0_892] : memref<8x16xf32, #tpu.memory_space<vmem>>, vector<1x16xf32>
    tpu.vector_store %arg11[%c7_891, %c0_892], %985 {strides = array<i32>} : memref<8x16xf32, #tpu.memory_space<vmem>>, vector<1x16xf32>,
    %c7_893 = arith.constant 7 : index
    %c0_894 = arith.constant 0 : index
    %991 = vector.load %arg12[%c7_893, %c0_894] : memref<8x16xf32, #tpu.memory_space<vmem>>, vector<1x16xf32>
    tpu.vector_store %arg12[%c7_893, %c0_894], %989 {strides = array<i32>} : memref<8x16xf32, #tpu.memory_space<vmem>>, vector<1x16xf32>,
    %c0_895 = arith.constant 0 : index
    %c0_896 = arith.constant 0 : index
    %992 = vector.load %arg11[%c0_895, %c0_896] : memref<8x16xf32, #tpu.memory_space<vmem>>, vector<8x16xf32>
    %cst_897 = arith.constant dense<0xFF800000> : vector<8xf32>
    %993 = vector.multi_reduction <maximumf>, %992, %cst_897 [1] : vector<8x16xf32> to vector<8xf32>
    %994 = vector.shape_cast %993 : vector<8xf32> to vector<8x1xf32>
    %cst_898 = arith.constant dense<0xFF800000> : vector<1xf32>
    %995 = vector.multi_reduction <maximumf>, %994, %cst_898 [0] : vector<8x1xf32> to vector<1xf32>
    %996 = vector.shape_cast %995 : vector<1xf32> to vector<1x1xf32>
    %997 = vector.broadcast %996 : vector<1x1xf32> to vector<8x16xf32>
    %998 = arith.subf %992, %997 : vector<8x16xf32>
    %999 = math.exp %998 : vector<8x16xf32>
    %cst_899 = arith.constant dense<0.000000e+00> : vector<8xf32>
    %1000 = vector.multi_reduction <add>, %999, %cst_899 [1] : vector<8x16xf32> to vector<8xf32>
    %1001 = vector.shape_cast %1000 : vector<8xf32> to vector<8x1xf32>
    %cst_900 = arith.constant dense<0.000000e+00> : vector<1xf32>
    %1002 = vector.multi_reduction <add>, %1001, %cst_900 [0] : vector<8x1xf32> to vector<1xf32>
    %1003 = vector.shape_cast %1002 : vector<1xf32> to vector<1x1xf32>
    %cst_901 = arith.constant 2.000000e+00 : f32
    %1004 = vector.broadcast %cst_901 : f32 to vector<1x1xf32>
    %1005 = arith.divf %1004, %1003 : vector<1x1xf32>
    %1006 = vector.broadcast %1005 : vector<1x1xf32> to vector<8x16xf32>
    %1007 = arith.mulf %999, %1006 : vector<8x16xf32>
    %1008 = vector.extract_strided_slice %1007 {offsets = [0, 0], sizes = [8, 1], strides = [1, 1]} : vector<8x16xf32> to vector<8x1xf32>
    %1009 = math.log %1008 : vector<8x1xf32>
    %cst_902 = arith.constant dense<0.000000e+00> : vector<1xf32>
    %1010 = vector.multi_reduction <add>, %1009, %cst_902 [0] : vector<8x1xf32> to vector<1xf32>
    %1011 = vector.shape_cast %1010 : vector<1xf32> to vector<1x1xf32>
    %cst_903 = arith.constant 0.234375104 : f32
    %1012 = vector.broadcast %cst_903 : f32 to vector<8x16xf32>
    %1013 = arith.addf %1007, %1012 : vector<8x16xf32>
    %1014 = math.log %1013 : vector<8x16xf32>
    %cst_904 = arith.constant dense<0.000000e+00> : vector<8xf32>
    %1015 = vector.multi_reduction <add>, %1014, %cst_904 [1] : vector<8x16xf32> to vector<8xf32>
    %1016 = vector.shape_cast %1015 : vector<8xf32> to vector<8x1xf32>
    %cst_905 = arith.constant dense<0.000000e+00> : vector<1xf32>
    %1017 = vector.multi_reduction <add>, %1016, %cst_905 [0] : vector<8x1xf32> to vector<1xf32>
    %1018 = vector.shape_cast %1017 : vector<1xf32> to vector<1x1xf32>
    %1019 = arith.subf %1011, %1018 : vector<1x1xf32>
    %cst_906 = arith.constant -174.099945 : f32
    %1020 = vector.broadcast %cst_906 : f32 to vector<1x1xf32>
    %1021 = arith.addf %1019, %1020 : vector<1x1xf32>
    %c0_907 = arith.constant 0 : index
    %c0_908 = arith.constant 0 : index
    %1022 = vector.load %arg12[%c0_907, %c0_908] : memref<8x16xf32, #tpu.memory_space<vmem>>, vector<8x16xf32>
    %cst_909 = arith.constant dense<0xFF800000> : vector<8xf32>
    %1023 = vector.multi_reduction <maximumf>, %1022, %cst_909 [1] : vector<8x16xf32> to vector<8xf32>
    %1024 = vector.shape_cast %1023 : vector<8xf32> to vector<8x1xf32>
    %cst_910 = arith.constant dense<0xFF800000> : vector<1xf32>
    %1025 = vector.multi_reduction <maximumf>, %1024, %cst_910 [0] : vector<8x1xf32> to vector<1xf32>
    %1026 = vector.shape_cast %1025 : vector<1xf32> to vector<1x1xf32>
    %1027 = vector.broadcast %1026 : vector<1x1xf32> to vector<8x16xf32>
    %1028 = arith.subf %1022, %1027 : vector<8x16xf32>
    %1029 = math.exp %1028 : vector<8x16xf32>
    %cst_911 = arith.constant dense<0.000000e+00> : vector<8xf32>
    %1030 = vector.multi_reduction <add>, %1029, %cst_911 [1] : vector<8x16xf32> to vector<8xf32>
    %1031 = vector.shape_cast %1030 : vector<8xf32> to vector<8x1xf32>
    %cst_912 = arith.constant dense<0.000000e+00> : vector<1xf32>
    %1032 = vector.multi_reduction <add>, %1031, %cst_912 [0] : vector<8x1xf32> to vector<1xf32>
    %1033 = vector.shape_cast %1032 : vector<1xf32> to vector<1x1xf32>
    %cst_913 = arith.constant 2.000000e+00 : f32
    %1034 = vector.broadcast %cst_913 : f32 to vector<1x1xf32>
    %1035 = arith.divf %1034, %1033 : vector<1x1xf32>
    %1036 = vector.broadcast %1035 : vector<1x1xf32> to vector<8x16xf32>
    %1037 = arith.mulf %1029, %1036 : vector<8x16xf32>
    %1038 = vector.extract_strided_slice %1037 {offsets = [0, 0], sizes = [8, 1], strides = [1, 1]} : vector<8x16xf32> to vector<8x1xf32>
    %1039 = math.log %1038 : vector<8x1xf32>
    %cst_914 = arith.constant dense<0.000000e+00> : vector<1xf32>
    %1040 = vector.multi_reduction <add>, %1039, %cst_914 [0] : vector<8x1xf32> to vector<1xf32>
    %1041 = vector.shape_cast %1040 : vector<1xf32> to vector<1x1xf32>
    %cst_915 = arith.constant 0.234375104 : f32
    %1042 = vector.broadcast %cst_915 : f32 to vector<8x16xf32>
    %1043 = arith.addf %1037, %1042 : vector<8x16xf32>
    %1044 = math.log %1043 : vector<8x16xf32>
    %cst_916 = arith.constant dense<0.000000e+00> : vector<8xf32>
    %1045 = vector.multi_reduction <add>, %1044, %cst_916 [1] : vector<8x16xf32> to vector<8xf32>
    %1046 = vector.shape_cast %1045 : vector<8xf32> to vector<8x1xf32>
    %cst_917 = arith.constant dense<0.000000e+00> : vector<1xf32>
    %1047 = vector.multi_reduction <add>, %1046, %cst_917 [0] : vector<8x1xf32> to vector<1xf32>
    %1048 = vector.shape_cast %1047 : vector<1xf32> to vector<1x1xf32>
    %1049 = arith.subf %1041, %1048 : vector<1x1xf32>
    %cst_918 = arith.constant -174.099945 : f32
    %1050 = vector.broadcast %cst_918 : f32 to vector<1x1xf32>
    %1051 = arith.addf %1049, %1050 : vector<1x1xf32>
    %1052 = arith.addf %1021, %1051 : vector<1x1xf32>
    %cst_919 = arith.constant 0.000000e+00 : f32
    %1053 = vector.broadcast %cst_919 : f32 to vector<1x1xf32>
    %1054 = arith.subf %1053, %1052 : vector<1x1xf32>
    %cst_920 = arith.constant 1.250000e-01 : f32
    %1055 = vector.broadcast %cst_920 : f32 to vector<1x1xf32>
    %1056 = arith.mulf %1054, %1055 : vector<1x1xf32>
    %c0_921 = arith.constant 0 : index
    %c0_922 = arith.constant 0 : index
    %1057 = vector.load %arg6[%c0_921, %c0_922] : memref<1x1xf32, #tpu.memory_space<vmem>>, vector<1x1xf32>
    tpu.vector_store %arg6[%c0_921, %c0_922], %1056 {strides = array<i32>} : memref<1x1xf32, #tpu.memory_space<vmem>>, vector<1x1xf32>,
    %c0_923 = arith.constant 0 : index
    %1058 = memref.load %arg1[%c0_923] : memref<8xi32, #tpu.memory_space<smem>>
    %1059 = arith.index_cast %1058 : i32 to index
    %c0_924 = arith.constant 0 : index
    %1060 = vector.load %arg3[%1059, %c0_924] : memref<64x128xf32, #tpu.memory_space<vmem>>, vector<1x128xf32>
    %c0_925 = arith.constant 0 : index
    %c0_926 = arith.constant 0 : index
    %1061 = vector.load %arg7[%c0_925, %c0_926] : memref<8x128xf32, #tpu.memory_space<vmem>>, vector<1x128xf32>
    tpu.vector_store %arg7[%c0_925, %c0_926], %1060 {strides = array<i32>} : memref<8x128xf32, #tpu.memory_space<vmem>>, vector<1x128xf32>,
    %1062 = arith.index_cast %1058 : i32 to index
    %c0_927 = arith.constant 0 : index
    %1063 = vector.load %arg2[%1062, %c0_927] : memref<64x128xf32, #tpu.memory_space<vmem>>, vector<1x128xf32>
    %c0_928 = arith.constant 0 : index
    %c0_929 = arith.constant 0 : index
    %1064 = vector.load %arg8[%c0_928, %c0_929] : memref<8x128xf32, #tpu.memory_space<vmem>>, vector<1x128xf32>
    tpu.vector_store %arg8[%c0_928, %c0_929], %1063 {strides = array<i32>} : memref<8x128xf32, #tpu.memory_space<vmem>>, vector<1x128xf32>,
    %c1_930 = arith.constant 1 : index
    %1065 = memref.load %arg1[%c1_930] : memref<8xi32, #tpu.memory_space<smem>>
    %1066 = arith.index_cast %1065 : i32 to index
    %c0_931 = arith.constant 0 : index
    %1067 = vector.load %arg3[%1066, %c0_931] : memref<64x128xf32, #tpu.memory_space<vmem>>, vector<1x128xf32>
    %c1_932 = arith.constant 1 : index
    %c0_933 = arith.constant 0 : index
    %1068 = vector.load %arg7[%c1_932, %c0_933] : memref<8x128xf32, #tpu.memory_space<vmem>>, vector<1x128xf32>
    tpu.vector_store %arg7[%c1_932, %c0_933], %1067 {strides = array<i32>} : memref<8x128xf32, #tpu.memory_space<vmem>>, vector<1x128xf32>,
    %1069 = arith.index_cast %1065 : i32 to index
    %c0_934 = arith.constant 0 : index
    %1070 = vector.load %arg2[%1069, %c0_934] : memref<64x128xf32, #tpu.memory_space<vmem>>, vector<1x128xf32>
    %c1_935 = arith.constant 1 : index
    %c0_936 = arith.constant 0 : index
    %1071 = vector.load %arg8[%c1_935, %c0_936] : memref<8x128xf32, #tpu.memory_space<vmem>>, vector<1x128xf32>
    tpu.vector_store %arg8[%c1_935, %c0_936], %1070 {strides = array<i32>} : memref<8x128xf32, #tpu.memory_space<vmem>>, vector<1x128xf32>,
    %c2_937 = arith.constant 2 : index
    %1072 = memref.load %arg1[%c2_937] : memref<8xi32, #tpu.memory_space<smem>>
    %1073 = arith.index_cast %1072 : i32 to index
    %c0_938 = arith.constant 0 : index
    %1074 = vector.load %arg3[%1073, %c0_938] : memref<64x128xf32, #tpu.memory_space<vmem>>, vector<1x128xf32>
    %c2_939 = arith.constant 2 : index
    %c0_940 = arith.constant 0 : index
    %1075 = vector.load %arg7[%c2_939, %c0_940] : memref<8x128xf32, #tpu.memory_space<vmem>>, vector<1x128xf32>
    tpu.vector_store %arg7[%c2_939, %c0_940], %1074 {strides = array<i32>} : memref<8x128xf32, #tpu.memory_space<vmem>>, vector<1x128xf32>,
    %1076 = arith.index_cast %1072 : i32 to index
    %c0_941 = arith.constant 0 : index
    %1077 = vector.load %arg2[%1076, %c0_941] : memref<64x128xf32, #tpu.memory_space<vmem>>, vector<1x128xf32>
    %c2_942 = arith.constant 2 : index
    %c0_943 = arith.constant 0 : index
    %1078 = vector.load %arg8[%c2_942, %c0_943] : memref<8x128xf32, #tpu.memory_space<vmem>>, vector<1x128xf32>
    tpu.vector_store %arg8[%c2_942, %c0_943], %1077 {strides = array<i32>} : memref<8x128xf32, #tpu.memory_space<vmem>>, vector<1x128xf32>,
    %c3_944 = arith.constant 3 : index
    %1079 = memref.load %arg1[%c3_944] : memref<8xi32, #tpu.memory_space<smem>>
    %1080 = arith.index_cast %1079 : i32 to index
    %c0_945 = arith.constant 0 : index
    %1081 = vector.load %arg3[%1080, %c0_945] : memref<64x128xf32, #tpu.memory_space<vmem>>, vector<1x128xf32>
    %c3_946 = arith.constant 3 : index
    %c0_947 = arith.constant 0 : index
    %1082 = vector.load %arg7[%c3_946, %c0_947] : memref<8x128xf32, #tpu.memory_space<vmem>>, vector<1x128xf32>
    tpu.vector_store %arg7[%c3_946, %c0_947], %1081 {strides = array<i32>} : memref<8x128xf32, #tpu.memory_space<vmem>>, vector<1x128xf32>,
    %1083 = arith.index_cast %1079 : i32 to index
    %c0_948 = arith.constant 0 : index
    %1084 = vector.load %arg2[%1083, %c0_948] : memref<64x128xf32, #tpu.memory_space<vmem>>, vector<1x128xf32>
    %c3_949 = arith.constant 3 : index
    %c0_950 = arith.constant 0 : index
    %1085 = vector.load %arg8[%c3_949, %c0_950] : memref<8x128xf32, #tpu.memory_space<vmem>>, vector<1x128xf32>
    tpu.vector_store %arg8[%c3_949, %c0_950], %1084 {strides = array<i32>} : memref<8x128xf32, #tpu.memory_space<vmem>>, vector<1x128xf32>,
    %c4_951 = arith.constant 4 : index
    %1086 = memref.load %arg1[%c4_951] : memref<8xi32, #tpu.memory_space<smem>>
    %1087 = arith.index_cast %1086 : i32 to index
    %c0_952 = arith.constant 0 : index
    %1088 = vector.load %arg3[%1087, %c0_952] : memref<64x128xf32, #tpu.memory_space<vmem>>, vector<1x128xf32>
    %c4_953 = arith.constant 4 : index
    %c0_954 = arith.constant 0 : index
    %1089 = vector.load %arg7[%c4_953, %c0_954] : memref<8x128xf32, #tpu.memory_space<vmem>>, vector<1x128xf32>
    tpu.vector_store %arg7[%c4_953, %c0_954], %1088 {strides = array<i32>} : memref<8x128xf32, #tpu.memory_space<vmem>>, vector<1x128xf32>,
    %1090 = arith.index_cast %1086 : i32 to index
    %c0_955 = arith.constant 0 : index
    %1091 = vector.load %arg2[%1090, %c0_955] : memref<64x128xf32, #tpu.memory_space<vmem>>, vector<1x128xf32>
    %c4_956 = arith.constant 4 : index
    %c0_957 = arith.constant 0 : index
    %1092 = vector.load %arg8[%c4_956, %c0_957] : memref<8x128xf32, #tpu.memory_space<vmem>>, vector<1x128xf32>
    tpu.vector_store %arg8[%c4_956, %c0_957], %1091 {strides = array<i32>} : memref<8x128xf32, #tpu.memory_space<vmem>>, vector<1x128xf32>,
    %c5_958 = arith.constant 5 : index
    %1093 = memref.load %arg1[%c5_958] : memref<8xi32, #tpu.memory_space<smem>>
    %1094 = arith.index_cast %1093 : i32 to index
    %c0_959 = arith.constant 0 : index
    %1095 = vector.load %arg3[%1094, %c0_959] : memref<64x128xf32, #tpu.memory_space<vmem>>, vector<1x128xf32>
    %c5_960 = arith.constant 5 : index
    %c0_961 = arith.constant 0 : index
    %1096 = vector.load %arg7[%c5_960, %c0_961] : memref<8x128xf32, #tpu.memory_space<vmem>>, vector<1x128xf32>
    tpu.vector_store %arg7[%c5_960, %c0_961], %1095 {strides = array<i32>} : memref<8x128xf32, #tpu.memory_space<vmem>>, vector<1x128xf32>,
    %1097 = arith.index_cast %1093 : i32 to index
    %c0_962 = arith.constant 0 : index
    %1098 = vector.load %arg2[%1097, %c0_962] : memref<64x128xf32, #tpu.memory_space<vmem>>, vector<1x128xf32>
    %c5_963 = arith.constant 5 : index
    %c0_964 = arith.constant 0 : index
    %1099 = vector.load %arg8[%c5_963, %c0_964] : memref<8x128xf32, #tpu.memory_space<vmem>>, vector<1x128xf32>
    tpu.vector_store %arg8[%c5_963, %c0_964], %1098 {strides = array<i32>} : memref<8x128xf32, #tpu.memory_space<vmem>>, vector<1x128xf32>,
    %c6_965 = arith.constant 6 : index
    %1100 = memref.load %arg1[%c6_965] : memref<8xi32, #tpu.memory_space<smem>>
    %1101 = arith.index_cast %1100 : i32 to index
    %c0_966 = arith.constant 0 : index
    %1102 = vector.load %arg3[%1101, %c0_966] : memref<64x128xf32, #tpu.memory_space<vmem>>, vector<1x128xf32>
    %c6_967 = arith.constant 6 : index
    %c0_968 = arith.constant 0 : index
    %1103 = vector.load %arg7[%c6_967, %c0_968] : memref<8x128xf32, #tpu.memory_space<vmem>>, vector<1x128xf32>
    tpu.vector_store %arg7[%c6_967, %c0_968], %1102 {strides = array<i32>} : memref<8x128xf32, #tpu.memory_space<vmem>>, vector<1x128xf32>,
    %1104 = arith.index_cast %1100 : i32 to index
    %c0_969 = arith.constant 0 : index
    %1105 = vector.load %arg2[%1104, %c0_969] : memref<64x128xf32, #tpu.memory_space<vmem>>, vector<1x128xf32>
    %c6_970 = arith.constant 6 : index
    %c0_971 = arith.constant 0 : index
    %1106 = vector.load %arg8[%c6_970, %c0_971] : memref<8x128xf32, #tpu.memory_space<vmem>>, vector<1x128xf32>
    tpu.vector_store %arg8[%c6_970, %c0_971], %1105 {strides = array<i32>} : memref<8x128xf32, #tpu.memory_space<vmem>>, vector<1x128xf32>,
    %c7_972 = arith.constant 7 : index
    %1107 = memref.load %arg1[%c7_972] : memref<8xi32, #tpu.memory_space<smem>>
    %1108 = arith.index_cast %1107 : i32 to index
    %c0_973 = arith.constant 0 : index
    %1109 = vector.load %arg3[%1108, %c0_973] : memref<64x128xf32, #tpu.memory_space<vmem>>, vector<1x128xf32>
    %c7_974 = arith.constant 7 : index
    %c0_975 = arith.constant 0 : index
    %1110 = vector.load %arg7[%c7_974, %c0_975] : memref<8x128xf32, #tpu.memory_space<vmem>>, vector<1x128xf32>
    tpu.vector_store %arg7[%c7_974, %c0_975], %1109 {strides = array<i32>} : memref<8x128xf32, #tpu.memory_space<vmem>>, vector<1x128xf32>,
    %1111 = arith.index_cast %1107 : i32 to index
    %c0_976 = arith.constant 0 : index
    %1112 = vector.load %arg2[%1111, %c0_976] : memref<64x128xf32, #tpu.memory_space<vmem>>, vector<1x128xf32>
    %c7_977 = arith.constant 7 : index
    %c0_978 = arith.constant 0 : index
    %1113 = vector.load %arg8[%c7_977, %c0_978] : memref<8x128xf32, #tpu.memory_space<vmem>>, vector<1x128xf32>
    tpu.vector_store %arg8[%c7_977, %c0_978], %1112 {strides = array<i32>} : memref<8x128xf32, #tpu.memory_space<vmem>>, vector<1x128xf32>,
    %c0_979 = arith.constant 0 : index
    %c0_980 = arith.constant 0 : index
    %1114 = vector.load %arg7[%c0_979, %c0_980] : memref<8x128xf32, #tpu.memory_space<vmem>>, vector<8x128xf32>
    %cst_981 = arith.constant 5.000000e-01 : f32
    %1115 = vector.broadcast %cst_981 : f32 to vector<8x128xf32>
    %1116 = arith.mulf %1114, %1115 : vector<8x128xf32>
    %c0_982 = arith.constant 0 : index
    %c0_983 = arith.constant 0 : index
    %1117 = vector.load %arg4[%c0_982, %c0_983] : memref<8x128xf32, #tpu.memory_space<vmem>>, vector<8x128xf32>
    %cst_984 = arith.constant 5.000000e-01 : f32
    %1118 = vector.broadcast %cst_984 : f32 to vector<8x128xf32>
    %1119 = arith.mulf %1117, %1118 : vector<8x128xf32>
    %1120 = arith.addf %1116, %1119 : vector<8x128xf32>
    %c0_985 = arith.constant 0 : index
    %c0_986 = arith.constant 0 : index
    %1121 = vector.load %arg8[%c0_985, %c0_986] : memref<8x128xf32, #tpu.memory_space<vmem>>, vector<8x128xf32>
    %cst_987 = arith.constant 5.000000e-01 : f32
    %1122 = vector.broadcast %cst_987 : f32 to vector<8x128xf32>
    %1123 = arith.mulf %1121, %1122 : vector<8x128xf32>
    %c0_988 = arith.constant 0 : index
    %c0_989 = arith.constant 0 : index
    %1124 = vector.load %arg5[%c0_988, %c0_989] : memref<8x128xf32, #tpu.memory_space<vmem>>, vector<8x128xf32>
    %cst_990 = arith.constant 5.000000e-01 : f32
    %1125 = vector.broadcast %cst_990 : f32 to vector<8x128xf32>
    %1126 = arith.mulf %1124, %1125 : vector<8x128xf32>
    %1127 = arith.addf %1123, %1126 : vector<8x128xf32>
    %1128 = arith.mulf %1120, %1120 : vector<8x128xf32>
    %cst_991 = arith.constant dense<0.000000e+00> : vector<8xf32>
    %1129 = vector.multi_reduction <add>, %1128, %cst_991 [1] : vector<8x128xf32> to vector<8xf32>
    %1130 = vector.shape_cast %1129 : vector<8xf32> to vector<8x1xf32>
    %1131 = math.rsqrt %1130 : vector<8x1xf32>
    %1132 = vector.broadcast %1131 : vector<8x1xf32> to vector<8x128xf32>
    %1133 = arith.mulf %1120, %1132 : vector<8x128xf32>
    %c0_992 = arith.constant 0 : index
    %c0_993 = arith.constant 0 : index
    %1134 = vector.load %arg7[%c0_992, %c0_993] : memref<8x128xf32, #tpu.memory_space<vmem>>, vector<8x128xf32>
    tpu.vector_store %arg7[%c0_992, %c0_993], %1133 {strides = array<i32>} : memref<8x128xf32, #tpu.memory_space<vmem>>, vector<8x128xf32>,
    %1135 = arith.mulf %1127, %1127 : vector<8x128xf32>
    %cst_994 = arith.constant dense<0.000000e+00> : vector<8xf32>
    %1136 = vector.multi_reduction <add>, %1135, %cst_994 [1] : vector<8x128xf32> to vector<8xf32>
    %1137 = vector.shape_cast %1136 : vector<8xf32> to vector<8x1xf32>
    %1138 = math.rsqrt %1137 : vector<8x1xf32>
    %1139 = vector.broadcast %1138 : vector<8x1xf32> to vector<8x128xf32>
    %1140 = arith.mulf %1127, %1139 : vector<8x128xf32>
    %c0_995 = arith.constant 0 : index
    %c0_996 = arith.constant 0 : index
    %1141 = vector.load %arg8[%c0_995, %c0_996] : memref<8x128xf32, #tpu.memory_space<vmem>>, vector<8x128xf32>
    tpu.vector_store %arg8[%c0_995, %c0_996], %1140 {strides = array<i32>} : memref<8x128xf32, #tpu.memory_space<vmem>>, vector<8x128xf32>,
    return
  }
}

</mosaic_0001>

<bundles_post_ra>
// kernel: nce_loss_forward.1
= control target key start
LH: loop header
LB: loop body
LE: loop exit
PB: predicated region body
PF: predicated region fallthrough
CT: control target
= control target key end

     0   :  { %s3654_s0 = inlined_call_operand.vmem [shape: s32[128], index: 0, kind: input, shape index: {}]   ;;  %s3655_s1 = inlined_call_operand.vmem [shape: s32[8], index: 1, kind: input, shape index: {}]   ;;  %s3656_s2 = inlined_call_operand.vmem [shape: f32[64,128], index: 2, kind: input, shape index: {}]   ;;  %s3657_s3 = inlined_call_operand.vmem [shape: f32[64,128], index: 3, kind: input, shape index: {}]   ;;  %s3658_s4 = inlined_call_operand.vmem [shape: f32[8,128], index: 4, kind: input, shape index: {}]   ;;  %s3659_s5 = inlined_call_operand.vmem [shape: f32[8,128], index: 5, kind: input, shape index: {}]   ;;  %s3660_s6 = inlined_call_operand.hbm [shape: f32[1,1], index: 6, kind: output, shape index: {0}]   ;;  %s3661_s7 = inlined_call_operand.vmem [shape: f32[8,128], index: 7, kind: output, shape index: {1}]   ;;  %s3662_s8 = inlined_call_operand.vmem [shape: f32[8,128], index: 8, kind: output, shape index: {2}]  }
   0x1   :  { %3676 = sst [smem:[#allocation19_spill]] %s3658_s4 }
   0x2   :  { %3677 = sst [smem:[#allocation20_spill]] %s3659_s5 }
   0x3   :  { %3678 = sst [smem:[#allocation21_spill]] %s3660_s6 }
   0x4   :  { %3679 = sst [smem:[#allocation22_spill]] %s3661_s7 }
   0x5   :  { %3680 = sst [smem:[#allocation23_spill]] %s3662_s8 }
   0x6   :  { %14 = vsyncpa [#allocation8], 0 }
   0x7   :  { %15 = vsyncpa [#allocation10], 0 }
   0x8   :  { %16 = vsyncpa [#allocation7], 0  ;;  %s22_s29 = sshll.u32 %s3654_s0, 4  ;;  %s31_s10 = sshll.u32 %s3655_s1, 4  ;;  %s23_s29 = int_to_ptr.vmem [resolvable:$true] %s22_s29  ;;  %s32_s10 = int_to_ptr.vmem [resolvable:$true] %s31_s10 }
   0x9   :  { %s2083_s11 = smov [#allocation6]   ;;  %s2084_s12 = smov [#allocation9]  }
   0xa   :  { %25 = dma.vmem_to_smem %s23_s29, 16, %s2083_s11, [#allocation8]  }
   0xb   :  { %34 = dma.vmem_to_smem %s32_s10, 16, %s2084_s12, [#allocation10]  }
   0xc   :  { %2077 = dma.done.wait [#allocation8], 16  }
   0xd   :  { %2078 = vsyncadd [#allocation8], 4294967280 }
   0xe   :  { %2079 = dma.done.wait [#allocation10], 16  }
   0xf   :  { %2080 = vsyncadd [#allocation10], 4294967280 }
  0x10   :  { %51 = sfence }
  0x11   :  { %s2137_s13 = sld [smem:[#allocation6 + $0x8]]  ;;  %vm212_vm0 = vcmask 122880   ;;  %vm1350_vm1 = vcmask 130048   ;;  %vm1390_vm13 = vcmask 7168  }
  0x12   :  { %s2139_s14 = sld [smem:[#allocation6 + $0x9]] }
  0x13   :  { %s2141_s0 = sld [smem:[#allocation6 + $0xa]] }
  0x14   :  { %s2143_s1 = sld [smem:[#allocation6 + $0xb]] }
  0x15   :  { %s2145_s15 = sld [smem:[#allocation6 + $0xc]] }
  0x16   :  { %s2147_s16 = sld [smem:[#allocation6 + $0xd]] }
  0x17   :  { %s111_s19 = scalar_lea.vmem %s3656_s2, %s2137_s13  ;;  %s2153_s20 = sld [smem:[#allocation6 + $0xe]] }
  0x18   :  { %v112_v0 = vld [vmem:[%s111_s19] sm:$0x1]  ;;  %s118_s23 = scalar_lea.vmem %s3656_s2, %s2139_s14  ;;  %s2159_s24 = sld [smem:[#allocation6 + $0xf]] }
  0x19   :  { %113 = vst [vmem:[#allocation2 + $0x8] sm:$0x1] %v112_v0  ;;  %v119_v1 = vld [vmem:[%s118_s23] sm:$0x1]  ;;  %s125_s27 = scalar_lea.vmem %s3656_s2, %s2141_s0  ;;  %s2169_s9 = sld [smem:[#allocation6 + $0x18]] }
  0x1a   :  { %120 = vst [vmem:[#allocation2 + $0x9] sm:$0x1] %v119_v1  ;;  %v126_v2 = vld [vmem:[%s125_s27] sm:$0x1]  ;;  %s132_s30 = scalar_lea.vmem %s3656_s2, %s2143_s1  ;;  %s2175_s17 = sld [smem:[#allocation6 + $0x19]] }
  0x1b   :  { %127 = vst [vmem:[#allocation2 + $0xa] sm:$0x1] %v126_v2  ;;  %v133_v3 = vld [vmem:[%s132_s30] sm:$0x1]  ;;  %s139_s12 = scalar_lea.vmem %s3656_s2, %s2145_s15  ;;  %s2181_s22 = sld [smem:[#allocation6 + $0x1a]] }
  0x1c   :  { %134 = vst [vmem:[#allocation2 + $0xb] sm:$0x1] %v133_v3  ;;  %v140_v4 = vld [vmem:[%s139_s12] sm:$0x1]  ;;  %s146_s21 = scalar_lea.vmem %s3656_s2, %s2147_s16  ;;  %s2187_s27 = sld [smem:[#allocation6 + $0x1b]] }
  0x1d   :  { %141 = vst [vmem:[#allocation2 + $0xc] sm:$0x1] %v140_v4  ;;  %v147_v5 = vld [vmem:[%s146_s21] sm:$0x1]  ;;  %s153_s26 = scalar_lea.vmem %s3656_s2, %s2153_s20  ;;  %s2193_s10 = sld [smem:[#allocation6 + $0x1c]] }
  0x1e   :  { %148 = vst [vmem:[#allocation2 + $0xd] sm:$0x1] %v147_v5  ;;  %v154_v6 = vld [vmem:[%s153_s26] sm:$0x1]  ;;  %s160_s30 = scalar_lea.vmem %s3656_s2, %s2159_s24  ;;  %s2195_s11 = sld [smem:[#allocation6 + $0x1d]] }
  0x1f   :  { %155 = vst [vmem:[#allocation2 + $0xe] sm:$0x1] %v154_v6  ;;  %v161_v7 = vld [vmem:[%s160_s30] sm:$0x1]  ;;  %s2197_s12 = sld [smem:[#allocation6 + $0x1e]]  ;;  %s114_s23 = scalar_lea.vmem %s3657_s3, %s2137_s13 }
  0x20   :  { %162 = vst [vmem:[#allocation2 + $0xf] sm:$0x1] %v161_v7  ;;  %s2199_s18 = sld [smem:[#allocation6 + $0x1f]]  ;;  %s274_s28 = scalar_lea.vmem %s3656_s2, %s2169_s9  ;;  %v115_v8 = vld [vmem:[%s114_s23] sm:$0x1] }
  0x21   :  { %s121_s6 = scalar_lea.vmem %s3657_s3, %s2139_s14  ;;  %s281_s5 = scalar_lea.vmem %s3656_s2, %s2175_s17  ;;  %116 = vst [vmem:[#allocation3 + $0x8] sm:$0x1] %v115_v8  ;;  %v275_v11 = vld [vmem:[%s274_s28] sm:$0x1] }
  0x22   :  { %v122_v9 = vld [vmem:[%s121_s6] sm:$0x1]  ;;  %s128_s13 = scalar_lea.vmem %s3657_s3, %s2141_s0  ;;  %s288_s23 = scalar_lea.vmem %s3656_s2, %s2181_s22 }
  0x23   :  { %123 = vst [vmem:[#allocation3 + $0x9] sm:$0x1] %v122_v9  ;;  %v129_v10 = vld [vmem:[%s128_s13] sm:$0x1]  ;;  %s135_s14 = scalar_lea.vmem %s3657_s3, %s2143_s1  ;;  %s295_s6 = scalar_lea.vmem %s3656_s2, %s2187_s27 }
  0x24   :  { %130 = vst [vmem:[#allocation3 + $0xa] sm:$0x1] %v129_v10  ;;  %v136_v12 = vld [vmem:[%s135_s14] sm:$0x1]  ;;  %s142_s30 = scalar_lea.vmem %s3657_s3, %s2145_s15  ;;  %s302_s21 = scalar_lea.vmem %s3656_s2, %s2193_s10 }
  0x25   :  { %v282_v13 = vld [vmem:[%s281_s5] sm:$0x1]  ;;  %137 = vst [vmem:[#allocation3 + $0xb] sm:$0x1] %v136_v12  ;;  %s309_s25 = scalar_lea.vmem %s3656_s2, %s2195_s11  ;;  %s316_s26 = scalar_lea.vmem %s3656_s2, %s2197_s12 }
  0x26   :  { %v143_v14 = vld [vmem:[%s142_s30] sm:$0x1]  ;;  %s323_s7 = scalar_lea.vmem %s3656_s2, %s2199_s18  ;;  %s149_s4 = scalar_lea.vmem %s3657_s3, %s2147_s16 }
  0x27   :  { %v167_v15 = vld [vmem:[#allocation2 + $0x8] sm:$0xff]  ;;  %v289_v16 = vld [vmem:[%s288_s23] sm:$0x1]  ;;  %144 = vst [vmem:[#allocation3 + $0xc] sm:$0x1] %v143_v14  ;;  %s156_s30 = scalar_lea.vmem %s3657_s3, %s2153_s20  ;;  %s2265_s1 = sld [smem:[#allocation6]] }
  0x28   :  { %276 = vst [vmem:[#allocation2 + $0x8] sm:$0x1] %v275_v11  ;;  %v296_v17 = vld [vmem:[%s295_s6] sm:$0x1]  ;;  %182 = vmatpush.xpose.msra.mxu0 %v167_v15  ;;  %s2267_s16 = sld [smem:[#allocation6 + $0x1]]  ;;  %s277_s5 = scalar_lea.vmem %s3657_s3, %s2169_s9 }
  0x29   :  { %283 = vst [vmem:[#allocation2 + $0x9] sm:$0x1] %v282_v13  ;;  %v303_v18 = vld [vmem:[%s302_s21] sm:$0x1]  ;;  %s163_s21 = scalar_lea.vmem %s3657_s3, %s2159_s24  ;;  %s2269_s20 = sld [smem:[#allocation6 + $0x2]] }
  0x2a   :  { %290 = vst [vmem:[#allocation2 + $0xa] sm:$0x1] %v289_v16  ;;  %v310_v19 = vld [vmem:[%s309_s25] sm:$0x1]  ;;  %s2271_s28 = sld [smem:[#allocation6 + $0x3]]  ;;  %s284_s14 = scalar_lea.vmem %s3657_s3, %s2175_s17 }
  0x2b   :  { %297 = vst [vmem:[#allocation2 + $0xb] sm:$0x1] %v296_v17  ;;  %v317_v20 = vld [vmem:[%s316_s26] sm:$0x1]  ;;  %s2273_s24 = sld [smem:[#allocation6 + $0x4]]  ;;  %s291_s26 = scalar_lea.vmem %s3657_s3, %s2181_s22 }
  0x2c   :  { %304 = vst [vmem:[#allocation2 + $0xc] sm:$0x1] %v303_v18  ;;  %v324_v21 = vld [vmem:[%s323_s7] sm:$0x1]  ;;  %s2293_s19 = sld [smem:[#allocation6 + $0x6]]  ;;  %s298_s0 = scalar_lea.vmem %s3657_s3, %s2187_s27 }
  0x2d   :  { %311 = vst [vmem:[#allocation2 + $0xd] sm:$0x1] %v310_v19  ;;  %v150_v22 = vld [vmem:[%s149_s4] sm:$0x1]  ;;  %s55_s8 = scalar_lea.vmem %s3656_s2, %s2265_s1  ;;  %s2287_s4 = sld [smem:[#allocation6 + $0x5]] }
  0x2e   :  { %318 = vst [vmem:[#allocation2 + $0xe] sm:$0x1] %v317_v20  ;;  %v157_v23 = vld [vmem:[%s156_s30] sm:$0x1]  ;;  %s62_s30 = scalar_lea.vmem %s3656_s2, %s2267_s16  ;;  %s305_s25 = scalar_lea.vmem %s3657_s3, %s2193_s10 }
  0x2f   :  { %325 = vst [vmem:[#allocation2 + $0xf] sm:$0x1] %v324_v21  ;;  %v164_v24 = vld [vmem:[%s163_s21] sm:$0x1]  ;;  %s69_s13 = scalar_lea.vmem %s3656_s2, %s2269_s20  ;;  %s2299_s21 = sld [smem:[#allocation6 + $0x7]] }
  0x30   :  { %151 = vst [vmem:[#allocation3 + $0xd] sm:$0x1] %v150_v22  ;;  %v56_v25 = vld [vmem:[%s55_s8] sm:$0x1]  ;;  %s76_s23 = scalar_lea.vmem %s3656_s2, %s2271_s28  ;;  %s312_s15 = scalar_lea.vmem %s3657_s3, %s2195_s11 }
  0x31   :  { %158 = vst [vmem:[#allocation3 + $0xe] sm:$0x1] %v157_v23  ;;  %v63_v26 = vld [vmem:[%s62_s30] sm:$0x1]  ;;  %s83_s22 = scalar_lea.vmem %s3656_s2, %s2273_s24  ;;  %s319_s7 = scalar_lea.vmem %s3657_s3, %s2197_s12 }
  0x32   :  { %165 = vst [vmem:[#allocation3 + $0xf] sm:$0x1] %v164_v24  ;;  %v70_v28 = vld [vmem:[%s69_s13] sm:$0x1]  ;;  %s97_s12 = scalar_lea.vmem %s3656_s2, %s2293_s19  ;;  %s2345_s17 = sld [smem:[#allocation6 + $0x10]] }
  0x33   :  { %57 = vst [vmem:[#allocation2] sm:$0x1] %v56_v25  ;;  %v278_v29 = vld [vmem:[%s277_s5] sm:$0x1]  ;;  %s90_s6 = scalar_lea.vmem %s3656_s2, %s2287_s4  ;;  %s2347_s13 = sld [smem:[#allocation6 + $0x11]] }
  0x34   :  { %64 = vst [vmem:[#allocation2 + $0x1] sm:$0x1] %v63_v26  ;;  %v77_v30 = vld [vmem:[%s76_s23] sm:$0x1]  ;;  %s58_s27 = scalar_lea.vmem %s3657_s3, %s2265_s1  ;;  %s2359_s10 = sld [smem:[#allocation6 + $0x13]] }
  0x35   :  { %71 = vst [vmem:[#allocation2 + $0x2] sm:$0x1] %v70_v28  ;;  %v285_v31 = vld [vmem:[%s284_s14] sm:$0x1]  ;;  %s72_s8 = scalar_lea.vmem %s3657_s3, %s2269_s20  ;;  %s2365_s1 = sld [smem:[#allocation6 + $0x14]] }
  0x36   :  { %v330_v27 = vld [vmem:[#allocation2 + $0x8] sm:$0xff]  ;;  %78 = vst [vmem:[#allocation2 + $0x3] sm:$0x1] %v77_v30  ;;  %v84_v32 = vld [vmem:[%s83_s22] sm:$0x1]  ;;  %s86_s9 = scalar_lea.vmem %s3657_s3, %s2273_s24  ;;  %s2377_s20 = sld [smem:[#allocation6 + $0x16]] }
  0x37   :  { %345 = vmatpush.xpose.msra.mxu2 %v330_v27  ;;  %v292_v34 = vld [vmem:[%s291_s26] sm:$0x1]  ;;  %85 = vst [vmem:[#allocation2 + $0x4] sm:$0x1] %v84_v32  ;;  %s326_s26 = scalar_lea.vmem %s3657_s3, %s2199_s18  ;;  %s104_s18 = scalar_lea.vmem %s3656_s2, %s2299_s21 }
  0x38   :  { %v299_v35 = vld [vmem:[%s298_s0] sm:$0x1]  ;;  %s79_s0 = scalar_lea.vmem %s3657_s3, %s2271_s28  ;;  %s2383_s5 = sld [smem:[#allocation6 + $0x17]] }
  0x39   :  { %v190_v33 = vld [vmem:[#allocation3 + $0x8] sm:$0xff]  ;;  %v306_v36 = vld [vmem:[%s305_s25] sm:$0x1]  ;;  %s93_s25 = scalar_lea.vmem %s3657_s3, %s2287_s4  ;;  %s100_s29 = scalar_lea.vmem %s3657_s3, %s2293_s19 }
  0x3a   :  { %279 = vst [vmem:[#allocation3 + $0x8] sm:$0x1] %v278_v29  ;;  %205 = vmatpush.xpose.msra.mxu1 %v190_v33  ;;  %v313_v37 = vld [vmem:[%s312_s15] sm:$0x1]  ;;  %s2353_s15 = sld [smem:[#allocation6 + $0x12]]  ;;  %s225_s4 = scalar_lea.vmem %s3656_s2, %s2347_s13 }
  0x3b   :  { %286 = vst [vmem:[#allocation3 + $0x9] sm:$0x1] %v285_v31  ;;  %v320_v38 = vld [vmem:[%s319_s7] sm:$0x1]  ;;  %s65_s7 = scalar_lea.vmem %s3657_s3, %s2267_s16  ;;  %s2371_s16 = sld [smem:[#allocation6 + $0x15]] }
  0x3c   :  { %293 = vst [vmem:[#allocation3 + $0xa] sm:$0x1] %v292_v34  ;;  %v327_v39 = vld [vmem:[%s326_s26] sm:$0x1]  ;;  %s239_s30 = scalar_lea.vmem %s3656_s2, %s2359_s10  ;;  %s246_s22 = scalar_lea.vmem %s3656_s2, %s2365_s1 }
  0x3d   :  { %300 = vst [vmem:[#allocation3 + $0xb] sm:$0x1] %v299_v35  ;;  %v91_v40 = vld [vmem:[%s90_s6] sm:$0x1]  ;;  %s260_s24 = scalar_lea.vmem %s3656_s2, %s2377_s20  ;;  %s107_s19 = scalar_lea.vmem %s3657_s3, %s2299_s21 }
  0x3e   :  { %307 = vst [vmem:[#allocation3 + $0xc] sm:$0x1] %v306_v36  ;;  %v98_v41 = vld [vmem:[%s97_s12] sm:$0x1]  ;;  %s2441_s21 = sld [smem:[#allocation6 + $0x2e]]  ;;  %s221_s23 = scalar_lea.vmem %s3657_s3, %s2345_s17 }
  0x3f   :  { %314 = vst [vmem:[#allocation3 + $0xd] sm:$0x1] %v313_v37  ;;  %v105_v42 = vld [vmem:[%s104_s18] sm:$0x1]  ;;  %s2409_s18 = sld [smem:[#allocation6 + $0x28]]  ;;  %s228_s12 = scalar_lea.vmem %s3657_s3, %s2347_s13 }
  0x40   :  { %321 = vst [vmem:[#allocation3 + $0xe] sm:$0x1] %v320_v38  ;;  %v59_v43 = vld [vmem:[%s58_s27] sm:$0x1]  ;;  %s232_s6 = scalar_lea.vmem %s3656_s2, %s2353_s15  ;;  %s2489_s14 = sld [smem:[#allocation6 + $0x38]] }
  0x41   :  { %328 = vst [vmem:[#allocation3 + $0xf] sm:$0x1] %v327_v39  ;;  %v66_v44 = vld [vmem:[%s65_s7] sm:$0x1]  ;;  %s218_s7 = scalar_lea.vmem %s3656_s2, %s2345_s17  ;;  %s253_s27 = scalar_lea.vmem %s3656_s2, %s2371_s16 }
  0x42   :  { %92 = vst [vmem:[#allocation2 + $0x5] sm:$0x1] %v91_v40  ;;  %v73_v45 = vld [vmem:[%s72_s8] sm:$0x1]  ;;  %s2425_s8 = sld [smem:[#allocation6 + $0x2a]]  ;;  %s235_s17 = scalar_lea.vmem %s3657_s3, %s2353_s15 }
  0x43   :  { %99 = vst [vmem:[#allocation2 + $0x6] sm:$0x1] %v98_v41  ;;  %v80_v46 = vld [vmem:[%s79_s0] sm:$0x1]  ;;  %s2431_s0 = sld [smem:[#allocation6 + $0x2b]] }
  0x44   :  { %106 = vst [vmem:[#allocation2 + $0x7] sm:$0x1] %v105_v42  ;;  %v87_v47 = vld [vmem:[%s86_s9] sm:$0x1]  ;;  %s2502_s15 = sld [smem:[#allocation6 + $0x39]]  ;;  %s481_s9 = scalar_lea.vmem %s3657_s3, %s2441_s21 }
  0x45   :  { %60 = vst [vmem:[#allocation3] sm:$0x1] %v59_v43  ;;  %v94_v48 = vld [vmem:[%s93_s25] sm:$0x1]  ;;  %s2439_s25 = sld [smem:[#allocation6 + $0x2d]] }
  0x46   :  { %67 = vst [vmem:[#allocation3 + $0x1] sm:$0x1] %v66_v44  ;;  %v101_v50 = vld [vmem:[%s100_s29] sm:$0x1]  ;;  %s2526_s26 = sld [smem:[#allocation6 + $0x3d]] }
  0x47   :  { %74 = vst [vmem:[#allocation3 + $0x2] sm:$0x1] %v73_v45  ;;  %v219_v51 = vld [vmem:[%s218_s7] sm:$0x1]  ;;  %s2419_s7 = sld [smem:[#allocation6 + $0x29]] }
  0x48   :  { %v353_v49 = vld [vmem:[#allocation3 + $0x8] sm:$0xff]  ;;  %81 = vst [vmem:[#allocation3 + $0x3] sm:$0x1] %v80_v46  ;;  %v226_v52 = vld [vmem:[%s225_s4] sm:$0x1]  ;;  %s267_s4 = scalar_lea.vmem %s3656_s2, %s2383_s5  ;;  %s450_s11 = scalar_lea.vmem %s3656_s2, %s2425_s8 }
  0x49   :  { %368 = vmatpush.xpose.msra.mxu3 %v353_v49  ;;  %88 = vst [vmem:[#allocation3 + $0x4] sm:$0x1] %v87_v47  ;;  %v233_v54 = vld [vmem:[%s232_s6] sm:$0x1]  ;;  %s457_s28 = scalar_lea.vmem %s3656_s2, %s2431_s0  ;;  %s478_s6 = scalar_lea.vmem %s3656_s2, %s2441_s21 }
  0x4a   :  { %95 = vst [vmem:[#allocation3 + $0x5] sm:$0x1] %v94_v48  ;;  %v240_v55 = vld [vmem:[%s239_s30] sm:$0x1]  ;;  %s2433_s30 = sld [smem:[#allocation6 + $0x2c]] }
  0x4b   :  { %v166_v53 = vld [vmem:[#allocation2] sm:$0xff]  ;;  %102 = vst [vmem:[#allocation3 + $0x6] sm:$0x1] %v101_v50  ;;  %s2593_s21 = sld [smem:[#allocation6 + $0x25]] }
  0x4c   :  { %220 = vst [vmem:[#allocation2] sm:$0x1] %v219_v51  ;;  %183 = vmatpush.xpose.msra.mxu0 %v166_v53  ;;  %v247_v56 = vld [vmem:[%s246_s22] sm:$0x1]  ;;  %s436_s22 = scalar_lea.vmem %s3656_s2, %s2409_s18 }
  0x4d   :  { %3681 = sst [smem:[#allocation15_spill]] %s2419_s7  ;;  %227 = vst [vmem:[#allocation2 + $0x1] sm:$0x1] %v226_v52  ;;  %v254_v57 = vld [vmem:[%s253_s27] sm:$0x1]  ;;  %s443_s29 = scalar_lea.vmem %s3656_s2, %s2419_s7 }
  0x4e   :  { %234 = vst [vmem:[#allocation2 + $0x2] sm:$0x1] %v233_v54  ;;  %v261_v58 = vld [vmem:[%s260_s24] sm:$0x1]  ;;  %s3683_s7 = sld [smem:[#allocation15_spill]] }
  0x4f   :  { %241 = vst [vmem:[#allocation2 + $0x3] sm:$0x1] %v240_v55  ;;  %v268_v59 = vld [vmem:[%s267_s4] sm:$0x1]  ;;  %s471_s4 = scalar_lea.vmem %s3656_s2, %s2439_s25  ;;  %s2514_s27 = sld [smem:[#allocation6 + $0x3b]] }
  0x50   :  { %248 = vst [vmem:[#allocation2 + $0x4] sm:$0x1] %v247_v56  ;;  %v108_v60 = vld [vmem:[%s107_s19] sm:$0x1]  ;;  %s464_s24 = scalar_lea.vmem %s3656_s2, %s2433_s30  ;;  %s270_s19 = scalar_lea.vmem %s3657_s3, %s2383_s5 }
  0x51   :  { %255 = vst [vmem:[#allocation2 + $0x5] sm:$0x1] %v254_v57  ;;  %v437_v61 = vld [vmem:[%s436_s22] sm:$0x1]  ;;  %s242_s22 = scalar_lea.vmem %s3657_s3, %s2359_s10  ;;  %s3682_s10 = sld [smem:[#allocation19_spill]] }
  0x52   :  { %262 = vst [vmem:[#allocation2 + $0x6] sm:$0x1] %v261_v58  ;;  %v444_v62 = vld [vmem:[%s443_s29] sm:$0x1]  ;;  %s249_s29 = scalar_lea.vmem %s3657_s3, %s2365_s1  ;;  %s439_s5 = scalar_lea.vmem %s3657_s3, %s2409_s18 }
  0x53   :  { %269 = vst [vmem:[#allocation2 + $0x7] sm:$0x1] %v268_v59  ;;  %v451_v63 = vld [vmem:[%s450_s11] sm:$0x1]  ;;  %s2475_s11 = sld [smem:[#allocation6 + $0x2f]]  ;;  %s605_s1 = scalar_lea.vmem %s3656_s2, %s2502_s15 }
  0x54   :  { %109 = vst [vmem:[#allocation3 + $0x7] sm:$0x1] %v108_v60  ;;  %v458_v0 = vld [vmem:[%s457_s28] sm:$0x1]  ;;  %s446_s13 = scalar_lea.vmem %s3657_s3, %s3683_s7  ;;  %s460_s7 = scalar_lea.vmem %s3657_s3, %s2431_s0 }
  0x55   :  { %438 = vst [vmem:[#allocation2 + $0x8] sm:$0x1] %v437_v61  ;;  %v465_v1 = vld [vmem:[%s464_s24] sm:$0x1]  ;;  %s474_s18 = scalar_lea.vmem %s3657_s3, %s2439_s25  ;;  %s2564_s25 = sld [smem:[#allocation6 + $0x20]] }
  0x56   :  { %445 = vst [vmem:[#allocation2 + $0x9] sm:$0x1] %v444_v62  ;;  %v472_v2 = vld [vmem:[%s471_s4] sm:$0x1]  ;;  %s263_s4 = scalar_lea.vmem %s3657_s3, %s2377_s20  ;;  %s2512_s20 = sld [smem:[#allocation6 + $0x3a]] }
  0x57   :  { %452 = vst [vmem:[#allocation2 + $0xa] sm:$0x1] %v451_v63  ;;  %v222_v3 = vld [vmem:[%s221_s23] sm:$0x1]  ;;  %v215_v9 = vld [vmem:[%s3682_s10 + $0x1] sm:$0x1] }
  0x58   :  { %459 = vst [vmem:[#allocation2 + $0xb] sm:$0x1] %v458_v0  ;;  %v479_v4 = vld [vmem:[%s478_s6] sm:$0x1]  ;;  %s453_s6 = scalar_lea.vmem %s3657_s3, %s2425_s8  ;;  %s467_s8 = scalar_lea.vmem %s3657_s3, %s2433_s30 }
  0x59   :  { %v229_v5 = vld [vmem:[%s228_s12] sm:$0x1]  ;;  %466 = vst [vmem:[#allocation2 + $0xc] sm:$0x1] %v465_v1  ;;  %s485_s28 = scalar_lea.vmem %s3656_s2, %s2475_s11  ;;  %s2520_s12 = sld [smem:[#allocation6 + $0x3c]] }
  0x5a   :  { %v236_v6 = vld [vmem:[%s235_s17] sm:$0x1]  ;;  %473 = vst [vmem:[#allocation2 + $0xd] sm:$0x1] %v472_v2  ;;  %s256_s17 = scalar_lea.vmem %s3657_s3, %s2371_s16  ;;  %s2554_s16 = sld [smem:[#allocation6 + $0x3f]] }
  0x5b   :  { %v329_v7 = vld [vmem:[#allocation2] sm:$0xff]  ;;  %v189_v8 = vld [vmem:[#allocation3] sm:$0xff]  ;;  %480 = vst [vmem:[#allocation2 + $0xe] sm:$0x1] %v479_v4  ;;  %s3684_s23 = sld [smem:[#allocation20_spill]] }
  0x5c   :  { %346 = vmatpush.xpose.msra.mxu2 %v329_v7  ;;  %223 = vst [vmem:[#allocation3] sm:$0x1] %v222_v3  ;;  %v243_v10 = vld [vmem:[%s242_s22] sm:$0x1]  ;;  %206 = vmatpush.xpose.msra.mxu1 %v189_v8  ;;  %s2587_s30 = sld [smem:[#allocation6 + $0x24]] }
  0x5d   :  { %230 = vst [vmem:[#allocation3 + $0x1] sm:$0x1] %v229_v5  ;;  %v250_v11 = vld [vmem:[%s249_s29] sm:$0x1]  ;;  %s612_s29 = scalar_lea.vmem %s3656_s2, %s2512_s20  ;;  %s2655_s0 = sld [smem:[#allocation6 + $0x30]] }
  0x5e   :  { %237 = vst [vmem:[#allocation3 + $0x2] sm:$0x1] %v236_v6  ;;  %v257_v12 = vld [vmem:[%s256_s17] sm:$0x1] }
  0x5f   :  { %347 = vmatmul.f32.vlgmr.msra.gmra.mxu2 %v215_v9  ;;  %244 = vst [vmem:[#allocation3 + $0x3] sm:$0x1] %v243_v10  ;;  %v264_v13 = vld [vmem:[%s263_s4] sm:$0x1] }
  0x60   :  { %251 = vst [vmem:[#allocation3 + $0x4] sm:$0x1] %v250_v11  ;;  %v271_v14 = vld [vmem:[%s270_s19] sm:$0x1]  ;;  %s598_s19 = scalar_lea.vmem %s3656_s2, %s2489_s14  ;;  %s647_s4 = scalar_lea.vmem %s3656_s2, %s2554_s16 }
  0x61   :  { %258 = vst [vmem:[#allocation3 + $0x5] sm:$0x1] %v257_v12  ;;  %v486_v15 = vld [vmem:[%s485_s28] sm:$0x1]  ;;  %s2540_s28 = sld [smem:[#allocation6 + $0x3e]] }
  0x62   :  { %265 = vst [vmem:[#allocation3 + $0x6] sm:$0x1] %v264_v13  ;;  %v440_v16 = vld [vmem:[%s439_s5] sm:$0x1]  ;;  %v216_v25 = vld [vmem:[%s3684_s23 + $0x1] sm:$0x1]  ;;  %s626_s5 = scalar_lea.vmem %s3656_s2, %s2520_s12  ;;  %s408_s17 = scalar_lea.vmem %s3656_s2, %s2587_s30 }
  0x63   :  { %272 = vst [vmem:[#allocation3 + $0x7] sm:$0x1] %v271_v14  ;;  %v447_v17 = vld [vmem:[%s446_s13] sm:$0x1]  ;;  %s488_s13 = scalar_lea.vmem %s3657_s3, %s2475_s11  ;;  %s2675_s11 = sld [smem:[#allocation6 + $0x32]] }
  0x64   :  { %487 = vst [vmem:[#allocation2 + $0xf] sm:$0x1] %v486_v15  ;;  %v454_v18 = vld [vmem:[%s453_s6] sm:$0x1]  ;;  %s2566_s6 = sld [smem:[#allocation6 + $0x21]]  ;;  %s542_s10 = scalar_lea.vmem %s3656_s2, %s2655_s0 }
  0x65   :  { %441 = vst [vmem:[#allocation3 + $0x8] sm:$0x1] %v440_v16  ;;  %v461_v19 = vld [vmem:[%s460_s7] sm:$0x1] }
  0x66   :  { %448 = vst [vmem:[#allocation3 + $0x9] sm:$0x1] %v447_v17  ;;  %v468_v20 = vld [vmem:[%s467_s8] sm:$0x1]  ;;  %s2575_s8 = sld [smem:[#allocation6 + $0x22]] }
  0x67   :  { %v599_v21 = vld [vmem:[%s598_s19] sm:$0x1]  ;;  %455 = vst [vmem:[#allocation3 + $0xa] sm:$0x1] %v454_v18  ;;  %s619_s19 = scalar_lea.vmem %s3656_s2, %s2514_s27  ;;  %s640_s7 = scalar_lea.vmem %s3656_s2, %s2540_s28 }
  0x68   :  { %v475_v22 = vld [vmem:[%s474_s18] sm:$0x1]  ;;  %462 = vst [vmem:[#allocation3 + $0xb] sm:$0x1] %v461_v19  ;;  %s2581_s18 = sld [smem:[#allocation6 + $0x23]] }
  0x69   :  { %v606_v23 = vld [vmem:[%s605_s1] sm:$0x1]  ;;  %469 = vst [vmem:[#allocation3 + $0xc] sm:$0x1] %v468_v20  ;;  %s2599_s1 = sld [smem:[#allocation6 + $0x26]] }
  0x6a   :  { %v482_v24 = vld [vmem:[%s481_s9] sm:$0x1]  ;;  %v352_v27 = vld [vmem:[#allocation3] sm:$0xff]  ;;  %476 = vst [vmem:[#allocation3 + $0xd] sm:$0x1] %v475_v22  ;;  %s633_s9 = scalar_lea.vmem %s3656_s2, %s2526_s26  ;;  %s387_s23 = scalar_lea.vmem %s3656_s2, %s2566_s6 }
  0x6b   :  { %v613_v26 = vld [vmem:[%s612_s29] sm:$0x1]  ;;  %369 = vmatpush.xpose.msra.mxu3 %v352_v27  ;;  %v492_v28 = vld [vmem:[#allocation2 + $0x8] sm:$0xff]  ;;  %483 = vst [vmem:[#allocation3 + $0xe] sm:$0x1] %v482_v24  ;;  %s643_s29 = scalar_lea.vmem %s3657_s3, %s2540_s28  ;;  %s2677_s28 = sld [smem:[#allocation6 + $0x33]] }
  0x6c   :  { %600 = vst [vmem:[#allocation2 + $0x8] sm:$0x1] %v599_v21  ;;  %v620_v29 = vld [vmem:[%s619_s19] sm:$0x1]  ;;  %507 = vmatpush.xpose.msrb.mxu0 %v492_v28  ;;  %s383_s19 = scalar_lea.vmem %s3657_s3, %s2564_s25 }
  0x6d   :  { %607 = vst [vmem:[#allocation2 + $0x9] sm:$0x1] %v606_v23  ;;  %v627_v30 = vld [vmem:[%s626_s5] sm:$0x1]  ;;  %s380_s5 = scalar_lea.vmem %s3656_s2, %s2564_s25  ;;  %s2765_s25 = sld [smem:[#allocation6 + $0x4e]] }
  0x6e   :  { %370 = vmatmul.f32.vlgmr.msra.gmra.mxu3 %v216_v25  ;;  %614 = vst [vmem:[#allocation2 + $0xa] sm:$0x1] %v613_v26  ;;  %v634_v31 = vld [vmem:[%s633_s9] sm:$0x1]  ;;  %s401_s22 = scalar_lea.vmem %s3656_s2, %s2581_s18  ;;  %s415_s9 = scalar_lea.vmem %s3656_s2, %s2593_s21 }
  0x6f   :  { %621 = vst [vmem:[#allocation2 + $0xb] sm:$0x1] %v620_v29  ;;  %v641_v32 = vld [vmem:[%s640_s7] sm:$0x1]  ;;  %s394_s7 = scalar_lea.vmem %s3656_s2, %s2575_s8 }
  0x70   :  { %628 = vst [vmem:[#allocation2 + $0xc] sm:$0x1] %v627_v30  ;;  %v648_v33 = vld [vmem:[%s647_s4] sm:$0x1]  ;;  %s418_s4 = scalar_lea.vmem %s3657_s3, %s2593_s21 }
  0x71   :  { %635 = vst [vmem:[#allocation2 + $0xd] sm:$0x1] %v634_v31  ;;  %v489_v34 = vld [vmem:[%s488_s13] sm:$0x1]  ;;  %s2641_s13 = sld [smem:[#allocation6 + $0x27]] }
  0x72   :  { %642 = vst [vmem:[#allocation2 + $0xe] sm:$0x1] %v641_v32  ;;  %v381_v35 = vld [vmem:[%s380_s5] sm:$0x1]  ;;  %s601_s5 = scalar_lea.vmem %s3657_s3, %s2489_s14  ;;  %s650_s14 = scalar_lea.vmem %s3657_s3, %s2554_s16 }
  0x73   :  { %649 = vst [vmem:[#allocation2 + $0xf] sm:$0x1] %v648_v33  ;;  %v388_v36 = vld [vmem:[%s387_s23] sm:$0x1]  ;;  %s422_s23 = scalar_lea.vmem %s3656_s2, %s2599_s1  ;;  %s2683_s16 = sld [smem:[#allocation6 + $0x34]] }
  0x74   :  { %490 = vst [vmem:[#allocation3 + $0xf] sm:$0x1] %v489_v34  ;;  %v395_v37 = vld [vmem:[%s394_s7] sm:$0x1]  ;;  %s608_s7 = scalar_lea.vmem %s3657_s3, %s2502_s15  ;;  %s622_s15 = scalar_lea.vmem %s3657_s3, %s2514_s27 }
  0x75   :  { %382 = vst [vmem:[#allocation2] sm:$0x1] %v381_v35  ;;  %v402_v38 = vld [vmem:[%s401_s22] sm:$0x1]  ;;  %s615_s22 = scalar_lea.vmem %s3657_s3, %s2512_s20 }
  0x76   :  { %389 = vst [vmem:[#allocation2 + $0x1] sm:$0x1] %v388_v36  ;;  %v409_v39 = vld [vmem:[%s408_s17] sm:$0x1] }
  0x77   :  { %396 = vst [vmem:[#allocation2 + $0x2] sm:$0x1] %v395_v37  ;;  %v416_v40 = vld [vmem:[%s415_s9] sm:$0x1]  ;;  %s629_s9 = scalar_lea.vmem %s3657_s3, %s2520_s12  ;;  %s2665_s12 = sld [smem:[#allocation6 + $0x31]] }
  0x78   :  { %403 = vst [vmem:[#allocation2 + $0x3] sm:$0x1] %v402_v38  ;;  %v423_v41 = vld [vmem:[%s422_s23] sm:$0x1]  ;;  %s636_s23 = scalar_lea.vmem %s3657_s3, %s2526_s26  ;;  %s429_s24 = scalar_lea.vmem %s3656_s2, %s2641_s13 }
  0x79   :  { %v602_v42 = vld [vmem:[%s601_s5] sm:$0x1]  ;;  %410 = vst [vmem:[#allocation2 + $0x4] sm:$0x1] %v409_v39  ;;  %s390_s5 = scalar_lea.vmem %s3657_s3, %s2566_s6  ;;  %s404_s6 = scalar_lea.vmem %s3657_s3, %s2581_s18 }
  0x7a   :  { %v609_v43 = vld [vmem:[%s608_s7] sm:$0x1]  ;;  %v654_v44 = vld [vmem:[#allocation2 + $0x8] sm:$0xff]  ;;  %417 = vst [vmem:[#allocation2 + $0x5] sm:$0x1] %v416_v40  ;;  %s2717_s18 = sld [smem:[#allocation6 + $0x37]]  ;;  %s425_s7 = scalar_lea.vmem %s3657_s3, %s2599_s1 }
  0x7b   :  { %669 = vmatpush.xpose.msrb.mxu2 %v654_v44  ;;  %v515_v45 = vld [vmem:[#allocation3 + $0x8] sm:$0xff]  ;;  %v616_v46 = vld [vmem:[%s615_s22] sm:$0x1]  ;;  %424 = vst [vmem:[#allocation2 + $0x6] sm:$0x1] %v423_v41  ;;  %s2703_s22 = sld [smem:[#allocation6 + $0x36]]  ;;  %s556_s26 = scalar_lea.vmem %s3656_s2, %s2675_s11 }
  0x7c   :  { %603 = vst [vmem:[#allocation3 + $0x8] sm:$0x1] %v602_v42  ;;  %v623_v47 = vld [vmem:[%s622_s15] sm:$0x1]  ;;  %530 = vmatpush.xpose.msrb.mxu1 %v515_v45  ;;  %s563_s15 = scalar_lea.vmem %s3656_s2, %s2677_s28  ;;  %s2735_s1 = sld [smem:[#allocation6 + $0x4a]] }
  0x7d   :  { %610 = vst [vmem:[#allocation3 + $0x9] sm:$0x1] %v609_v43  ;;  %v630_v48 = vld [vmem:[%s629_s9] sm:$0x1]  ;;  %s549_s20 = scalar_lea.vmem %s3656_s2, %s2665_s12  ;;  %s570_s9 = scalar_lea.vmem %s3656_s2, %s2683_s16 }
  0x7e   :  { %617 = vst [vmem:[#allocation3 + $0xa] sm:$0x1] %v616_v46  ;;  %v637_v49 = vld [vmem:[%s636_s23] sm:$0x1]  ;;  %s2689_s23 = sld [smem:[#allocation6 + $0x35]] }
  0x7f   :  { %624 = vst [vmem:[#allocation3 + $0xb] sm:$0x1] %v623_v47  ;;  %v644_v50 = vld [vmem:[%s643_s29] sm:$0x1]  ;;  %s397_s29 = scalar_lea.vmem %s3657_s3, %s2575_s8  ;;  %s411_s8 = scalar_lea.vmem %s3657_s3, %s2587_s30 }
  0x80   :  { %631 = vst [vmem:[#allocation3 + $0xc] sm:$0x1] %v630_v48  ;;  %v651_v51 = vld [vmem:[%s650_s14] sm:$0x1]  ;;  %s591_s27 = scalar_lea.vmem %s3656_s2, %s2717_s18  ;;  %s432_s30 = scalar_lea.vmem %s3657_s3, %s2641_s13 }
  0x81   :  { %638 = vst [vmem:[#allocation3 + $0xd] sm:$0x1] %v637_v49  ;;  %v430_v52 = vld [vmem:[%s429_s24] sm:$0x1]  ;;  %s2807_s24 = sld [smem:[#allocation6 + $0x4f]]  ;;  %s573_s13 = scalar_lea.vmem %s3657_s3, %s2683_s16 }
  0x82   :  { %645 = vst [vmem:[#allocation3 + $0xe] sm:$0x1] %v644_v50  ;;  %v384_v53 = vld [vmem:[%s383_s19] sm:$0x1]  ;;  %3685 = sst [smem:[#allocation15_spill]] %s2735_s1  ;;  %s587_s16 = scalar_lea.vmem %s3657_s3, %s2703_s22 }
  0x83   :  { %652 = vst [vmem:[#allocation3 + $0xf] sm:$0x1] %v651_v51  ;;  %v391_v54 = vld [vmem:[%s390_s5] sm:$0x1]  ;;  %s2743_s19 = sld [smem:[#allocation6 + $0x4c]] }
  0x84   :  { %431 = vst [vmem:[#allocation2 + $0x7] sm:$0x1] %v430_v52  ;;  %v398_v55 = vld [vmem:[%s397_s29] sm:$0x1]  ;;  %s2727_s29 = sld [smem:[#allocation6 + $0x48]] }
  0x85   :  { %385 = vst [vmem:[#allocation3] sm:$0x1] %v384_v53  ;;  %v405_v56 = vld [vmem:[%s404_s6] sm:$0x1]  ;;  %s2733_s6 = sld [smem:[#allocation6 + $0x49]] }
  0x86   :  { %392 = vst [vmem:[#allocation3 + $0x1] sm:$0x1] %v391_v54  ;;  %v412_v57 = vld [vmem:[%s411_s8] sm:$0x1]  ;;  %s2737_s8 = sld [smem:[#allocation6 + $0x4b]] }
  0x87   :  { %v543_v58 = vld [vmem:[%s542_s10] sm:$0x1]  ;;  %399 = vst [vmem:[#allocation3 + $0x2] sm:$0x1] %v398_v55  ;;  %s2759_s10 = sld [smem:[#allocation6 + $0x4d]] }
  0x88   :  { %v419_v59 = vld [vmem:[%s418_s4] sm:$0x1]  ;;  %406 = vst [vmem:[#allocation3 + $0x3] sm:$0x1] %v405_v56  ;;  %s577_s4 = scalar_lea.vmem %s3656_s2, %s2689_s23  ;;  %s2884_s14 = sld [smem:[#allocation6 + $0x5e]] }
  0x89   :  { %v550_v60 = vld [vmem:[%s549_s20] sm:$0x1]  ;;  %413 = vst [vmem:[#allocation3 + $0x4] sm:$0x1] %v412_v57  ;;  %s788_s17 = scalar_lea.vmem %s3656_s2, %s2743_s19 }
  0x8a   :  { %v426_v61 = vld [vmem:[%s425_s7] sm:$0x1]  ;;  %v677_v63 = vld [vmem:[#allocation3 + $0x8] sm:$0xff]  ;;  %420 = vst [vmem:[#allocation3 + $0x5] sm:$0x1] %v419_v59  ;;  %s3687_s7 = sld [smem:[#allocation19_spill]]  ;;  %s760_s21 = scalar_lea.vmem %s3656_s2, %s2727_s29 }
  0x8b   :  { %v557_v62 = vld [vmem:[%s556_s26] sm:$0x1]  ;;  %692 = vmatpush.xpose.msrb.mxu3 %v677_v63  ;;  %427 = vst [vmem:[#allocation3 + $0x6] sm:$0x1] %v426_v61  ;;  %s584_s26 = scalar_lea.vmem %s3656_s2, %s2703_s22  ;;  %s809_s22 = scalar_lea.vmem %s3656_s2, %s2807_s24 }
  0x8c   :  { %3686 = sst [smem:[#allocation16_spill]] %s2737_s8  ;;  %v564_v0 = vld [vmem:[%s563_s15] sm:$0x1]  ;;  %s770_s5 = scalar_lea.vmem %s3657_s3, %s2733_s6 }
  0x8d   :  { %v491_v1 = vld [vmem:[#allocation2] sm:$0xff]  ;;  %s3688_s15 = sld [smem:[#allocation20_spill]] }
  0x8e   :  { %544 = vst [vmem:[#allocation2] sm:$0x1] %v543_v58  ;;  %v571_v4 = vld [vmem:[%s570_s9] sm:$0x1]  ;;  %508 = vmatpush.xpose.msrb.mxu0 %v491_v1  ;;  %s781_s9 = scalar_lea.vmem %s3656_s2, %s2737_s8  ;;  %s2898_s8 = sld [smem:[#allocation6 + $0x41]] }
  0x8f   :  { %551 = vst [vmem:[#allocation2 + $0x1] sm:$0x1] %v550_v60  ;;  %v578_v5 = vld [vmem:[%s577_s4] sm:$0x1]  ;;  %s795_s4 = scalar_lea.vmem %s3656_s2, %s2759_s10 }
  0x90   :  { %v52_v2 = vld [vmem:[%s3687_s7] sm:$0x1]  ;;  %558 = vst [vmem:[#allocation2 + $0x2] sm:$0x1] %v557_v62  ;;  %v539_v21 = vld [vmem:[%s3687_s7 + $0x3] sm:$0x1] }
  0x91   :  { %184 = vmatmul.f32.vlgmr.msra.gmra.mxu0 %v52_v2  ;;  %565 = vst [vmem:[#allocation2 + $0x3] sm:$0x1] %v564_v0  ;;  %v585_v6 = vld [vmem:[%s584_s26] sm:$0x1]  ;;  %s774_s26 = scalar_lea.vmem %s3656_s2, %s2735_s1  ;;  %s2838_s1 = sld [smem:[#allocation6 + $0x59]] }
  0x92   :  { %572 = vst [vmem:[#allocation2 + $0x4] sm:$0x1] %v571_v4  ;;  %v592_v7 = vld [vmem:[%s591_s27] sm:$0x1]  ;;  %s2832_s27 = sld [smem:[#allocation6 + $0x58]] }
  0x93   :  { %v53_v3 = vld [vmem:[%s3688_s15] sm:$0x1]  ;;  %s767_s15 = scalar_lea.vmem %s3656_s2, %s2733_s6  ;;  %579 = vst [vmem:[#allocation2 + $0x5] sm:$0x1] %v578_v5  ;;  %s791_s6 = scalar_lea.vmem %s3657_s3, %s2743_s19 }
  0x94   :  { %207 = vmatmul.f32.vlgmr.msra.gmra.mxu1 %v53_v3  ;;  %v433_v8 = vld [vmem:[%s432_s30] sm:$0x1]  ;;  %586 = vst [vmem:[#allocation2 + $0x6] sm:$0x1] %v585_v6  ;;  %s3690_s30 = sld [smem:[#allocation16_spill]] }
  0x95   :  { %v761_v9 = vld [vmem:[%s760_s21] sm:$0x1]  ;;  %593 = vst [vmem:[#allocation2 + $0x7] sm:$0x1] %v592_v7  ;;  %s545_s21 = scalar_lea.vmem %s3657_s3, %s2655_s0  ;;  %s559_s0 = scalar_lea.vmem %s3657_s3, %s2675_s11 }
  0x96   :  { %v768_v10 = vld [vmem:[%s767_s15] sm:$0x1]  ;;  %434 = vst [vmem:[#allocation3 + $0x7] sm:$0x1] %v433_v8  ;;  %s802_s15 = scalar_lea.vmem %s3656_s2, %s2765_s25  ;;  %s763_s11 = scalar_lea.vmem %s3657_s3, %s2727_s29 }
  0x97   :  { %v775_v11 = vld [vmem:[%s774_s26] sm:$0x1]  ;;  %762 = vst [vmem:[#allocation2 + $0x8] sm:$0x1] %v761_v9  ;;  %s552_s26 = scalar_lea.vmem %s3657_s3, %s2665_s12  ;;  %s566_s12 = scalar_lea.vmem %s3657_s3, %s2677_s28 }
  0x98   :  { %v782_v12 = vld [vmem:[%s781_s9] sm:$0x1]  ;;  %769 = vst [vmem:[#allocation2 + $0x9] sm:$0x1] %v768_v10  ;;  %s2844_s9 = sld [smem:[#allocation6 + $0x5a]] }
  0x99   :  { %v789_v13 = vld [vmem:[%s788_s17] sm:$0x1]  ;;  %776 = vst [vmem:[#allocation2 + $0xa] sm:$0x1] %v775_v11  ;;  %s2862_s29 = sld [smem:[#allocation6 + $0x5b]]  ;;  %s798_s17 = scalar_lea.vmem %s3657_s3, %s2759_s10 }
  0x9a   :  { %v796_v14 = vld [vmem:[%s795_s4] sm:$0x1]  ;;  %783 = vst [vmem:[#allocation2 + $0xb] sm:$0x1] %v782_v12  ;;  %s929_s10 = scalar_lea.vmem %s3656_s2, %s2838_s1  ;;  %s2931_s19 = sld [smem:[#allocation6 + $0x46]] }
  0x9b   :  { %v803_v15 = vld [vmem:[%s802_s15] sm:$0x1]  ;;  %790 = vst [vmem:[#allocation2 + $0xc] sm:$0x1] %v789_v13  ;;  %s812_s15 = scalar_lea.vmem %s3657_s3, %s2807_s24  ;;  %s3009_s24 = sld [smem:[#allocation6 + $0x53]] }
  0x9c   :  { %v546_v16 = vld [vmem:[%s545_s21] sm:$0x1]  ;;  %797 = vst [vmem:[#allocation2 + $0xd] sm:$0x1] %v796_v14  ;;  %s580_s21 = scalar_lea.vmem %s3657_s3, %s2689_s23  ;;  %s2890_s23 = sld [smem:[#allocation6 + $0x5f]] }
  0x9d   :  { %v553_v17 = vld [vmem:[%s552_s26] sm:$0x1]  ;;  %v514_v20 = vld [vmem:[#allocation3] sm:$0xff]  ;;  %804 = vst [vmem:[#allocation2 + $0xe] sm:$0x1] %v803_v15  ;;  %s3689_s26 = sld [smem:[#allocation15_spill]] }
  0x9e   :  { %v653_v18 = vld [vmem:[#allocation2] sm:$0xff]  ;;  %547 = vst [vmem:[#allocation3] sm:$0x1] %v546_v16  ;;  %531 = vmatpush.xpose.msrb.mxu1 %v514_v20 }
  0x9f   :  { %v560_v19 = vld [vmem:[%s559_s0] sm:$0x1]  ;;  %670 = vmatpush.xpose.msrb.mxu2 %v653_v18  ;;  %554 = vst [vmem:[#allocation3 + $0x1] sm:$0x1] %v553_v17  ;;  %s594_s0 = scalar_lea.vmem %s3657_s3, %s2717_s18  ;;  %s805_s18 = scalar_lea.vmem %s3657_s3, %s2765_s25 }
  0xa0   :  { %v567_v22 = vld [vmem:[%s566_s12] sm:$0x1]  ;;  %561 = vst [vmem:[#allocation3 + $0x2] sm:$0x1] %v560_v19  ;;  %s936_s25 = scalar_lea.vmem %s3656_s2, %s2844_s9  ;;  %s964_s12 = scalar_lea.vmem %s3656_s2, %s2884_s14 }
  0xa1   :  { %v574_v23 = vld [vmem:[%s573_s13] sm:$0x1]  ;;  %568 = vst [vmem:[#allocation3 + $0x3] sm:$0x1] %v567_v22 }
  0xa2   :  { %v581_v24 = vld [vmem:[%s580_s21] sm:$0x1]  ;;  %671 = vmatmul.f32.vlgmr.msrb.gmra.mxu2 %v539_v21  ;;  %575 = vst [vmem:[#allocation3 + $0x4] sm:$0x1] %v574_v23  ;;  %s922_s21 = scalar_lea.vmem %s3656_s2, %s2832_s27  ;;  %s971_s4 = scalar_lea.vmem %s3656_s2, %s2890_s23 }
  0xa3   :  { %v588_v25 = vld [vmem:[%s587_s16] sm:$0x1]  ;;  %s777_s28 = scalar_lea.vmem %s3657_s3, %s3689_s26  ;;  %s784_s16 = scalar_lea.vmem %s3657_s3, %s3690_s30  ;;  %582 = vst [vmem:[#allocation3 + $0x5] sm:$0x1] %v581_v24 }
  0xa4   :  { %v595_v26 = vld [vmem:[%s594_s0] sm:$0x1]  ;;  %589 = vst [vmem:[#allocation3 + $0x6] sm:$0x1] %v588_v25  ;;  %s2868_s0 = sld [smem:[#allocation6 + $0x5c]] }
  0xa5   :  { %v810_v27 = vld [vmem:[%s809_s22] sm:$0x1]  ;;  %596 = vst [vmem:[#allocation3 + $0x7] sm:$0x1] %v595_v26  ;;  %s2874_s30 = sld [smem:[#allocation6 + $0x5d]] }
  0xa6   :  { %v764_v28 = vld [vmem:[%s763_s11] sm:$0x1]  ;;  %811 = vst [vmem:[#allocation2 + $0xf] sm:$0x1] %v810_v27  ;;  %s3691_s26 = sld [smem:[#allocation20_spill]] }
  0xa7   :  { %v771_v29 = vld [vmem:[%s770_s5] sm:$0x1]  ;;  %765 = vst [vmem:[#allocation3 + $0x8] sm:$0x1] %v764_v28  ;;  %s2919_s5 = sld [smem:[#allocation6 + $0x44]] }
  0xa8   :  { %v778_v30 = vld [vmem:[%s777_s28] sm:$0x1]  ;;  %772 = vst [vmem:[#allocation3 + $0x9] sm:$0x1] %v771_v29  ;;  %s2896_s28 = sld [smem:[#allocation6 + $0x40]] }
  0xa9   :  { %v785_v31 = vld [vmem:[%s784_s16] sm:$0x1]  ;;  %779 = vst [vmem:[#allocation3 + $0xa] sm:$0x1] %v778_v30  ;;  %s2925_s16 = sld [smem:[#allocation6 + $0x45]] }
  0xaa   :  { %v792_v32 = vld [vmem:[%s791_s6] sm:$0x1]  ;;  %786 = vst [vmem:[#allocation3 + $0xb] sm:$0x1] %v785_v31  ;;  %s943_s6 = scalar_lea.vmem %s3656_s2, %s2862_s29  ;;  %s2987_s11 = sld [smem:[#allocation6 + $0x50]] }
  0xab   :  { %v923_v33 = vld [vmem:[%s922_s21] sm:$0x1]  ;;  %793 = vst [vmem:[#allocation3 + $0xc] sm:$0x1] %v792_v32  ;;  %s2913_s21 = sld [smem:[#allocation6 + $0x43]] }
  0xac   :  { %v799_v34 = vld [vmem:[%s798_s17] sm:$0x1]  ;;  %v540_v37 = vld [vmem:[%s3691_s26 + $0x3] sm:$0x1]  ;;  %s2907_s17 = sld [smem:[#allocation6 + $0x42]]  ;;  %v676_v39 = vld [vmem:[#allocation3] sm:$0xff]  ;;  %s711_s26 = scalar_lea.vmem %s3656_s2, %s2898_s8 }
  0xad   :  { %v930_v35 = vld [vmem:[%s929_s10] sm:$0x1]  ;;  %800 = vst [vmem:[#allocation3 + $0xd] sm:$0x1] %v799_v34  ;;  %693 = vmatpush.xpose.msrb.mxu3 %v676_v39  ;;  %v816_v40 = vld [vmem:[#allocation2 + $0x8] sm:$0xff]  ;;  %s957_s10 = scalar_lea.vmem %s3656_s2, %s2874_s30  ;;  %s732_s22 = scalar_lea.vmem %s3656_s2, %s2919_s5 }
  0xae   :  { %v806_v36 = vld [vmem:[%s805_s18] sm:$0x1]  ;;  %s950_s18 = scalar_lea.vmem %s3656_s2, %s2868_s0  ;;  %924 = vst [vmem:[#allocation2 + $0x8] sm:$0x1] %v923_v33  ;;  %831 = vmatpush.xpose.msra.mxu0 %v816_v40 }
  0xaf   :  { %v937_v38 = vld [vmem:[%s936_s25] sm:$0x1]  ;;  %807 = vst [vmem:[#allocation3 + $0xe] sm:$0x1] %v806_v36  ;;  %s967_s25 = scalar_lea.vmem %s3657_s3, %s2884_s14  ;;  %s3007_s14 = sld [smem:[#allocation6 + $0x52]] }
  0xb0   :  { %v944_v41 = vld [vmem:[%s943_s6] sm:$0x1]  ;;  %931 = vst [vmem:[#allocation2 + $0x9] sm:$0x1] %v930_v35  ;;  %694 = vmatmul.f32.vlgmr.msrb.gmra.mxu3 %v540_v37  ;;  %s707_s6 = scalar_lea.vmem %s3657_s3, %s2896_s28 }
  0xb1   :  { %v951_v42 = vld [vmem:[%s950_s18] sm:$0x1]  ;;  %938 = vst [vmem:[#allocation2 + $0xa] sm:$0x1] %v937_v38  ;;  %s704_s18 = scalar_lea.vmem %s3656_s2, %s2896_s28  ;;  %s725_s20 = scalar_lea.vmem %s3656_s2, %s2913_s21 }
  0xb2   :  { %v958_v43 = vld [vmem:[%s957_s10] sm:$0x1]  ;;  %945 = vst [vmem:[#allocation2 + $0xb] sm:$0x1] %v944_v41  ;;  %s739_s10 = scalar_lea.vmem %s3656_s2, %s2925_s16  ;;  %s728_s28 = scalar_lea.vmem %s3657_s3, %s2913_s21 }
  0xb3   :  { %v965_v44 = vld [vmem:[%s964_s12] sm:$0x1]  ;;  %952 = vst [vmem:[#allocation2 + $0xc] sm:$0x1] %v951_v42  ;;  %s718_s12 = scalar_lea.vmem %s3656_s2, %s2907_s17 }
  0xb4   :  { %v972_v45 = vld [vmem:[%s971_s4] sm:$0x1]  ;;  %959 = vst [vmem:[#allocation2 + $0xd] sm:$0x1] %v958_v43  ;;  %s3023_s4 = sld [smem:[#allocation6 + $0x54]] }
  0xb5   :  { %v813_v46 = vld [vmem:[%s812_s15] sm:$0x1]  ;;  %966 = vst [vmem:[#allocation2 + $0xe] sm:$0x1] %v965_v44  ;;  %s2973_s15 = sld [smem:[#allocation6 + $0x47]] }
  0xb6   :  { %v705_v47 = vld [vmem:[%s704_s18] sm:$0x1]  ;;  %973 = vst [vmem:[#allocation2 + $0xf] sm:$0x1] %v972_v45  ;;  %s925_s18 = scalar_lea.vmem %s3657_s3, %s2832_s27  ;;  %s974_s27 = scalar_lea.vmem %s3657_s3, %s2890_s23 }
  0xb7   :  { %v712_v48 = vld [vmem:[%s711_s26] sm:$0x1]  ;;  %814 = vst [vmem:[#allocation3 + $0xf] sm:$0x1] %v813_v46  ;;  %s746_s26 = scalar_lea.vmem %s3656_s2, %s2931_s19 }
  0xb8   :  { %v719_v49 = vld [vmem:[%s718_s12] sm:$0x1]  ;;  %706 = vst [vmem:[#allocation2] sm:$0x1] %v705_v47  ;;  %s932_s12 = scalar_lea.vmem %s3657_s3, %s2838_s1  ;;  %s946_s1 = scalar_lea.vmem %s3657_s3, %s2862_s29 }
  0xb9   :  { %v726_v50 = vld [vmem:[%s725_s20] sm:$0x1]  ;;  %713 = vst [vmem:[#allocation2 + $0x1] sm:$0x1] %v712_v48  ;;  %s939_s20 = scalar_lea.vmem %s3657_s3, %s2844_s9  ;;  %s714_s9 = scalar_lea.vmem %s3657_s3, %s2898_s8 }
  0xba   :  { %v733_v51 = vld [vmem:[%s732_s22] sm:$0x1]  ;;  %720 = vst [vmem:[#allocation2 + $0x2] sm:$0x1] %v719_v49  ;;  %s721_s29 = scalar_lea.vmem %s3657_s3, %s2907_s17  ;;  %s866_s8 = scalar_lea.vmem %s3656_s2, %s2987_s11 }
  0xbb   :  { %v740_v52 = vld [vmem:[%s739_s10] sm:$0x1]  ;;  %727 = vst [vmem:[#allocation2 + $0x3] sm:$0x1] %v726_v50  ;;  %s953_s10 = scalar_lea.vmem %s3657_s3, %s2868_s0  ;;  %s2997_s0 = sld [smem:[#allocation6 + $0x51]] }
  0xbc   :  { %v747_v53 = vld [vmem:[%s746_s26] sm:$0x1]  ;;  %734 = vst [vmem:[#allocation2 + $0x4] sm:$0x1] %v733_v51  ;;  %s960_s26 = scalar_lea.vmem %s3657_s3, %s2874_s30  ;;  %s753_s13 = scalar_lea.vmem %s3656_s2, %s2973_s15 }
  0xbd   :  { %v926_v54 = vld [vmem:[%s925_s18] sm:$0x1]  ;;  %v978_v56 = vld [vmem:[#allocation2 + $0x8] sm:$0xff]  ;;  %741 = vst [vmem:[#allocation2 + $0x5] sm:$0x1] %v740_v52  ;;  %s3033_s30 = sld [smem:[#allocation6 + $0x55]]  ;;  %s894_s22 = scalar_lea.vmem %s3656_s2, %s3023_s4 }
  0xbe   :  { %v933_v55 = vld [vmem:[%s932_s12] sm:$0x1]  ;;  %993 = vmatpush.xpose.msra.mxu2 %v978_v56  ;;  %v839_v57 = vld [vmem:[#allocation3 + $0x8] sm:$0xff]  ;;  %748 = vst [vmem:[#allocation2 + $0x6] sm:$0x1] %v747_v53  ;;  %s3035_s17 = sld [smem:[#allocation6 + $0x56]]  ;;  %s749_s12 = scalar_lea.vmem %s3657_s3, %s2931_s19 }
  0xbf   :  { %v940_v58 = vld [vmem:[%s939_s20] sm:$0x1]  ;;  %927 = vst [vmem:[#allocation3 + $0x8] sm:$0x1] %v926_v54  ;;  %854 = vmatpush.xpose.msra.mxu1 %v839_v57  ;;  %s3067_s19 = sld [smem:[#allocation6 + $0x6a]] }
  0xc0   :  { %v947_v59 = vld [vmem:[%s946_s1] sm:$0x1]  ;;  %934 = vst [vmem:[#allocation3 + $0x9] sm:$0x1] %v933_v55  ;;  %s735_s1 = scalar_lea.vmem %s3657_s3, %s2919_s5  ;;  %s756_s5 = scalar_lea.vmem %s3657_s3, %s2973_s15 }
  0xc1   :  { %v954_v60 = vld [vmem:[%s953_s10] sm:$0x1]  ;;  %941 = vst [vmem:[#allocation3 + $0xa] sm:$0x1] %v940_v58  ;;  %s873_s23 = scalar_lea.vmem %s3656_s2, %s2997_s0  ;;  %s3075_s10 = sld [smem:[#allocation6 + $0x6c]] }
  0xc2   :  { %v961_v61 = vld [vmem:[%s960_s26] sm:$0x1]  ;;  %948 = vst [vmem:[#allocation3 + $0xb] sm:$0x1] %v947_v59  ;;  %s742_s26 = scalar_lea.vmem %s3657_s3, %s2925_s16  ;;  %s876_s7 = scalar_lea.vmem %s3657_s3, %s2997_s0 }
  0xc3   :  { %v968_v62 = vld [vmem:[%s967_s25] sm:$0x1]  ;;  %955 = vst [vmem:[#allocation3 + $0xc] sm:$0x1] %v954_v60  ;;  %s3097_s25 = sld [smem:[#allocation6 + $0x6e]] }
  0xc4   :  { %v975_v63 = vld [vmem:[%s974_s27] sm:$0x1]  ;;  %962 = vst [vmem:[#allocation3 + $0xd] sm:$0x1] %v961_v61  ;;  %s880_s27 = scalar_lea.vmem %s3656_s2, %s3007_s14  ;;  %s3145_s0 = sld [smem:[#allocation6 + $0x78]] }
  0xc5   :  { %v754_v0 = vld [vmem:[%s753_s13] sm:$0x1]  ;;  %969 = vst [vmem:[#allocation3 + $0xe] sm:$0x1] %v968_v62  ;;  %s887_s13 = scalar_lea.vmem %s3656_s2, %s3009_s24  ;;  %3694 = sst [smem:[#allocation17_spill]] %s3067_s19 }
  0xc6   :  { %v708_v1 = vld [vmem:[%s707_s6] sm:$0x1]  ;;  %976 = vst [vmem:[#allocation3 + $0xf] sm:$0x1] %v975_v63  ;;  %s3049_s6 = sld [smem:[#allocation6 + $0x57]] }
  0xc7   :  { %v715_v2 = vld [vmem:[%s714_s9] sm:$0x1]  ;;  %755 = vst [vmem:[#allocation2 + $0x7] sm:$0x1] %v754_v0  ;;  %3695 = sst [smem:[#allocation18_spill]] %s3075_s10  ;;  %s1112_s21 = scalar_lea.vmem %s3656_s2, %s3075_s10 }
  0xc8   :  { %v722_v3 = vld [vmem:[%s721_s29] sm:$0x1]  ;;  %709 = vst [vmem:[#allocation3] sm:$0x1] %v708_v1  ;;  %s3059_s29 = sld [smem:[#allocation6 + $0x68]]  ;;  %s890_s10 = scalar_lea.vmem %s3657_s3, %s3009_s24 }
  0xc9   :  { %v729_v4 = vld [vmem:[%s728_s28] sm:$0x1]  ;;  %716 = vst [vmem:[#allocation3 + $0x1] sm:$0x1] %v715_v2  ;;  %s3065_s28 = sld [smem:[#allocation6 + $0x69]]  ;;  %s904_s9 = scalar_lea.vmem %s3657_s3, %s3033_s30 }
  0xca   :  { %v736_v5 = vld [vmem:[%s735_s1] sm:$0x1]  ;;  %723 = vst [vmem:[#allocation3 + $0x2] sm:$0x1] %v722_v3  ;;  %s3069_s1 = sld [smem:[#allocation6 + $0x6b]] }
  0xcb   :  { %v867_v6 = vld [vmem:[%s866_s8] sm:$0x1]  ;;  %730 = vst [vmem:[#allocation3 + $0x3] sm:$0x1] %v729_v4  ;;  %s3091_s8 = sld [smem:[#allocation6 + $0x6d]] }
  0xcc   :  { %v743_v7 = vld [vmem:[%s742_s26] sm:$0x1]  ;;  %737 = vst [vmem:[#allocation3 + $0x4] sm:$0x1] %v736_v5  ;;  %s901_s26 = scalar_lea.vmem %s3656_s2, %s3033_s30  ;;  %s915_s18 = scalar_lea.vmem %s3656_s2, %s3049_s6 }
  0xcd   :  { %v874_v8 = vld [vmem:[%s873_s23] sm:$0x1]  ;;  %v1001_v11 = vld [vmem:[#allocation3 + $0x8] sm:$0xff]  ;;  %744 = vst [vmem:[#allocation3 + $0x5] sm:$0x1] %v743_v7  ;;  %s3701_s15 = sld [smem:[#allocation18_spill]] }
  0xce   :  { %3692 = sst [smem:[#allocation15_spill]] %s3059_s29  ;;  %v750_v9 = vld [vmem:[%s749_s12] sm:$0x1]  ;;  %1016 = vmatpush.xpose.msra.mxu3 %v1001_v11  ;;  %s1084_s16 = scalar_lea.vmem %s3656_s2, %s3059_s29 }
  0xcf   :  { %3693 = sst [smem:[#allocation16_spill]] %s3065_s28  ;;  %v881_v10 = vld [vmem:[%s880_s27] sm:$0x1]  ;;  %751 = vst [vmem:[#allocation3 + $0x6] sm:$0x1] %v750_v9  ;;  %s908_s27 = scalar_lea.vmem %s3656_s2, %s3035_s17 }
  0xd0   :  { %v888_v12 = vld [vmem:[%s887_s13] sm:$0x1]  ;;  %s3696_s12 = sld [smem:[#allocation19_spill]]  ;;  %s1105_s20 = scalar_lea.vmem %s3656_s2, %s3069_s1 }
  0xd1   :  { %v815_v13 = vld [vmem:[#allocation2] sm:$0xff]  ;;  %s3697_s13 = sld [smem:[#allocation20_spill]] }
  0xd2   :  { %868 = vst [vmem:[#allocation2] sm:$0x1] %v867_v6  ;;  %v895_v16 = vld [vmem:[%s894_s22] sm:$0x1]  ;;  %832 = vmatpush.xpose.msra.mxu0 %v815_v13  ;;  %s1126_s22 = scalar_lea.vmem %s3656_s2, %s3097_s25  ;;  %s3698_s24 = sld [smem:[#allocation15_spill]] }
  0xd3   :  { %875 = vst [vmem:[#allocation2 + $0x1] sm:$0x1] %v874_v8  ;;  %v902_v17 = vld [vmem:[%s901_s26] sm:$0x1]  ;;  %s1091_s26 = scalar_lea.vmem %s3656_s2, %s3065_s28  ;;  %s869_s28 = scalar_lea.vmem %s3657_s3, %s2987_s11 }
  0xd4   :  { %882 = vst [vmem:[#allocation2 + $0x2] sm:$0x1] %v881_v10  ;;  %v909_v18 = vld [vmem:[%s908_s27] sm:$0x1]  ;;  %s1098_s27 = scalar_lea.vmem %s3656_s2, %s3067_s19  ;;  %s883_s11 = scalar_lea.vmem %s3657_s3, %s3007_s14 }
  0xd5   :  { %889 = vst [vmem:[#allocation2 + $0x3] sm:$0x1] %v888_v12  ;;  %v916_v19 = vld [vmem:[%s915_s18] sm:$0x1]  ;;  %s3176_s14 = sld [smem:[#allocation6 + $0x7a]] }
  0xd6   :  { %v377_v14 = vld [vmem:[%s3696_s12 + $0x2] sm:$0x1]  ;;  %896 = vst [vmem:[#allocation2 + $0x4] sm:$0x1] %v895_v16  ;;  %v757_v20 = vld [vmem:[%s756_s5] sm:$0x1]  ;;  %s1115_s5 = scalar_lea.vmem %s3657_s3, %s3701_s15 }
  0xd7   :  { %509 = vmatmul.f32.vlgmr.msrb.gmra.mxu0 %v377_v14  ;;  %v378_v15 = vld [vmem:[%s3697_s13 + $0x2] sm:$0x1]  ;;  %903 = vst [vmem:[#allocation2 + $0x5] sm:$0x1] %v902_v17  ;;  %v1085_v21 = vld [vmem:[%s1084_s16] sm:$0x1]  ;;  %s1119_s16 = scalar_lea.vmem %s3656_s2, %s3091_s8  ;;  %s911_s13 = scalar_lea.vmem %s3657_s3, %s3035_s17 }
  0xd8   :  { %532 = vmatmul.f32.vlgmr.msrb.gmra.mxu1 %v378_v15  ;;  %910 = vst [vmem:[#allocation2 + $0x6] sm:$0x1] %v909_v18  ;;  %v1092_v22 = vld [vmem:[%s1091_s26] sm:$0x1]  ;;  %v863_v33 = vld [vmem:[%s3696_s12 + $0x5] sm:$0x1]  ;;  %s1122_s26 = scalar_lea.vmem %s3657_s3, %s3091_s8 }
  0xd9   :  { %917 = vst [vmem:[#allocation2 + $0x7] sm:$0x1] %v916_v19  ;;  %v1099_v23 = vld [vmem:[%s1098_s27] sm:$0x1]  ;;  %s3143_s27 = sld [smem:[#allocation6 + $0x6f]] }
  0xda   :  { %758 = vst [vmem:[#allocation3 + $0x7] sm:$0x1] %v757_v20  ;;  %v1106_v24 = vld [vmem:[%s1105_s20] sm:$0x1]  ;;  %s3204_s20 = sld [smem:[#allocation6 + $0x7c]] }
  0xdb   :  { %1086 = vst [vmem:[#allocation2 + $0x8] sm:$0x1] %v1085_v21  ;;  %v1113_v25 = vld [vmem:[%s1112_s21] sm:$0x1]  ;;  %s3155_s21 = sld [smem:[#allocation6 + $0x79]]  ;;  %s1260_s15 = scalar_lea.vmem %s3656_s2, %s3176_s14 }
  0xdc   :  { %1093 = vst [vmem:[#allocation2 + $0x9] sm:$0x1] %v1092_v22  ;;  %v870_v26 = vld [vmem:[%s869_s28] sm:$0x1]  ;;  %s897_s28 = scalar_lea.vmem %s3657_s3, %s3023_s4  ;;  %s1246_s4 = scalar_lea.vmem %s3656_s2, %s3145_s0 }
  0xdd   :  { %1100 = vst [vmem:[#allocation2 + $0xa] sm:$0x1] %v1099_v23  ;;  %v1120_v27 = vld [vmem:[%s1119_s16] sm:$0x1]  ;;  %s3218_s18 = sld [smem:[#allocation6 + $0x7f]] }
  0xde   :  { %1107 = vst [vmem:[#allocation2 + $0xb] sm:$0x1] %v1106_v24  ;;  %v1127_v28 = vld [vmem:[%s1126_s22] sm:$0x1]  ;;  %s3700_s22 = sld [smem:[#allocation17_spill]] }
  0xdf   :  { %v877_v29 = vld [vmem:[%s876_s7] sm:$0x1]  ;;  %1114 = vst [vmem:[#allocation2 + $0xc] sm:$0x1] %v1113_v25  ;;  %s3699_s7 = sld [smem:[#allocation16_spill]] }
  0xe0   :  { %v884_v30 = vld [vmem:[%s883_s11] sm:$0x1]  ;;  %1121 = vst [vmem:[#allocation2 + $0xd] sm:$0x1] %v1120_v27  ;;  %s918_s11 = scalar_lea.vmem %s3657_s3, %s3049_s6  ;;  %s3228_s8 = sld [smem:[#allocation6 + $0x60]] }
  0xe1   :  { %v977_v31 = vld [vmem:[#allocation2] sm:$0xff]  ;;  %v838_v32 = vld [vmem:[#allocation3] sm:$0xff]  ;;  %1128 = vst [vmem:[#allocation2 + $0xe] sm:$0x1] %v1127_v28  ;;  %s1253_s17 = scalar_lea.vmem %s3656_s2, %s3155_s21  ;;  %s3702_s19 = sld [smem:[#allocation20_spill]] }
  0xe2   :  { %994 = vmatpush.xpose.msra.mxu2 %v977_v31  ;;  %871 = vst [vmem:[#allocation3] sm:$0x1] %v870_v26  ;;  %v891_v34 = vld [vmem:[%s890_s10] sm:$0x1]  ;;  %855 = vmatpush.xpose.msra.mxu1 %v838_v32  ;;  %s1133_s10 = scalar_lea.vmem %s3656_s2, %s3143_s27  ;;  %s1274_s16 = scalar_lea.vmem %s3656_s2, %s3204_s20 }
  0xe3   :  { %878 = vst [vmem:[#allocation3 + $0x1] sm:$0x1] %v877_v29  ;;  %v898_v35 = vld [vmem:[%s897_s28] sm:$0x1]  ;;  %s1087_s28 = scalar_lea.vmem %s3657_s3, %s3698_s24  ;;  %s3251_s29 = sld [smem:[#allocation6 + $0x64]] }
  0xe4   :  { %885 = vst [vmem:[#allocation3 + $0x2] sm:$0x1] %v884_v30  ;;  %v905_v36 = vld [vmem:[%s904_s9] sm:$0x1]  ;;  %s1101_s30 = scalar_lea.vmem %s3657_s3, %s3700_s22  ;;  %s3206_s22 = sld [smem:[#allocation6 + $0x7d]] }
  0xe5   :  { %995 = vmatmul.f32.vlgmr.msra.gmra.mxu2 %v863_v33  ;;  %892 = vst [vmem:[#allocation3 + $0x3] sm:$0x1] %v891_v34  ;;  %v912_v37 = vld [vmem:[%s911_s13] sm:$0x1]  ;;  %s1094_s6 = scalar_lea.vmem %s3657_s3, %s3699_s7  ;;  %s3194_s13 = sld [smem:[#allocation6 + $0x7b]]  ;;  %v348_v34 = vpop.f32.mrf.mxu2 }
  0xe6   :  { %899 = vst [vmem:[#allocation3 + $0x4] sm:$0x1] %v898_v35  ;;  %v919_v38 = vld [vmem:[%s918_s11] sm:$0x1]  ;;  %s1108_s7 = scalar_lea.vmem %s3657_s3, %s3069_s1  ;;  %s3212_s1 = sld [smem:[#allocation6 + $0x7e]] }
  0xe7   :  { %906 = vst [vmem:[#allocation3 + $0x5] sm:$0x1] %v905_v36  ;;  %v1134_v39 = vld [vmem:[%s1133_s10] sm:$0x1]  ;;  %v864_v49 = vld [vmem:[%s3702_s19 + $0x5] sm:$0x1]  ;;  %s1295_s9 = scalar_lea.vmem %s3656_s2, %s3218_s18  ;;  %s1136_s24 = scalar_lea.vmem %s3657_s3, %s3143_s27 }
  0xe8   :  { %913 = vst [vmem:[#allocation3 + $0x6] sm:$0x1] %v912_v37  ;;  %v1088_v40 = vld [vmem:[%s1087_s28] sm:$0x1]  ;;  %s3337_s12 = sld [smem:[#allocation6 + $0x71]] }
  0xe9   :  { %920 = vst [vmem:[#allocation3 + $0x7] sm:$0x1] %v919_v38  ;;  %v1095_v41 = vld [vmem:[%s1094_s6] sm:$0x1]  ;;  %s1129_s6 = scalar_lea.vmem %s3657_s3, %s3097_s25  ;;  %s3257_s25 = sld [smem:[#allocation6 + $0x65]] }
  0xea   :  { %1135 = vst [vmem:[#allocation2 + $0xf] sm:$0x1] %v1134_v39  ;;  %v1102_v42 = vld [vmem:[%s1101_s30] sm:$0x1]  ;;  %s3230_s30 = sld [smem:[#allocation6 + $0x61]]  ;;  %s1056_s10 = scalar_lea.vmem %s3656_s2, %s3251_s29 }
  0xeb   :  { %1089 = vst [vmem:[#allocation3 + $0x8] sm:$0x1] %v1088_v40  ;;  %v1109_v43 = vld [vmem:[%s1108_s7] sm:$0x1]  ;;  %s1284_s28 = scalar_lea.vmem %s3657_s3, %s3206_s22  ;;  %v351_v39 = vmul.f32 14.285714, %v348_v34 }
  0xec   :  { %1096 = vst [vmem:[#allocation3 + $0x9] sm:$0x1] %v1095_v41  ;;  %v1116_v44 = vld [vmem:[%s1115_s5] sm:$0x1]  ;;  %s3239_s5 = sld [smem:[#allocation6 + $0x62]]  ;;  %s1288_s7 = scalar_lea.vmem %s3656_s2, %s3212_s1 }
  0xed   :  { %v1247_v45 = vld [vmem:[%s1246_s4] sm:$0x1]  ;;  %1103 = vst [vmem:[#allocation3 + $0xa] sm:$0x1] %v1102_v42  ;;  %s1267_s4 = scalar_lea.vmem %s3656_s2, %s3194_s13 }
  0xee   :  { %v1123_v46 = vld [vmem:[%s1122_s26] sm:$0x1]  ;;  %1110 = vst [vmem:[#allocation3 + $0xb] sm:$0x1] %v1109_v43  ;;  %s3245_s26 = sld [smem:[#allocation6 + $0x63]] }
  0xef   :  { %v1254_v47 = vld [vmem:[%s1253_s17] sm:$0x1]  ;;  %1117 = vst [vmem:[#allocation3 + $0xc] sm:$0x1] %v1116_v44  ;;  %s3263_s17 = sld [smem:[#allocation6 + $0x66]] }
  0xf0   :  { %v1130_v48 = vld [vmem:[%s1129_s6] sm:$0x1]  ;;  %v1000_v51 = vld [vmem:[#allocation3] sm:$0xff]  ;;  %1124 = vst [vmem:[#allocation3 + $0xd] sm:$0x1] %v1123_v46  ;;  %s1281_s6 = scalar_lea.vmem %s3656_s2, %s3206_s22  ;;  %s1035_s19 = scalar_lea.vmem %s3656_s2, %s3230_s30 }
  0xf1   :  { %v1261_v50 = vld [vmem:[%s1260_s15] sm:$0x1]  ;;  %1017 = vmatpush.xpose.msra.mxu3 %v1000_v51  ;;  %v1140_v52 = vld [vmem:[#allocation2 + $0x8] sm:$0xff]  ;;  %1131 = vst [vmem:[#allocation3 + $0xe] sm:$0x1] %v1130_v48  ;;  %s3367_s22 = sld [smem:[#allocation6 + $0x76]]  ;;  %v371_v40 = vpop.f32.mrf.mxu3 }
  0xf2   :  { %1248 = vst [vmem:[#allocation2 + $0x8] sm:$0x1] %v1247_v45  ;;  %v1268_v53 = vld [vmem:[%s1267_s4] sm:$0x1]  ;;  %1155 = vmatpush.xpose.msrb.mxu0 %v1140_v52  ;;  %s1042_s27 = scalar_lea.vmem %s3656_s2, %s3239_s5  ;;  %s3703_s4 = sld [smem:[#allocation19_spill]] }
  0xf3   :  { %1255 = vst [vmem:[#allocation2 + $0x9] sm:$0x1] %v1254_v47  ;;  %v1275_v54 = vld [vmem:[%s1274_s16] sm:$0x1]  ;;  %s1028_s16 = scalar_lea.vmem %s3656_s2, %s3228_s8  ;;  %v374_v41 = vmul.f32 14.285714, %v371_v40 }
  0xf4   :  { %1018 = vmatmul.f32.vlgmr.msra.gmra.mxu3 %v864_v49  ;;  %1262 = vst [vmem:[#allocation2 + $0xa] sm:$0x1] %v1261_v50  ;;  %v1282_v55 = vld [vmem:[%s1281_s6] sm:$0x1]  ;;  %s1049_s11 = scalar_lea.vmem %s3656_s2, %s3245_s26  ;;  %s1063_s6 = scalar_lea.vmem %s3656_s2, %s3257_s25 }
  0xf5   :  { %1269 = vst [vmem:[#allocation2 + $0xb] sm:$0x1] %v1268_v53  ;;  %v1289_v56 = vld [vmem:[%s1288_s7] sm:$0x1]  ;;  %s1070_s7 = scalar_lea.vmem %s3656_s2, %s3263_s17 }
  0xf6   :  { %1276 = vst [vmem:[#allocation2 + $0xc] sm:$0x1] %v1275_v54  ;;  %v1296_v57 = vld [vmem:[%s1295_s9] sm:$0x1]  ;;  %s3301_s9 = sld [smem:[#allocation6 + $0x67]] }
  0xf7   :  { %1283 = vst [vmem:[#allocation2 + $0xd] sm:$0x1] %v1282_v55  ;;  %v1137_v58 = vld [vmem:[%s1136_s24] sm:$0x1]  ;;  %s1256_s24 = scalar_lea.vmem %s3657_s3, %s3155_s21  ;;  %s1073_s21 = scalar_lea.vmem %s3657_s3, %s3263_s17 }
  0xf8   :  { %1290 = vst [vmem:[#allocation2 + $0xe] sm:$0x1] %v1289_v56  ;;  %v1029_v59 = vld [vmem:[%s1028_s16] sm:$0x1]  ;;  %s1263_s16 = scalar_lea.vmem %s3657_s3, %s3176_s14  ;;  %s3349_s14 = sld [smem:[#allocation6 + $0x73]] }
  0xf9   :  { %1297 = vst [vmem:[#allocation2 + $0xf] sm:$0x1] %v1296_v57  ;;  %v1036_v60 = vld [vmem:[%s1035_s19] sm:$0x1]  ;;  %s1249_s19 = scalar_lea.vmem %s3657_s3, %s3145_s0  ;;  %s1066_s0 = scalar_lea.vmem %s3657_s3, %s3257_s25  ;;  %v701_v25 = vld [vmem:[%s3703_s4 + $0x4] sm:$0x1] }
  0xfa   :  { %1138 = vst [vmem:[#allocation3 + $0xf] sm:$0x1] %v1137_v58  ;;  %v1043_v61 = vld [vmem:[%s1042_s27] sm:$0x1]  ;;  %s1291_s27 = scalar_lea.vmem %s3657_s3, %s3212_s1  ;;  %s3339_s1 = sld [smem:[#allocation6 + $0x72]]  ;;  %833 = vmatmul.f32.vlgmr.msra.gmra.mxu0 %v701_v25 }
  0xfb   :  { %1030 = vst [vmem:[#allocation2] sm:$0x1] %v1029_v59  ;;  %v1050_v62 = vld [vmem:[%s1049_s11] sm:$0x1]  ;;  %s3331_s11 = sld [smem:[#allocation6 + $0x70]] }
  0xfc   :  { %1037 = vst [vmem:[#allocation2 + $0x1] sm:$0x1] %v1036_v60  ;;  %v1057_v63 = vld [vmem:[%s1056_s10] sm:$0x1]  ;;  %s1270_s10 = scalar_lea.vmem %s3657_s3, %s3194_s13  ;;  %s1045_s13 = scalar_lea.vmem %s3657_s3, %s3239_s5  ;;  %v1025_v35 = vld [vmem:[%s3703_s4 + $0x6] sm:$0x1] }
  0xfd   :  { %1044 = vst [vmem:[#allocation2 + $0x2] sm:$0x1] %v1043_v61  ;;  %v1064_v0 = vld [vmem:[%s1063_s6] sm:$0x1]  ;;  %s1277_s6 = scalar_lea.vmem %s3657_s3, %s3204_s20  ;;  %s3361_s20 = sld [smem:[#allocation6 + $0x75]] }
  0xfe   :  { %1051 = vst [vmem:[#allocation2 + $0x3] sm:$0x1] %v1050_v62  ;;  %v1071_v1 = vld [vmem:[%s1070_s7] sm:$0x1]  ;;  %s1059_s5 = scalar_lea.vmem %s3657_s3, %s3251_s29  ;;  %s1211_s15 = scalar_lea.vmem %s3656_s2, %s3349_s14  ;;  %v1187_v47 = vld [vmem:[%s3703_s4 + $0x7] sm:$0x1] }
  0xff   :  { %v1250_v2 = vld [vmem:[%s1249_s19] sm:$0x1]  ;;  %1058 = vst [vmem:[#allocation2 + $0x4] sm:$0x1] %v1057_v63  ;;  %s3355_s19 = sld [smem:[#allocation6 + $0x74]]  ;;  %s1232_s7 = scalar_lea.vmem %s3656_s2, %s3367_s22 }
 0x100   :  { %v1302_v3 = vld [vmem:[#allocation2 + $0x8] sm:$0xff]  ;;  %v1257_v4 = vld [vmem:[%s1256_s24] sm:$0x1]  ;;  %1065 = vst [vmem:[#allocation2 + $0x5] sm:$0x1] %v1064_v0  ;;  %s1298_s24 = scalar_lea.vmem %s3657_s3, %s3218_s18  ;;  %s1031_s18 = scalar_lea.vmem %s3657_s3, %s3228_s8 }
 0x101   :  { %1317 = vmatpush.xpose.msrb.mxu2 %v1302_v3  ;;  %v1163_v5 = vld [vmem:[#allocation3 + $0x8] sm:$0xff]  ;;  %v1264_v6 = vld [vmem:[%s1263_s16] sm:$0x1]  ;;  %1072 = vst [vmem:[#allocation2 + $0x6] sm:$0x1] %v1071_v1  ;;  %s1077_s16 = scalar_lea.vmem %s3656_s2, %s3301_s9  ;;  %s1190_s29 = scalar_lea.vmem %s3656_s2, %s3331_s11 }
 0x102   :  { %1251 = vst [vmem:[#allocation3 + $0x8] sm:$0x1] %v1250_v2  ;;  %v1271_v7 = vld [vmem:[%s1270_s10] sm:$0x1]  ;;  %1178 = vmatpush.xpose.msrb.mxu1 %v1163_v5  ;;  %s3373_s10 = sld [smem:[#allocation6 + $0x77]] }
 0x103   :  { %1258 = vst [vmem:[#allocation3 + $0x9] sm:$0x1] %v1257_v4  ;;  %v1278_v8 = vld [vmem:[%s1277_s6] sm:$0x1]  ;;  %s1038_s6 = scalar_lea.vmem %s3657_s3, %s3230_s30  ;;  %s1052_s30 = scalar_lea.vmem %s3657_s3, %s3245_s26 }
 0x104   :  { %1265 = vst [vmem:[#allocation3 + $0xa] sm:$0x1] %v1264_v6  ;;  %v1285_v9 = vld [vmem:[%s1284_s28] sm:$0x1]  ;;  %s1225_s26 = scalar_lea.vmem %s3656_s2, %s3361_s20  ;;  %s3704_s25 = sld [smem:[#allocation20_spill]] }
 0x105   :  { %1272 = vst [vmem:[#allocation3 + $0xb] sm:$0x1] %v1271_v7  ;;  %v1292_v10 = vld [vmem:[%s1291_s27] sm:$0x1]  ;;  %s1204_s27 = scalar_lea.vmem %s3656_s2, %s3339_s1  ;;  %s1218_s23 = scalar_lea.vmem %s3656_s2, %s3355_s19 }
 0x106   :  { %1279 = vst [vmem:[#allocation3 + $0xc] sm:$0x1] %v1278_v8  ;;  %v1299_v11 = vld [vmem:[%s1298_s24] sm:$0x1]  ;;  %s3503_s28 = sld [smem:[#allocation9 + $0x6]] }
 0x107   :  { %1286 = vst [vmem:[#allocation3 + $0xd] sm:$0x1] %v1285_v9  ;;  %v1078_v12 = vld [vmem:[%s1077_s16] sm:$0x1]  ;;  %s3705_s8 = sld [smem:[#allocation22_spill]] }
 0x108   :  { %1293 = vst [vmem:[#allocation3 + $0xe] sm:$0x1] %v1292_v10  ;;  %v1032_v13 = vld [vmem:[%s1031_s18] sm:$0x1]  ;;  %s1239_s17 = scalar_lea.vmem %s3656_s2, %s3373_s10  ;;  %s3493_s18 = sld [smem:[#allocation9 + $0x1]] }
 0x109   :  { %1300 = vst [vmem:[#allocation3 + $0xf] sm:$0x1] %v1299_v11  ;;  %v1039_v14 = vld [vmem:[%s1038_s6] sm:$0x1]  ;;  %s3497_s6 = sld [smem:[#allocation9 + $0x3]] }
 0x10a   :  { %1079 = vst [vmem:[#allocation2 + $0x7] sm:$0x1] %v1078_v12  ;;  %v1046_v15 = vld [vmem:[%s1045_s13] sm:$0x1]  ;;  %s1197_s13 = scalar_lea.vmem %s3656_s2, %s3337_s12  ;;  %v702_v27 = vld [vmem:[%s3704_s25 + $0x4] sm:$0x1] }
 0x10b   :  { %1033 = vst [vmem:[#allocation3] sm:$0x1] %v1032_v13  ;;  %v1053_v16 = vld [vmem:[%s1052_s30] sm:$0x1]  ;;  %856 = vmatmul.f32.vlgmr.msra.gmra.mxu1 %v702_v27  ;;  %v1026_v49 = vld [vmem:[%s3704_s25 + $0x6] sm:$0x1] }
 0x10c   :  { %1040 = vst [vmem:[#allocation3 + $0x1] sm:$0x1] %v1039_v14  ;;  %v1060_v17 = vld [vmem:[%s1059_s5] sm:$0x1]  ;;  %s1080_s5 = scalar_lea.vmem %s3657_s3, %s3301_s9  ;;  %v1188_v55 = vld [vmem:[%s3704_s25 + $0x7] sm:$0x1] }
 0x10d   :  { %1047 = vst [vmem:[#allocation3 + $0x2] sm:$0x1] %v1046_v15  ;;  %v1067_v18 = vld [vmem:[%s1066_s0] sm:$0x1]  ;;  %s1193_s0 = scalar_lea.vmem %s3657_s3, %s3331_s11  ;;  %s1214_s11 = scalar_lea.vmem %s3657_s3, %s3349_s14 }
 0x10e   :  { %1054 = vst [vmem:[#allocation3 + $0x3] sm:$0x1] %v1053_v16  ;;  %v1074_v19 = vld [vmem:[%s1073_s21] sm:$0x1]  ;;  %v185_v30 = vpop.f32.mrf.mxu0  ;;  %s1200_s21 = scalar_lea.vmem %s3657_s3, %s3337_s12  ;;  %s1221_s12 = scalar_lea.vmem %s3657_s3, %s3355_s19 }
 0x10f   :  { %v1191_v20 = vld [vmem:[%s1190_s29] sm:$0x1]  ;;  %1061 = vst [vmem:[#allocation3 + $0x4] sm:$0x1] %v1060_v17  ;;  %v188_v36 = vmul.f32 14.285714, %v185_v30  ;;  %s1486_s30 = scalar_lea.vmem %s3657_s3, %s3493_s18 }
 0x110   :  { %v1198_v21 = vld [vmem:[%s1197_s13] sm:$0x1]  ;;  %v1325_v22 = vld [vmem:[#allocation3 + $0x8] sm:$0xff]  ;;  %1068 = vst [vmem:[#allocation3 + $0x5] sm:$0x1] %v1067_v18  ;;  %s3499_s29 = sld [smem:[#allocation9 + $0x4]] }
 0x111   :  { %v1205_v23 = vld [vmem:[%s1204_s27] sm:$0x1]  ;;  %1340 = vmatpush.xpose.msrb.mxu3 %v1325_v22  ;;  %1075 = vst [vmem:[#allocation3 + $0x6] sm:$0x1] %v1074_v19  ;;  %v208_v37 = vpop.f32.mrf.mxu1  ;;  %s3505_s13 = sld [smem:[#allocation9 + $0x7]] }
 0x112   :  { %v1139_v24 = vld [vmem:[#allocation2] sm:$0xff]  ;;  %v211_v38 = vmul.f32 14.285714, %v208_v37  ;;  %213 = vst.msk [vmem:[#allocation4] sm:$0x1] %vm212_vm0, %v188_v36 }
 0x113   :  { %1192 = vst [vmem:[#allocation2] sm:$0x1] %v1191_v20  ;;  %v1212_v26 = vld [vmem:[%s1211_s15] sm:$0x1]  ;;  %1156 = vmatpush.xpose.msrb.mxu0 %v1139_v24 }
 0x114   :  { %1199 = vst [vmem:[#allocation2 + $0x1] sm:$0x1] %v1198_v21  ;;  %v1219_v28 = vld [vmem:[%s1218_s23] sm:$0x1]  ;;  %s1235_s23 = scalar_lea.vmem %s3657_s3, %s3367_s22 }
 0x115   :  { %1206 = vst [vmem:[#allocation2 + $0x2] sm:$0x1] %v1205_v23  ;;  %v1226_v29 = vld [vmem:[%s1225_s26] sm:$0x1] }
 0x116   :  { %1213 = vst [vmem:[#allocation2 + $0x3] sm:$0x1] %v1212_v26  ;;  %v1233_v31 = vld [vmem:[%s1232_s7] sm:$0x1]  ;;  %1157 = vmatmul.f32.vlgmr.msrb.gmra.mxu0 %v1025_v35  ;;  %s1207_s7 = scalar_lea.vmem %s3657_s3, %s3339_s1  ;;  %s1228_s1 = scalar_lea.vmem %s3657_s3, %s3361_s20 }
 0x117   :  { %1220 = vst [vmem:[#allocation2 + $0x4] sm:$0x1] %v1219_v28  ;;  %v1240_v32 = vld [vmem:[%s1239_s17] sm:$0x1]  ;;  %s1242_s20 = scalar_lea.vmem %s3657_s3, %s3373_s10  ;;  %s3491_s10 = sld [smem:[#allocation9]] }
 0x118   :  { %v1081_v33 = vld [vmem:[%s1080_s5] sm:$0x1]  ;;  %1227 = vst [vmem:[#allocation2 + $0x5] sm:$0x1] %v1226_v29  ;;  %s1507_s16 = scalar_lea.vmem %s3657_s3, %s3499_s29  ;;  %s1528_s14 = scalar_lea.vmem %s3657_s3, %s3505_s13 }
 0x119   :  { %1234 = vst [vmem:[#allocation2 + $0x6] sm:$0x1] %v1233_v31  ;;  %v1194_v42 = vld [vmem:[%s1193_s0] sm:$0x1] }
 0x11a   :  { %1241 = vst [vmem:[#allocation2 + $0x7] sm:$0x1] %v1240_v32  ;;  %v1201_v44 = vld [vmem:[%s1200_s21] sm:$0x1]  ;;  %s3495_s21 = sld [smem:[#allocation9 + $0x2]] }
 0x11b   :  { %1082 = vst [vmem:[#allocation3 + $0x7] sm:$0x1] %v1081_v33  ;;  %v1208_v46 = vld [vmem:[%s1207_s7] sm:$0x1]  ;;  %s3501_s7 = sld [smem:[#allocation9 + $0x5]] }
 0x11c   :  { %214 = vst.msk [vmem:[#allocation5] sm:$0x1] %vm212_vm0, %v211_v38  ;;  %v1215_v48 = vld [vmem:[%s1214_s11] sm:$0x1] }
 0x11d   :  { %375 = vst.msk [vmem:[#allocation4 + $0x1] sm:$0x1] %vm212_vm0, %v351_v39  ;;  %v1222_v50 = vld [vmem:[%s1221_s12] sm:$0x1]  ;;  %s1479_s27 = scalar_lea.vmem %s3657_s3, %s3491_s10  ;;  %s1482_s0 = scalar_lea.vmem %s3656_s2, %s3491_s10 }
 0x11e   :  { %376 = vst.msk [vmem:[#allocation5 + $0x1] sm:$0x1] %vm212_vm0, %v374_v41  ;;  %v1229_v51 = vld [vmem:[%s1228_s1] sm:$0x1]  ;;  %s1521_s1 = scalar_lea.vmem %s3657_s3, %s3503_s28  ;;  %s3706_s12 = sld [smem:[#allocation23_spill]] }
 0x11f   :  { %v1236_v52 = vld [vmem:[%s1235_s23] sm:$0x1]  ;;  %s1500_s23 = scalar_lea.vmem %s3657_s3, %s3497_s6 }
 0x120   :  { %v1243_v53 = vld [vmem:[%s1242_s20] sm:$0x1]  ;;  %s1493_s5 = scalar_lea.vmem %s3657_s3, %s3495_s21  ;;  %s1496_s10 = scalar_lea.vmem %s3656_s2, %s3495_s21 }
 0x121   :  { %v1301_v43 = vld [vmem:[#allocation2] sm:$0xff]  ;;  %s1514_s22 = scalar_lea.vmem %s3657_s3, %s3501_s7  ;;  %s1489_s3 = scalar_lea.vmem %s3656_s2, %s3493_s18 }
 0x122   :  { %1318 = vmatpush.xpose.msrb.mxu2 %v1301_v43  ;;  %v1162_v45 = vld [vmem:[#allocation3] sm:$0xff]  ;;  %s1503_s18 = scalar_lea.vmem %s3656_s2, %s3497_s6  ;;  %s1510_s21 = scalar_lea.vmem %s3656_s2, %s3499_s29 }
 0x123   :  { %1195 = vst [vmem:[#allocation3] sm:$0x1] %v1194_v42  ;;  %1179 = vmatpush.xpose.msrb.mxu1 %v1162_v45 }
 0x124   :  { %1202 = vst [vmem:[#allocation3 + $0x1] sm:$0x1] %v1201_v44 }
 0x125   :  { %1209 = vst [vmem:[#allocation3 + $0x2] sm:$0x1] %v1208_v46  ;;  %1319 = vmatmul.f32.vlgmr.msrb.gmra.mxu2 %v1187_v47  ;;  %v672_v56 = vpop.f32.mrf.mxu2  ;;  %v1480_v46 = vld [vmem:[%s1479_s27] sm:$0x1] }
 0x126   :  { %1216 = vst [vmem:[#allocation3 + $0x3] sm:$0x1] %v1215_v48  ;;  %1180 = vmatmul.f32.vlgmr.msrb.gmra.mxu1 %v1026_v49  ;;  %v675_v57 = vmul.f32 14.285714, %v672_v56  ;;  %v1487_v47 = vld [vmem:[%s1486_s30] sm:$0x1]  ;;  %s1531_s30 = scalar_lea.vmem %s3656_s2, %s3505_s13 }
 0x127   :  { %1223 = vst [vmem:[#allocation3 + $0x4] sm:$0x1] %v1222_v50  ;;  %v1494_v48 = vld [vmem:[%s1493_s5] sm:$0x1] }
 0x128   :  { %1230 = vst [vmem:[#allocation3 + $0x5] sm:$0x1] %v1229_v51  ;;  %v1501_v50 = vld [vmem:[%s1500_s23] sm:$0x1] }
 0x129   :  { %1237 = vst [vmem:[#allocation3 + $0x6] sm:$0x1] %v1236_v52  ;;  %v1508_v51 = vld [vmem:[%s1507_s16] sm:$0x1]  ;;  %s1517_s16 = scalar_lea.vmem %s3656_s2, %s3501_s7 }
 0x12a   :  { %1244 = vst [vmem:[#allocation3 + $0x7] sm:$0x1] %v1243_v53  ;;  %v1515_v53 = vld [vmem:[%s1514_s22] sm:$0x1]  ;;  %s1524_s22 = scalar_lea.vmem %s3656_s2, %s3503_s28 }
 0x12b   :  { %699 = vst.msk [vmem:[#allocation4 + $0x3] sm:$0x1] %vm212_vm0, %v675_v57  ;;  %v1529_v56 = vld [vmem:[%s1528_s14] sm:$0x1] }
 0x12c   :  { %1481 = vst [vmem:[%s3705_s8] sm:$0x1] %v1480_v46  ;;  %v1483_v57 = vld [vmem:[%s1482_s0] sm:$0x1] }
 0x12d   :  { %1488 = vst [vmem:[%s3705_s8 + $0x1] sm:$0x1] %v1487_v47 }
 0x12e   :  { %1495 = vst [vmem:[%s3705_s8 + $0x2] sm:$0x1] %v1494_v48 }
 0x12f   :  { %1502 = vst [vmem:[%s3705_s8 + $0x3] sm:$0x1] %v1501_v50 }
 0x130   :  { %1509 = vst [vmem:[%s3705_s8 + $0x4] sm:$0x1] %v1508_v51 }
 0x131   :  { %v1324_v54 = vld [vmem:[#allocation3] sm:$0xff]  ;;  %1516 = vst [vmem:[%s3705_s8 + $0x5] sm:$0x1] %v1515_v53 }
 0x132   :  { %1341 = vmatpush.xpose.msrb.mxu3 %v1324_v54  ;;  %v1522_v54 = vld [vmem:[%s1521_s1] sm:$0x1]  ;;  %1530 = vst [vmem:[%s3705_s8 + $0x7] sm:$0x1] %v1529_v56 }
 0x133   :  { %v695_v58 = vpop.f32.mrf.mxu3  ;;  %1523 = vst [vmem:[%s3705_s8 + $0x6] sm:$0x1] %v1522_v54 }
 0x134   :  { %v698_v59 = vmul.f32 14.285714, %v695_v58  ;;  %v1490_v58 = vld [vmem:[%s1489_s3] sm:$0x1]  ;;  %1484 = vst [vmem:[%s3706_s12] sm:$0x1] %v1483_v57 }
 0x135   :  { %1342 = vmatmul.f32.vlgmr.msrb.gmra.mxu3 %v1188_v55  ;;  %1491 = vst [vmem:[%s3706_s12 + $0x1] sm:$0x1] %v1490_v58 }
 0x136   :  { %700 = vst.msk [vmem:[#allocation5 + $0x3] sm:$0x1] %vm212_vm0, %v698_v59  ;;  %v1497_v59 = vld [vmem:[%s1496_s10] sm:$0x1]  ;;  %s3707_s10 = sld [smem:[#allocation21_spill]] }
 0x137   :  { %1498 = vst [vmem:[%s3706_s12 + $0x2] sm:$0x1] %v1497_v59 }
 0x13c   :  { %s1581_s27 = sshll.u32 %s3707_s10, 4  ;;  %s1582_s27 = int_to_ptr.hbm [resolvable:$true] %s1581_s27 }
 0x154   :  { %v510_v60 = vpop.f32.mrf.mxu0 }
 0x155   :  { %v513_v61 = vmul.f32 14.285714, %v510_v60  ;;  %v533_v62 = vpop.f32.mrf.mxu1  ;;  %v1504_v60 = vld [vmem:[%s1503_s18] sm:$0x1] }
 0x156   :  { %v536_v63 = vmul.f32 14.285714, %v533_v62  ;;  %v1511_v62 = vld [vmem:[%s1510_s21] sm:$0x1]  ;;  %1505 = vst [vmem:[%s3706_s12 + $0x3] sm:$0x1] %v1504_v60 }
 0x157   :  { %537 = vst.msk [vmem:[#allocation4 + $0x2] sm:$0x1] %vm212_vm0, %v513_v61 }
 0x158   :  { %538 = vst.msk [vmem:[#allocation5 + $0x2] sm:$0x1] %vm212_vm0, %v536_v63 }
 0x159   :  { %1512 = vst [vmem:[%s3706_s12 + $0x4] sm:$0x1] %v1511_v62 }
 0x168   :  { %v996_v0 = vpop.f32.mrf.mxu2 }
 0x169   :  { %v999_v1 = vmul.f32 14.285714, %v996_v0  ;;  %v1536_v0 = vld [vmem:[%s3703_s4] sm:$0xff] }
 0x16b   :  { %1023 = vst.msk [vmem:[#allocation4 + $0x5] sm:$0x1] %vm212_vm0, %v999_v1  ;;  %v1518_v1 = vld [vmem:[%s1517_s16] sm:$0x1] }
 0x16c   :  { %1519 = vst [vmem:[%s3706_s12 + $0x5] sm:$0x1] %v1518_v1 }
 0x177   :  { %v1019_v2 = vpop.f32.mrf.mxu3  ;;  %v834_v4 = vpop.f32.mrf.mxu0 }
 0x178   :  { %v1022_v3 = vmul.f32 14.285714, %v1019_v2  ;;  %v837_v5 = vmul.f32 14.285714, %v834_v4  ;;  %v1525_v2 = vld [vmem:[%s1524_s22] sm:$0x1] }
 0x179   :  { %1526 = vst [vmem:[%s3706_s12 + $0x6] sm:$0x1] %v1525_v2 }
 0x17a   :  { %1024 = vst.msk [vmem:[#allocation5 + $0x5] sm:$0x1] %vm212_vm0, %v1022_v3 }
 0x17b   :  { %861 = vst.msk [vmem:[#allocation4 + $0x4] sm:$0x1] %vm212_vm0, %v837_v5  ;;  %v1532_v5 = vld [vmem:[%s1531_s30] sm:$0x1] }
 0x17c   :  { %1533 = vst [vmem:[%s3706_s12 + $0x7] sm:$0x1] %v1532_v5 }
 0x188   :  { %v857_v6 = vpop.f32.mrf.mxu1 }
 0x189   :  { %v860_v7 = vmul.f32 14.285714, %v857_v6 }
 0x18b   :  { %862 = vst.msk [vmem:[#allocation5 + $0x4] sm:$0x1] %vm212_vm0, %v860_v7  ;;  %v1537_v7 = vmul.f32 0.5, %v1536_v0 }
 0x193   :  { %v1158_v8 = vpop.f32.mrf.mxu0 }
 0x194   :  { %v1161_v9 = vmul.f32 14.285714, %v1158_v8 }
 0x196   :  { %1185 = vst.msk [vmem:[#allocation4 + $0x6] sm:$0x1] %vm212_vm0, %v1161_v9  ;;  %v1534_v9 = vld [vmem:[%s3705_s8] sm:$0xff] }
 0x1a3   :  { %v1181_v10 = vpop.f32.mrf.mxu1 }
 0x1a4   :  { %v1184_v11 = vmul.f32 14.285714, %v1181_v10 }
 0x1a6   :  { %1186 = vst.msk [vmem:[#allocation5 + $0x6] sm:$0x1] %vm212_vm0, %v1184_v11  ;;  %v1535_v11 = vmul.f32 0.5, %v1534_v9 }
 0x1a8   :  { %v1320_v12 = vpop.f32.mrf.mxu2 }
 0x1a9   :  { %v1323_v13 = vmul.f32 14.285714, %v1320_v12 }
 0x1ab   :  { %1347 = vst.msk [vmem:[#allocation4 + $0x7] sm:$0x1] %vm212_vm0, %v1323_v13 }
 0x1b2   :  { %v1349_v14 = vld [vmem:[#allocation4] sm:$0xff] }
 0x1b3   :  { %v1351_v15 = vsel %vm1350_vm1, %v1349_v14, -inf }
 0x1b4   :  { %1352 = vmax.xlane.f32.xlu0 %v1351_v15 }
 0x1b8   :  { %v1343_v16 = vpop.f32.mrf.mxu3 }
 0x1b9   :  { %v1346_v17 = vmul.f32 14.285714, %v1343_v16 }
 0x1bb   :  { %1348 = vst.msk [vmem:[#allocation5 + $0x7] sm:$0x1] %vm212_vm0, %v1346_v17 }
 0x1c2   :  { %v1412_v18 = vld [vmem:[#allocation5] sm:$0xff] }
 0x1c3   :  { %v1413_v19 = vsel %vm1350_vm1, %v1412_v18, -inf }
 0x1c4   :  { %1414 = vmax.xlane.f32.xlu0 %v1413_v19 }
 0x227   :  { %v1353_v20 = vpop.xlane.xlu0 %1352 }
 0x228   :  { %v1354_v21 = vrot.slane %v1353_v20, 4 }
 0x22a   :  { %v1355_v22 = vmax.f32 %v1353_v20, %v1354_v21 }
 0x22c   :  { %v1356_v23 = vrot.slane %v1355_v22, 2 }
 0x22e   :  { %v1357_v24 = vmax.f32 %v1355_v22, %v1356_v23 }
 0x230   :  { %v1358_v25 = vrot.slane %v1357_v24, 1 }
 0x232   :  { %v1359_v26 = vmax.f32 %v1357_v24, %v1358_v25  ;;  %v1539_v25 = vld [vmem:[%s3706_s12] sm:$0xff] }
 0x234   :  { %v1360_v27 = vsub.f32 %v1349_v14, %v1359_v26  ;;  %v3625_v14 = vadd.f32 %v1537_v7, %v1535_v11 }
 0x236   :  { %v1361_v28 = vmul.f32 1.442695, %v1360_v27  ;;  %v1544_v19 = vmul.f32 %v3625_v14, %v3625_v14  ;;  %v1540_v27 = vmul.f32 0.5, %v1539_v25 }
 0x237   :  { %v1415_v29 = vpop.xlane.xlu0 %1414 }
 0x238   :  { %v1416_v30 = vrot.slane %v1415_v29, 4  ;;  %2009 = vpow2.f32 %v1361_v28  ;;  %1545 = vadd.xlane.f32.xlu0 %v1544_v19 }
 0x23a   :  { %v1417_v31 = vmax.f32 %v1415_v29, %v1416_v30 }
 0x23c   :  { %v1418_v32 = vrot.slane %v1417_v31, 2 }
 0x23e   :  { %v3483_v33 = vpop.eup %2009  ;;  %v1419_v34 = vmax.f32 %v1417_v31, %v1418_v32 }
 0x23f   :  { %v1363_v35 = vsel %vm1350_vm1, %v3483_v33, 0.0 }
 0x240   :  { %v1420_v36 = vrot.slane %v1419_v34, 1  ;;  %1364 = vadd.xlane.f32.xlu1 %v1363_v35 }
 0x242   :  { %v1421_v37 = vmax.f32 %v1419_v34, %v1420_v36 }
 0x244   :  { %v1422_v38 = vsub.f32 %v1412_v18, %v1421_v37  ;;  %v1541_v18 = vld [vmem:[%s3704_s25] sm:$0xff] }
 0x245   :  { %v1542_v23 = vmul.f32 0.5, %v1541_v18 }
 0x246   :  { %v1423_v39 = vmul.f32 1.442695, %v1422_v38 }
 0x247   :  { %v3635_v29 = vadd.f32 %v1542_v23, %v1540_v27 }
 0x248   :  { %2011 = vpow2.f32 %v1423_v39 }
 0x249   :  { %v1559_v31 = vmul.f32 %v3635_v29, %v3635_v29 }
 0x24e   :  { %v3487_v40 = vpop.eup %2011 }
 0x24f   :  { %v1425_v41 = vsel %vm1350_vm1, %v3487_v40, 0.0 }
 0x250   :  { %1426 = vadd.xlane.f32.xlu1 %v1425_v41 }
 0x258   :  { %1560 = vadd.xlane.f32.xlu1 %v1559_v31 }
 0x2ab   :  { %v1546_v53 = vpop.xlane.xlu0 %1545 }
 0x2ac   :  { %vm1553_vm10 = vweird.f32 %v1546_v53 }
 0x2b3   :  { %v1365_v42 = vpop.xlane.xlu1 %1364 }
 0x2b4   :  { %v1366_v43 = vrot.slane %v1365_v42, 4 }
 0x2b6   :  { %v1367_v44 = vadd.f32 %v1366_v43, %v1365_v42 }
 0x2b8   :  { %v1368_v45 = vrot.slane %v1367_v44, 2 }
 0x2ba   :  { %v1369_v49 = vadd.f32 %v1368_v45, %v1367_v44 }
 0x2bc   :  { %v1370_v52 = vrot.slane %v1369_v49, 1 }
 0x2be   :  { %v1371_v55 = vadd.f32 %v1370_v52, %v1369_v49 }
 0x2c0   :  { %2013 = vrcp.f32 %v1371_v55  ;;  %v1383_v13 = vand.u32 2147483648, %v1371_v55  ;;  %v1381_v16 = vand.u32 2147483647, %v1371_v55  ;;  %vm1377_vm3 = vweird.f32 %v1371_v55 }
 0x2c2   :  { %v1384_v22 = vor.u32 1.1754944e-38, %v1383_v13  ;;  %vm1382_vm5 = vcmp.eq.f32.partialorder %v1381_v16, 8.507059e+37 }
 0x2c3   :  { %v1427_v61 = vpop.xlane.xlu1 %1426 }
 0x2c4   :  { %v1428_v63 = vrot.slane %v1427_v61, 4 }
 0x2c6   :  { %v2014_v3 = vpop.eup %2013  ;;  %v1429_v4 = vadd.f32 %v1428_v63, %v1427_v61 }
 0x2c7   :  { %v1373_v6 = vmul.f32 %v2014_v3, %v1371_v55  ;;  %vm1378_vm2 = vweird.f32 %v2014_v3 }
 0x2c8   :  { %v1430_v8 = vrot.slane %v1429_v4, 2  ;;  %vm1379_vm4 = vmor %vm1377_vm3, %vm1378_vm2 }
 0x2c9   :  { %v1374_v10 = vsub.f32 1.0, %v1373_v6 }
 0x2ca   :  { %v1431_v12 = vadd.f32 %v1430_v8, %v1429_v4 }
 0x2cb   :  { %v1375_v15 = vmul.f32 %v2014_v3, %v1374_v10  ;;  %v1561_v55 = vpop.xlane.xlu1 %1560 }
 0x2cc   :  { %v1432_v17 = vrot.slane %v1431_v12, 1  ;;  %vm1568_vm14 = vweird.f32 %v1561_v55 }
 0x2cd   :  { %v1376_v20 = vadd.f32 %v2014_v3, %v1375_v15 }
 0x2ce   :  { %v1433_v21 = vadd.f32 %v1432_v17, %v1431_v12 }
 0x2cf   :  { %v1380_v24 = vsel %vm1379_vm4, %v2014_v3, %v1376_v20 }
 0x2d0   :  { %2015 = vrcp.f32 %v1433_v21  ;;  %v1385_v26 = vsel %vm1382_vm5, %v1384_v22, %v1380_v24  ;;  %v1445_v37 = vand.u32 2147483648, %v1433_v21  ;;  %v1443_v39 = vand.u32 2147483647, %v1433_v21 }
 0x2d1   :  { %v1386_v28 = vmul.f32 2.0, %v1385_v26  ;;  %vm1439_vm7 = vweird.f32 %v1433_v21 }
 0x2d2   :  { %v1446_v44 = vor.u32 1.1754944e-38, %v1445_v37  ;;  %vm1444_vm9 = vcmp.eq.f32.partialorder %v1443_v39, 8.507059e+37 }
 0x2d3   :  { %v1387_v30 = vmul.f32 %v3483_v33, %v1386_v28 }
 0x2d5   :  { %v1398_v32 = vadd.f32 0.2343751, %v1387_v30 }
 0x2d6   :  { %v2016_v34 = vpop.eup %2015 }
 0x2d7   :  { %v1435_v35 = vmul.f32 %v2016_v34, %v1433_v21  ;;  %2017 = vlog2.f32 %v1398_v32  ;;  %vm1440_vm6 = vweird.f32 %v2016_v34 }
 0x2d8   :  { %vm1441_vm8 = vmor %vm1439_vm7, %vm1440_vm6 }
 0x2d9   :  { %v1436_v36 = vsub.f32 1.0, %v1435_v35 }
 0x2db   :  { %v1437_v38 = vmul.f32 %v2016_v34, %v1436_v36 }
 0x2dd   :  { %v2018_v41 = vpop.eup %2017  ;;  %v1438_v42 = vadd.f32 %v2016_v34, %v1437_v38 }
 0x2de   :  { %v1400_v43 = vmul.f32 0.6931472, %v2018_v41 }
 0x2df   :  { %v1442_v33 = vsel %vm1441_vm8, %v2016_v34, %v1438_v42 }
 0x2e0   :  { %v1401_v45 = vsel %vm1350_vm1, %v1400_v43, 0.0  ;;  %v1447_v46 = vsel %vm1444_vm9, %v1446_v44, %v1442_v33 }
 0x2e1   :  { %1402 = vadd.xlane.f32.xlu2 %v1401_v45  ;;  %v1448_v47 = vmul.f32 2.0, %v1447_v46 }
 0x2e3   :  { %v1449_v48 = vmul.f32 %v3487_v40, %v1448_v47 }
 0x2e5   :  { %v1459_v49 = vadd.f32 0.2343751, %v1449_v48 }
 0x2e7   :  { %2019 = vlog2.f32 %v1459_v49 }
 0x2e8   :  { %2021 = vrsqrt.f32 %v1546_v53 }
 0x2e9   :  { %2023 = vlog2.f32 %v1387_v30 }
 0x2ea   :  { %2025 = vlog2.f32 %v1449_v48 }
 0x2eb   :  { %2027 = vrsqrt.f32 %v1561_v55 }
 0x2ed   :  { %v2020_v50 = vpop.eup %2019 }
 0x2ee   :  { %v1461_v51 = vmul.f32 0.6931472, %v2020_v50  ;;  %v2022_v54 = vpop.eup %2021 }
 0x2ef   :  { %v1548_v56 = vmul.f32 %v2022_v54, %v1546_v53  ;;  %vm1554_vm11 = vweird.f32 %v2022_v54  ;;  %v2024_v40 = vpop.eup %2023 }
 0x2f0   :  { %v1462_v52 = vsel %vm1350_vm1, %v1461_v51, 0.0  ;;  %v2026_v59 = vpop.eup %2025  ;;  %vm1555_vm12 = vmor %vm1553_vm10, %vm1554_vm11  ;;  %v1389_v62 = vmul.f32 0.6931472, %v2024_v40  ;;  %vm1476_vm1 = vcmask 0  }
 0x2f1   :  { %1463 = vadd.xlane.f32.xlu2 %v1462_v52  ;;  %v1549_v57 = vmul.f32 %v2022_v54, %v1548_v56  ;;  %v2028_v61 = vpop.eup %2027  ;;  %v1451_v1 = vmul.f32 0.6931472, %v2026_v59 }
 0x2f2   :  { %v1563_v63 = vmul.f32 %v2028_v61, %v1561_v55  ;;  %v1391_v6 = vsel %vm1390_vm13, %v1389_v62, 0.0  ;;  %vm1569_vm15 = vweird.f32 %v2028_v61 }
 0x2f3   :  { %v1550_v58 = vmul.f32 0.5, %v1549_v57  ;;  %v1452_v9 = vsel %vm1390_vm13, %v1451_v1, 0.0  ;;  %v1392_v11 = vrot.slane %v1391_v6, 4  ;;  %vm1570_vm0 = vmor %vm1568_vm14, %vm1569_vm15 }
 0x2f4   :  { %v1564_v2 = vmul.f32 %v2028_v61, %v1563_v63  ;;  %v1453_v13 = vrot.slane %v1452_v9, 4 }
 0x2f5   :  { %v1551_v60 = vsub.f32 1.5, %v1550_v58  ;;  %v1393_v17 = vadd.f32 %v1392_v11, %v1391_v6 }
 0x2f6   :  { %v1565_v7 = vmul.f32 0.5, %v1564_v2  ;;  %v1454_v19 = vadd.f32 %v1453_v13, %v1452_v9 }
 0x2f7   :  { %v1552_v0 = vmul.f32 %v2022_v54, %v1551_v60  ;;  %v1394_v20 = vrot.slane %v1393_v17, 2 }
 0x2f8   :  { %v1566_v10 = vsub.f32 1.5, %v1565_v7  ;;  %v1455_v22 = vrot.slane %v1454_v19, 2 }
 0x2f9   :  { %v1556_v3 = vsel %vm1555_vm12, %v2022_v54, %v1552_v0  ;;  %v1395_v25 = vadd.f32 %v1394_v20, %v1393_v17 }
 0x2fa   :  { %v1557_v5 = vmul.f32 %v1556_v3, %v3625_v14  ;;  %v1567_v12 = vmul.f32 %v2028_v61, %v1566_v10  ;;  %v1456_v27 = vadd.f32 %v1455_v22, %v1454_v19 }
 0x2fb   :  { %v1396_v31 = vrot.slane %v1395_v25, 1 }
 0x2fc   :  { %1558 = vst [vmem:[%s3705_s8] sm:$0xff] %v1557_v5  ;;  %v1571_v16 = vsel %vm1570_vm0, %v2028_v61, %v1567_v12  ;;  %v1457_v34 = vrot.slane %v1456_v27, 1  ;;  %s2085_s8 = smov [#allocation11]  }
 0x2fd   :  { %v1572_v14 = vmul.f32 %v1571_v16, %v3635_v29  ;;  %v1397_v36 = vadd.f32 %v1396_v31, %v1395_v25 }
 0x2fe   :  { %v1458_v37 = vadd.f32 %v1457_v34, %v1456_v27 }
 0x2ff   :  { %1573 = vst [vmem:[%s3706_s12] sm:$0xff] %v1572_v14  ;;  %s1579_s12 = sshll.u32 %s2085_s8, 4  ;;  %s1580_s12 = int_to_ptr.vmem [resolvable:$true] %s1579_s12 }
 0x354   :  { %v1403_v4 = vpop.xlane.xlu2 %1402 }
 0x355   :  { %v1404_v8 = vrot.slane %v1403_v4, 4 }
 0x357   :  { %v1405_v15 = vadd.f32 %v1404_v8, %v1403_v4 }
 0x359   :  { %v1406_v18 = vrot.slane %v1405_v15, 2 }
 0x35b   :  { %v1407_v21 = vadd.f32 %v1406_v18, %v1405_v15 }
 0x35d   :  { %v1408_v26 = vrot.slane %v1407_v21, 1 }
 0x35f   :  { %v1409_v32 = vadd.f32 %v1408_v26, %v1407_v21 }
 0x361   :  { %v1410_v39 = vsub.f32 %v1397_v36, %v1409_v32 }
 0x363   :  { %v1411_v42 = vadd.f32 -174.09995, %v1410_v39 }
 0x364   :  { %v1464_v23 = vpop.xlane.xlu2 %1463 }
 0x365   :  { %v1465_v24 = vrot.slane %v1464_v23, 4 }
 0x367   :  { %v1466_v28 = vadd.f32 %v1465_v24, %v1464_v23 }
 0x369   :  { %v1467_v30 = vrot.slane %v1466_v28, 2 }
 0x36b   :  { %v1468_v29 = vadd.f32 %v1467_v30, %v1466_v28 }
 0x36d   :  { %v1469_v35 = vrot.slane %v1468_v29, 1 }
 0x36f   :  { %v1470_v38 = vadd.f32 %v1469_v35, %v1468_v29 }
 0x371   :  { %v1471_v41 = vsub.f32 %v1458_v37, %v1470_v38 }
 0x373   :  { %v1472_v43 = vadd.f32 -174.09995, %v1471_v41 }
 0x375   :  { %v1473_v44 = vadd.f32 %v1472_v43, %v1411_v42 }
 0x377   :  { %v1474_v33 = vsub.f32 0.0, %v1473_v44 }
 0x379   :  { %v1475_v45 = vmul.f32 0.125, %v1474_v33 }
 0x37b   :  { %1477 = vst.msk [vmem:[#allocation11] sm:$0x1] %vm1476_vm1, %v1475_v45 }
 0x37c   :  { %1584 = dma.vmem_to_hbm [thread:$0]  %s1580_s12, 16, %s1582_s27, [#allocation7]  }
 0x37d   :  { %2081 = dma.done.wait [#allocation7], 16  }
 0x37e   :  { %2082 = vsyncadd [#allocation7], 4294967280 }
 0x37f   :  { %1597 = vsyncpa [#allocation7], 1 }
 0x380   :  { %1598 = vsyncpa [#allocation8], 1 }
 0x381   :  { %1599 = vsyncpa [#allocation10], 1 }

</bundles_post_ra>
